<compile_context>
chip_gen: v6e
topology: v6e:2x2x1
jax: 0.10.0
libtpu: 0.0.40
codegen_flags: <defaults>
</compile_context>

<pallas_src>
import numpy as np
import jax
import jax.numpy as jnp
from jax.experimental import pallas as pl
from jax.experimental.pallas import tpu as pltpu


TTL1 = dict(size_in=(16, 16, 16, 16), size_out=(8, 8, 8, 8), ranks=(1, 3, 3, 3, 1))
TTL2 = dict(size_in=(8, 8, 8, 8), size_out=(4, 4, 4, 4), ranks=(1, 2, 2, 2, 1))
TTL3 = dict(size_in=(4, 4, 4, 4), size_out=(2, 4, 2, 4), ranks=(1, 2, 2, 2, 1))

LANE = 128   # lane padding of every layer's per-rank output block


# ----------------------------- fused Pallas kernel ---------------------------

def _fused_tt_net_kernel(x_ref, gb1_ref, ga1_ref, b1_ref,
                         gb2_ref, ga2_ref, b2_ref,
                         gb3_ref, ga3_ref, b3_ref,
                         wu_ref, sel_ref, rsel_ref, gsum_ref, bl_ref,
                         o_ref, h2_s, h3_s, y3_s):
    """Whole BasicTT forward for one block of `bt` samples (resident in VMEM)."""
    bt = x_ref.shape[0] // ga1_ref.shape[2]        # rows per sample = n01 of layer 1

    def tt_layer(h_block, gb_ref, ga_ref, bias_ref, out_s):
        """relu(sum_r GA[r] @ (h @ GB[r]) + bias) for every sample of the block."""
        r, m01, n01 = ga_ref.shape
        mp = gb_ref.shape[1] // r                  # lane-padded rank block (= LANE)
        # ONE batched MXU matmul covers the GB contraction for all ranks+samples.
        s = jnp.dot(h_block, gb_ref[...], preferred_element_type=jnp.float32)
        bias = bias_ref[...]
        for b in range(bt):                        # bt small & static -> unrolled
            sb = s[b * n01:(b + 1) * n01, :]
            acc = None
            for rho in range(r):                   # rank 2/3 -> unrolled
                blk = sb[:, rho * mp:(rho + 1) * mp].astype(jnp.bfloat16)
                t = jnp.dot(ga_ref[rho], blk, preferred_element_type=jnp.float32)
                acc = t if acc is None else acc + t
            out_s[b * m01:(b + 1) * m01, :] = jnp.maximum(acc + bias, 0.0)

    tt_layer(x_ref[...], gb1_ref, ga1_ref, b1_ref, h2_s)                       # -> [bt*64, 128]
    tt_layer(h2_s[...].astype(jnp.bfloat16), gb2_ref, ga2_ref, b2_ref, h3_s)   # -> [bt*16, 128]
    tt_layer(h3_s[...].astype(jnp.bfloat16), gb3_ref, ga3_ref, b3_ref, y3_s)   # -> [bt*8, 128]

    # ---- fused nn.Linear(64, 10): 3 tiny batched matmuls, one block store ----
    u = jnp.dot(y3_s[...].astype(jnp.bfloat16), wu_ref[...],
                preferred_element_type=jnp.float32)                    # [bt*8, 80]
    v = (u * sel_ref[...]).astype(jnp.bfloat16)                        # keep matching i01 block
    w8 = jnp.dot(v, rsel_ref[...], preferred_element_type=jnp.float32)  # [bt*8, 10]
    logits = jnp.dot(gsum_ref[...], w8,
                     preferred_element_type=jnp.float32) + bl_ref[...]  # [bt, 10]
    o_ref[...] = logits


# ------------------------- parameter preprocessing ---------------------------

def _merge_pair(g_left, g_right):
    """[rl,m0,n0,rm] x [rm,m1,n1,rr] -> [rl, m0*m1, n0*n1, rr] (contract shared rank)."""
    m = jnp.einsum('aijb,bklc->aikjlc', g_left, g_right,
                   precision=jax.lax.Precision.HIGHEST)
    rl, m0, m1, n0, n1, rr = m.shape
    return m.reshape(rl, m0 * m1, n0 * n1, rr)


def _prep_tt_layer(layer, in_pad):
    c = layer["cores"]
    ga = _merge_pair(c[0], c[1])[0]                 # [m01, n01, r]
    gb = _merge_pair(c[2], c[3])[..., 0]            # [r, m23, n23]
    r, m23, n23 = gb.shape
    ga_stack = jnp.transpose(ga, (2, 0, 1)).astype(jnp.bfloat16)       # [r, m01, n01]
    # lane-padded, rank-concatenated right factor: [in_pad, r*LANE]
    gbp = jnp.zeros((r, in_pad, LANE), jnp.float32)
    gbp = gbp.at[:, :n23, :m23].set(jnp.transpose(gb, (0, 2, 1)))      # place [r, n23, m23]
    gb_cat = jnp.transpose(gbp, (1, 0, 2)).reshape(in_pad, r * LANE).astype(jnp.bfloat16)
    m0, m1, m2, m3 = layer["bias"].shape
    bias2d = layer["bias"].reshape(m0 * m1, m2 * m3).astype(jnp.float32)
    bias2d = jnp.pad(bias2d, ((0, 0), (0, LANE - m2 * m3)))
    return gb_cat, ga_stack, bias2d


def prepare_pallas_params(params):
    # final linear: W[c, i01*8+i23] -> wu[i23, i01*10+c], lane-padded to 128 rows
    w3d = params["linear"]["weight"].reshape(10, 8, 8)
    wu = jnp.transpose(w3d, (2, 1, 0)).reshape(8, 80)
    wu = jnp.pad(wu, ((0, LANE - 8), (0, 0))).astype(jnp.bfloat16)             # [128, 80]
    rsel = jnp.tile(jnp.eye(10, dtype=jnp.float32), (8, 1)).astype(jnp.bfloat16)  # [80, 10]
    bl = params["linear"]["bias"].reshape(1, 10).astype(jnp.float32)
    return dict(ttl1=_prep_tt_layer(params["ttl1"], in_pad=256),
                ttl2=_prep_tt_layer(params["ttl2"], in_pad=LANE),
                ttl3=_prep_tt_layer(params["ttl3"], in_pad=LANE),
                wu=wu, rsel=rsel, bl=bl)


# --------------------------------- wrapper -----------------------------------

def _full_spec(arr):
    nd = arr.ndim
    return pl.BlockSpec(arr.shape, lambda i, _nd=nd: (0,) * _nd)


@jax.jit
def basic_tt_forward_pallas(x, prepped):
    B = x.shape[0]
    bt = B if B <= 8 else 8                          # samples per grid step
    assert B % bt == 0, "batch must be divisible by the per-step block"
    x2 = x.reshape(B * 256, 256).astype(jnp.bfloat16)          # [B*n01, n23]

    gb1, ga1, b1 = prepped["ttl1"]
    gb2, ga2, b2 = prepped["ttl2"]
    gb3, ga3, b3 = prepped["ttl3"]
    # constant selector matrices for the fused linear head (depend only on bt)
    sel = (jnp.arange(bt * 8)[:, None] % 8 ==
           jnp.arange(80)[None, :] // 10).astype(jnp.float32)            # [bt*8, 80]
    gsum = (jnp.arange(bt)[:, None] ==
            jnp.arange(bt * 8)[None, :] // 8).astype(jnp.float32)        # [bt, bt*8]
    weights = (gb1, ga1, b1, gb2, ga2, b2, gb3, ga3, b3,
               prepped["wu"], sel, prepped["rsel"], gsum, prepped["bl"])

    return pl.pallas_call(
        _fused_tt_net_kernel,
        out_shape=jax.ShapeDtypeStruct((B, 10), jnp.float32),
        grid=(B // bt,),
        in_specs=[pl.BlockSpec((bt * 256, 256), lambda i: (i, 0))]
                 + [_full_spec(w) for w in weights],
        out_specs=pl.BlockSpec((bt, 10), lambda i: (i, 0)),
        scratch_shapes=[pltpu.VMEM((bt * 64, LANE), jnp.float32),
                        pltpu.VMEM((bt * 16, LANE), jnp.float32),
                        pltpu.VMEM((bt * 8, LANE), jnp.float32)],
        compiler_params=pltpu.CompilerParams(
            dimension_semantics=("parallel",)),
    )(x2, *weights)


# ------------------------ pure-JAX reference (check) --------------------------

def _ref_tt_layer(x, cores, bias):
    hp = jax.lax.Precision.HIGHEST
    g0, g1, g2, g3 = cores
    t = jnp.einsum('Bwxyz,rlz->Bwxyrl', x, g3[..., 0], precision=hp)
    t = jnp.einsum('Bwxyrl,qkyr->Bwxqkl', t, g2, precision=hp)
    t = jnp.einsum('Bwxqkl,pjxq->Bwpjkl', t, g1, precision=hp)
    t = jnp.einsum('Bwpjkl,iwp->Bijkl', t, g0[0], precision=hp)
    return jnp.maximum(t + bias[None], 0.0)


@jax.jit
def ref_forward(x, params):
    h = _ref_tt_layer(x, params["ttl1"]["cores"], params["ttl1"]["bias"])
    h = _ref_tt_layer(h, params["ttl2"]["cores"], params["ttl2"]["bias"])
    h = _ref_tt_layer(h, params["ttl3"]["cores"], params["ttl3"]["bias"])
    h = h.reshape(h.shape[0], -1)                                   # [B, 64]
    return jnp.matmul(h, params["linear"]["weight"].T,
                      precision=jax.lax.Precision.HIGHEST) + params["linear"]["bias"]


# ----------------------- deterministic parameter init -------------------------

def init_tt_layer(key, size_in, size_out, ranks):
    d = len(size_in)
    interior = int(np.prod(ranks[1:-1], dtype=np.int64))
    var_w = 2.0 / float(np.prod(size_in, dtype=np.int64))        # He-like target
    core_std = float((var_w / interior) ** (1.0 / (2.0 * d)))
    cores = []
    for k in range(d):
        key, sub = jax.random.split(key)
        shape = (ranks[k], size_out[k], size_in[k], ranks[k + 1])
        cores.append(core_std * jax.random.normal(sub, shape, jnp.float32))
    key, kb = jax.random.split(key)
    bias = 0.1 * jax.random.normal(kb, size_out, jnp.float32)
    return key, dict(cores=cores, bias=bias)


def init_params(key):
    key, ttl1 = init_tt_layer(key, **TTL1)
    key, ttl2 = init_tt_layer(key, **TTL2)
    key, ttl3 = init_tt_layer(key, **TTL3)
    key, kw, kb = jax.random.split(key, 3)
    bound = 1.0 / float(np.sqrt(64.0))
    lin_w = jax.random.uniform(kw, (10, 64), jnp.float32, -bound, bound)
    lin_b = jax.random.uniform(kb, (10,), jnp.float32, -bound, bound)
    return dict(ttl1=ttl1, ttl2=ttl2, ttl3=ttl3,
                linear=dict(weight=lin_w, bias=lin_b))


# ------------------------------------ main ------------------------------------

if __name__ == "__main__":
    key = jax.random.PRNGKey(0)
    key, kx = jax.random.split(key)
    params = init_params(key)
    # batch=2; the TT layers fix the mode shape to [16, 16, 16, 16]
    x = jax.random.normal(kx, (2, 16, 16, 16, 16), jnp.float32)

    prepped = prepare_pallas_params(params)        # one-time TT-core pair merging

    out = jax.block_until_ready(basic_tt_forward_pallas(x, prepped))
    ref = jax.block_until_ready(ref_forward(x, params))

    assert out.shape == (2, 10) and out.dtype == jnp.float32
    np.testing.assert_allclose(np.asarray(out), np.asarray(ref), rtol=5e-2, atol=5e-2)
    print("KERNEL_OK")
</pallas_src>

<mosaic_0001>
module attributes {stable_mosaic.version = 11 : i64} {
  func.func @_fused_tt_net_kernel(%arg0: i32, %arg1: memref<512x256xbf16, #tpu.memory_space<vmem>>, %arg2: memref<256x384xbf16, #tpu.memory_space<vmem>>, %arg3: memref<3x64x256xbf16, #tpu.memory_space<vmem>>, %arg4: memref<64x128xf32, #tpu.memory_space<vmem>>, %arg5: memref<128x256xbf16, #tpu.memory_space<vmem>>, %arg6: memref<2x16x64xbf16, #tpu.memory_space<vmem>>, %arg7: memref<16x128xf32, #tpu.memory_space<vmem>>, %arg8: memref<128x256xbf16, #tpu.memory_space<vmem>>, %arg9: memref<2x8x16xbf16, #tpu.memory_space<vmem>>, %arg10: memref<8x128xf32, #tpu.memory_space<vmem>>, %arg11: memref<128x80xbf16, #tpu.memory_space<vmem>>, %arg12: memref<16x80xf32, #tpu.memory_space<vmem>>, %arg13: memref<80x10xbf16, #tpu.memory_space<vmem>>, %arg14: memref<2x16xf32, #tpu.memory_space<vmem>>, %arg15: memref<1x10xf32, #tpu.memory_space<vmem>>, %arg16: memref<2x10xf32, #tpu.memory_space<vmem>>, %arg17: memref<128x128xf32, #tpu.memory_space<vmem>>, %arg18: memref<32x128xf32, #tpu.memory_space<vmem>>, %arg19: memref<16x128xf32, #tpu.memory_space<vmem>>) attributes {dimension_semantics = [#tpu.dimension_semantics<parallel>], iteration_bounds = array<i64: 1>, scalar_prefetch = 0 : i64, scratch_operands = 3 : i64, tpu.core_type = #tpu.core_type<tc>, window_params = [{transform_indices = @transform_0, window_bounds = array<i64: 512, 256>}, {pipeline_mode = #tpu.pipeline_mode<synchronous>, transform_indices = @transform_1, window_bounds = array<i64: 256, 384>}, {pipeline_mode = #tpu.pipeline_mode<synchronous>, transform_indices = @transform_2, window_bounds = array<i64: 3, 64, 256>}, {pipeline_mode = #tpu.pipeline_mode<synchronous>, transform_indices = @transform_3, window_bounds = array<i64: 64, 128>}, {pipeline_mode = #tpu.pipeline_mode<synchronous>, transform_indices = @transform_4, window_bounds = array<i64: 128, 256>}, {pipeline_mode = #tpu.pipeline_mode<synchronous>, transform_indices = @transform_5, window_bounds = array<i64: 2, 16, 64>}, {pipeline_mode = #tpu.pipeline_mode<synchronous>, transform_indices = @transform_6, window_bounds = array<i64: 16, 128>}, {pipeline_mode = #tpu.pipeline_mode<synchronous>, transform_indices = @transform_7, window_bounds = array<i64: 128, 256>}, {pipeline_mode = #tpu.pipeline_mode<synchronous>, transform_indices = @transform_8, window_bounds = array<i64: 2, 8, 16>}, {pipeline_mode = #tpu.pipeline_mode<synchronous>, transform_indices = @transform_9, window_bounds = array<i64: 8, 128>}, {pipeline_mode = #tpu.pipeline_mode<synchronous>, transform_indices = @transform_10, window_bounds = array<i64: 128, 80>}, {pipeline_mode = #tpu.pipeline_mode<synchronous>, transform_indices = @transform_11, window_bounds = array<i64: 16, 80>}, {pipeline_mode = #tpu.pipeline_mode<synchronous>, transform_indices = @transform_12, window_bounds = array<i64: 80, 10>}, {pipeline_mode = #tpu.pipeline_mode<synchronous>, transform_indices = @transform_13, window_bounds = array<i64: 2, 16>}, {pipeline_mode = #tpu.pipeline_mode<synchronous>, transform_indices = @transform_14, window_bounds = array<i64: 1, 10>}, {transform_indices = @transform_15, window_bounds = array<i64: 2, 10>}]} {
    %c0 = arith.constant 0 : index
    %c0_0 = arith.constant 0 : index
    %0 = vector.load %arg1[%c0, %c0_0] : memref<512x256xbf16, #tpu.memory_space<vmem>>, vector<512x256xbf16>
    %c0_1 = arith.constant 0 : index
    %c0_2 = arith.constant 0 : index
    %1 = vector.load %arg2[%c0_1, %c0_2] : memref<256x384xbf16, #tpu.memory_space<vmem>>, vector<256x384xbf16>
    %cst = arith.constant dense<0.000000e+00> : vector<512x384xf32>
    %2 = tpu.matmul %0, %1, %cst {dimension_numbers = #tpu.dot_dimension_numbers<[1], [0], [0], [1], [0, 0, 1, 1], [], []>} : vector<512x256xbf16>, vector<256x384xbf16>, vector<512x384xf32> -> vector<512x384xf32>
    %c0_3 = arith.constant 0 : index
    %c0_4 = arith.constant 0 : index
    %3 = vector.load %arg4[%c0_3, %c0_4] : memref<64x128xf32, #tpu.memory_space<vmem>>, vector<64x128xf32>
    %4 = vector.extract_strided_slice %2 {offsets = [0, 0], sizes = [256, 384], strides = [1, 1]} : vector<512x384xf32> to vector<256x384xf32>
    %5 = vector.extract_strided_slice %4 {offsets = [0, 0], sizes = [256, 128], strides = [1, 1]} : vector<256x384xf32> to vector<256x128xf32>
    %6 = arith.truncf %5 : vector<256x128xf32> to vector<256x128xbf16>
    %c0_5 = arith.constant 0 : index
    %c0_6 = arith.constant 0 : index
    %c0_7 = arith.constant 0 : index
    %7 = vector.load %arg3[%c0_5, %c0_6, %c0_7] : memref<3x64x256xbf16, #tpu.memory_space<vmem>>, vector<1x64x256xbf16>
    %8 = vector.shape_cast %7 : vector<1x64x256xbf16> to vector<64x256xbf16>
    %cst_8 = arith.constant dense<0.000000e+00> : vector<64x128xf32>
    %9 = tpu.matmul %8, %6, %cst_8 {dimension_numbers = #tpu.dot_dimension_numbers<[1], [0], [0], [1], [0, 0, 1, 1], [], []>} : vector<64x256xbf16>, vector<256x128xbf16>, vector<64x128xf32> -> vector<64x128xf32>
    %10 = vector.extract_strided_slice %4 {offsets = [0, 128], sizes = [256, 128], strides = [1, 1]} : vector<256x384xf32> to vector<256x128xf32>
    %11 = arith.truncf %10 : vector<256x128xf32> to vector<256x128xbf16>
    %c1 = arith.constant 1 : index
    %c0_9 = arith.constant 0 : index
    %c0_10 = arith.constant 0 : index
    %12 = vector.load %arg3[%c1, %c0_9, %c0_10] : memref<3x64x256xbf16, #tpu.memory_space<vmem>>, vector<1x64x256xbf16>
    %13 = vector.shape_cast %12 : vector<1x64x256xbf16> to vector<64x256xbf16>
    %cst_11 = arith.constant dense<0.000000e+00> : vector<64x128xf32>
    %14 = tpu.matmul %13, %11, %cst_11 {dimension_numbers = #tpu.dot_dimension_numbers<[1], [0], [0], [1], [0, 0, 1, 1], [], []>} : vector<64x256xbf16>, vector<256x128xbf16>, vector<64x128xf32> -> vector<64x128xf32>
    %15 = arith.addf %9, %14 : vector<64x128xf32>
    %16 = vector.extract_strided_slice %4 {offsets = [0, 256], sizes = [256, 128], strides = [1, 1]} : vector<256x384xf32> to vector<256x128xf32>
    %17 = arith.truncf %16 : vector<256x128xf32> to vector<256x128xbf16>
    %c2 = arith.constant 2 : index
    %c0_12 = arith.constant 0 : index
    %c0_13 = arith.constant 0 : index
    %18 = vector.load %arg3[%c2, %c0_12, %c0_13] : memref<3x64x256xbf16, #tpu.memory_space<vmem>>, vector<1x64x256xbf16>
    %19 = vector.shape_cast %18 : vector<1x64x256xbf16> to vector<64x256xbf16>
    %cst_14 = arith.constant dense<0.000000e+00> : vector<64x128xf32>
    %20 = tpu.matmul %19, %17, %cst_14 {dimension_numbers = #tpu.dot_dimension_numbers<[1], [0], [0], [1], [0, 0, 1, 1], [], []>} : vector<64x256xbf16>, vector<256x128xbf16>, vector<64x128xf32> -> vector<64x128xf32>
    %21 = arith.addf %15, %20 : vector<64x128xf32>
    %22 = arith.addf %21, %3 : vector<64x128xf32>
    %cst_15 = arith.constant 0.000000e+00 : f32
    %23 = vector.broadcast %cst_15 : f32 to vector<64x128xf32>
    %24 = arith.maximumf %22, %23 : vector<64x128xf32>
    %c0_16 = arith.constant 0 : index
    %c0_17 = arith.constant 0 : index
    %25 = vector.load %arg17[%c0_16, %c0_17] : memref<128x128xf32, #tpu.memory_space<vmem>>, vector<64x128xf32>
    tpu.vector_store %arg17[%c0_16, %c0_17], %24 {strides = array<i32>} : memref<128x128xf32, #tpu.memory_space<vmem>>, vector<64x128xf32>,
    %26 = vector.extract_strided_slice %2 {offsets = [256, 0], sizes = [256, 384], strides = [1, 1]} : vector<512x384xf32> to vector<256x384xf32>
    %27 = vector.extract_strided_slice %26 {offsets = [0, 0], sizes = [256, 128], strides = [1, 1]} : vector<256x384xf32> to vector<256x128xf32>
    %28 = arith.truncf %27 : vector<256x128xf32> to vector<256x128xbf16>
    %c0_18 = arith.constant 0 : index
    %c0_19 = arith.constant 0 : index
    %c0_20 = arith.constant 0 : index
    %29 = vector.load %arg3[%c0_18, %c0_19, %c0_20] : memref<3x64x256xbf16, #tpu.memory_space<vmem>>, vector<1x64x256xbf16>
    %30 = vector.shape_cast %29 : vector<1x64x256xbf16> to vector<64x256xbf16>
    %cst_21 = arith.constant dense<0.000000e+00> : vector<64x128xf32>
    %31 = tpu.matmul %30, %28, %cst_21 {dimension_numbers = #tpu.dot_dimension_numbers<[1], [0], [0], [1], [0, 0, 1, 1], [], []>} : vector<64x256xbf16>, vector<256x128xbf16>, vector<64x128xf32> -> vector<64x128xf32>
    %32 = vector.extract_strided_slice %26 {offsets = [0, 128], sizes = [256, 128], strides = [1, 1]} : vector<256x384xf32> to vector<256x128xf32>
    %33 = arith.truncf %32 : vector<256x128xf32> to vector<256x128xbf16>
    %c1_22 = arith.constant 1 : index
    %c0_23 = arith.constant 0 : index
    %c0_24 = arith.constant 0 : index
    %34 = vector.load %arg3[%c1_22, %c0_23, %c0_24] : memref<3x64x256xbf16, #tpu.memory_space<vmem>>, vector<1x64x256xbf16>
    %35 = vector.shape_cast %34 : vector<1x64x256xbf16> to vector<64x256xbf16>
    %cst_25 = arith.constant dense<0.000000e+00> : vector<64x128xf32>
    %36 = tpu.matmul %35, %33, %cst_25 {dimension_numbers = #tpu.dot_dimension_numbers<[1], [0], [0], [1], [0, 0, 1, 1], [], []>} : vector<64x256xbf16>, vector<256x128xbf16>, vector<64x128xf32> -> vector<64x128xf32>
    %37 = arith.addf %31, %36 : vector<64x128xf32>
    %38 = vector.extract_strided_slice %26 {offsets = [0, 256], sizes = [256, 128], strides = [1, 1]} : vector<256x384xf32> to vector<256x128xf32>
    %39 = arith.truncf %38 : vector<256x128xf32> to vector<256x128xbf16>
    %c2_26 = arith.constant 2 : index
    %c0_27 = arith.constant 0 : index
    %c0_28 = arith.constant 0 : index
    %40 = vector.load %arg3[%c2_26, %c0_27, %c0_28] : memref<3x64x256xbf16, #tpu.memory_space<vmem>>, vector<1x64x256xbf16>
    %41 = vector.shape_cast %40 : vector<1x64x256xbf16> to vector<64x256xbf16>
    %cst_29 = arith.constant dense<0.000000e+00> : vector<64x128xf32>
    %42 = tpu.matmul %41, %39, %cst_29 {dimension_numbers = #tpu.dot_dimension_numbers<[1], [0], [0], [1], [0, 0, 1, 1], [], []>} : vector<64x256xbf16>, vector<256x128xbf16>, vector<64x128xf32> -> vector<64x128xf32>
    %43 = arith.addf %37, %42 : vector<64x128xf32>
    %44 = arith.addf %43, %3 : vector<64x128xf32>
    %cst_30 = arith.constant 0.000000e+00 : f32
    %45 = vector.broadcast %cst_30 : f32 to vector<64x128xf32>
    %46 = arith.maximumf %44, %45 : vector<64x128xf32>
    %c64 = arith.constant 64 : index
    %c0_31 = arith.constant 0 : index
    %47 = vector.load %arg17[%c64, %c0_31] : memref<128x128xf32, #tpu.memory_space<vmem>>, vector<64x128xf32>
    tpu.vector_store %arg17[%c64, %c0_31], %46 {strides = array<i32>} : memref<128x128xf32, #tpu.memory_space<vmem>>, vector<64x128xf32>,
    %c0_32 = arith.constant 0 : index
    %c0_33 = arith.constant 0 : index
    %48 = vector.load %arg17[%c0_32, %c0_33] : memref<128x128xf32, #tpu.memory_space<vmem>>, vector<128x128xf32>
    %49 = arith.truncf %48 : vector<128x128xf32> to vector<128x128xbf16>
    %c0_34 = arith.constant 0 : index
    %c0_35 = arith.constant 0 : index
    %50 = vector.load %arg5[%c0_34, %c0_35] : memref<128x256xbf16, #tpu.memory_space<vmem>>, vector<128x256xbf16>
    %cst_36 = arith.constant dense<0.000000e+00> : vector<128x256xf32>
    %51 = tpu.matmul %49, %50, %cst_36 {dimension_numbers = #tpu.dot_dimension_numbers<[1], [0], [0], [1], [0, 0, 1, 1], [], []>} : vector<128x128xbf16>, vector<128x256xbf16>, vector<128x256xf32> -> vector<128x256xf32>
    %c0_37 = arith.constant 0 : index
    %c0_38 = arith.constant 0 : index
    %52 = vector.load %arg7[%c0_37, %c0_38] : memref<16x128xf32, #tpu.memory_space<vmem>>, vector<16x128xf32>
    %53 = vector.extract_strided_slice %51 {offsets = [0, 0], sizes = [64, 256], strides = [1, 1]} : vector<128x256xf32> to vector<64x256xf32>
    %54 = vector.extract_strided_slice %53 {offsets = [0, 0], sizes = [64, 128], strides = [1, 1]} : vector<64x256xf32> to vector<64x128xf32>
    %55 = arith.truncf %54 : vector<64x128xf32> to vector<64x128xbf16>
    %c0_39 = arith.constant 0 : index
    %c0_40 = arith.constant 0 : index
    %c0_41 = arith.constant 0 : index
    %56 = vector.load %arg6[%c0_39, %c0_40, %c0_41] : memref<2x16x64xbf16, #tpu.memory_space<vmem>>, vector<1x16x64xbf16>
    %57 = vector.shape_cast %56 : vector<1x16x64xbf16> to vector<16x64xbf16>
    %cst_42 = arith.constant dense<0.000000e+00> : vector<16x128xf32>
    %58 = tpu.matmul %57, %55, %cst_42 {dimension_numbers = #tpu.dot_dimension_numbers<[1], [0], [0], [1], [0, 0, 1, 1], [], []>} : vector<16x64xbf16>, vector<64x128xbf16>, vector<16x128xf32> -> vector<16x128xf32>
    %59 = vector.extract_strided_slice %53 {offsets = [0, 128], sizes = [64, 128], strides = [1, 1]} : vector<64x256xf32> to vector<64x128xf32>
    %60 = arith.truncf %59 : vector<64x128xf32> to vector<64x128xbf16>
    %c1_43 = arith.constant 1 : index
    %c0_44 = arith.constant 0 : index
    %c0_45 = arith.constant 0 : index
    %61 = vector.load %arg6[%c1_43, %c0_44, %c0_45] : memref<2x16x64xbf16, #tpu.memory_space<vmem>>, vector<1x16x64xbf16>
    %62 = vector.shape_cast %61 : vector<1x16x64xbf16> to vector<16x64xbf16>
    %cst_46 = arith.constant dense<0.000000e+00> : vector<16x128xf32>
    %63 = tpu.matmul %62, %60, %cst_46 {dimension_numbers = #tpu.dot_dimension_numbers<[1], [0], [0], [1], [0, 0, 1, 1], [], []>} : vector<16x64xbf16>, vector<64x128xbf16>, vector<16x128xf32> -> vector<16x128xf32>
    %64 = arith.addf %58, %63 : vector<16x128xf32>
    %65 = arith.addf %64, %52 : vector<16x128xf32>
    %cst_47 = arith.constant 0.000000e+00 : f32
    %66 = vector.broadcast %cst_47 : f32 to vector<16x128xf32>
    %67 = arith.maximumf %65, %66 : vector<16x128xf32>
    %c0_48 = arith.constant 0 : index
    %c0_49 = arith.constant 0 : index
    %68 = vector.load %arg18[%c0_48, %c0_49] : memref<32x128xf32, #tpu.memory_space<vmem>>, vector<16x128xf32>
    tpu.vector_store %arg18[%c0_48, %c0_49], %67 {strides = array<i32>} : memref<32x128xf32, #tpu.memory_space<vmem>>, vector<16x128xf32>,
    %69 = vector.extract_strided_slice %51 {offsets = [64, 0], sizes = [64, 256], strides = [1, 1]} : vector<128x256xf32> to vector<64x256xf32>
    %70 = vector.extract_strided_slice %69 {offsets = [0, 0], sizes = [64, 128], strides = [1, 1]} : vector<64x256xf32> to vector<64x128xf32>
    %71 = arith.truncf %70 : vector<64x128xf32> to vector<64x128xbf16>
    %c0_50 = arith.constant 0 : index
    %c0_51 = arith.constant 0 : index
    %c0_52 = arith.constant 0 : index
    %72 = vector.load %arg6[%c0_50, %c0_51, %c0_52] : memref<2x16x64xbf16, #tpu.memory_space<vmem>>, vector<1x16x64xbf16>
    %73 = vector.shape_cast %72 : vector<1x16x64xbf16> to vector<16x64xbf16>
    %cst_53 = arith.constant dense<0.000000e+00> : vector<16x128xf32>
    %74 = tpu.matmul %73, %71, %cst_53 {dimension_numbers = #tpu.dot_dimension_numbers<[1], [0], [0], [1], [0, 0, 1, 1], [], []>} : vector<16x64xbf16>, vector<64x128xbf16>, vector<16x128xf32> -> vector<16x128xf32>
    %75 = vector.extract_strided_slice %69 {offsets = [0, 128], sizes = [64, 128], strides = [1, 1]} : vector<64x256xf32> to vector<64x128xf32>
    %76 = arith.truncf %75 : vector<64x128xf32> to vector<64x128xbf16>
    %c1_54 = arith.constant 1 : index
    %c0_55 = arith.constant 0 : index
    %c0_56 = arith.constant 0 : index
    %77 = vector.load %arg6[%c1_54, %c0_55, %c0_56] : memref<2x16x64xbf16, #tpu.memory_space<vmem>>, vector<1x16x64xbf16>
    %78 = vector.shape_cast %77 : vector<1x16x64xbf16> to vector<16x64xbf16>
    %cst_57 = arith.constant dense<0.000000e+00> : vector<16x128xf32>
    %79 = tpu.matmul %78, %76, %cst_57 {dimension_numbers = #tpu.dot_dimension_numbers<[1], [0], [0], [1], [0, 0, 1, 1], [], []>} : vector<16x64xbf16>, vector<64x128xbf16>, vector<16x128xf32> -> vector<16x128xf32>
    %80 = arith.addf %74, %79 : vector<16x128xf32>
    %81 = arith.addf %80, %52 : vector<16x128xf32>
    %cst_58 = arith.constant 0.000000e+00 : f32
    %82 = vector.broadcast %cst_58 : f32 to vector<16x128xf32>
    %83 = arith.maximumf %81, %82 : vector<16x128xf32>
    %c16 = arith.constant 16 : index
    %c0_59 = arith.constant 0 : index
    %84 = vector.load %arg18[%c16, %c0_59] : memref<32x128xf32, #tpu.memory_space<vmem>>, vector<16x128xf32>
    tpu.vector_store %arg18[%c16, %c0_59], %83 {strides = array<i32>} : memref<32x128xf32, #tpu.memory_space<vmem>>, vector<16x128xf32>,
    %c0_60 = arith.constant 0 : index
    %c0_61 = arith.constant 0 : index
    %85 = vector.load %arg18[%c0_60, %c0_61] : memref<32x128xf32, #tpu.memory_space<vmem>>, vector<32x128xf32>
    %86 = arith.truncf %85 : vector<32x128xf32> to vector<32x128xbf16>
    %c0_62 = arith.constant 0 : index
    %c0_63 = arith.constant 0 : index
    %87 = vector.load %arg8[%c0_62, %c0_63] : memref<128x256xbf16, #tpu.memory_space<vmem>>, vector<128x256xbf16>
    %cst_64 = arith.constant dense<0.000000e+00> : vector<32x256xf32>
    %88 = tpu.matmul %86, %87, %cst_64 {dimension_numbers = #tpu.dot_dimension_numbers<[1], [0], [0], [1], [0, 0, 1, 1], [], []>} : vector<32x128xbf16>, vector<128x256xbf16>, vector<32x256xf32> -> vector<32x256xf32>
    %c0_65 = arith.constant 0 : index
    %c0_66 = arith.constant 0 : index
    %89 = vector.load %arg10[%c0_65, %c0_66] : memref<8x128xf32, #tpu.memory_space<vmem>>, vector<8x128xf32>
    %90 = vector.extract_strided_slice %88 {offsets = [0, 0], sizes = [16, 256], strides = [1, 1]} : vector<32x256xf32> to vector<16x256xf32>
    %91 = vector.extract_strided_slice %90 {offsets = [0, 0], sizes = [16, 128], strides = [1, 1]} : vector<16x256xf32> to vector<16x128xf32>
    %92 = arith.truncf %91 : vector<16x128xf32> to vector<16x128xbf16>
    %c0_67 = arith.constant 0 : index
    %c0_68 = arith.constant 0 : index
    %c0_69 = arith.constant 0 : index
    %93 = vector.load %arg9[%c0_67, %c0_68, %c0_69] : memref<2x8x16xbf16, #tpu.memory_space<vmem>>, vector<1x8x16xbf16>
    %94 = vector.shape_cast %93 : vector<1x8x16xbf16> to vector<8x16xbf16>
    %cst_70 = arith.constant dense<0.000000e+00> : vector<8x128xf32>
    %95 = tpu.matmul %94, %92, %cst_70 {dimension_numbers = #tpu.dot_dimension_numbers<[1], [0], [0], [1], [0, 0, 1, 1], [], []>} : vector<8x16xbf16>, vector<16x128xbf16>, vector<8x128xf32> -> vector<8x128xf32>
    %96 = vector.extract_strided_slice %90 {offsets = [0, 128], sizes = [16, 128], strides = [1, 1]} : vector<16x256xf32> to vector<16x128xf32>
    %97 = arith.truncf %96 : vector<16x128xf32> to vector<16x128xbf16>
    %c1_71 = arith.constant 1 : index
    %c0_72 = arith.constant 0 : index
    %c0_73 = arith.constant 0 : index
    %98 = vector.load %arg9[%c1_71, %c0_72, %c0_73] : memref<2x8x16xbf16, #tpu.memory_space<vmem>>, vector<1x8x16xbf16>
    %99 = vector.shape_cast %98 : vector<1x8x16xbf16> to vector<8x16xbf16>
    %cst_74 = arith.constant dense<0.000000e+00> : vector<8x128xf32>
    %100 = tpu.matmul %99, %97, %cst_74 {dimension_numbers = #tpu.dot_dimension_numbers<[1], [0], [0], [1], [0, 0, 1, 1], [], []>} : vector<8x16xbf16>, vector<16x128xbf16>, vector<8x128xf32> -> vector<8x128xf32>
    %101 = arith.addf %95, %100 : vector<8x128xf32>
    %102 = arith.addf %101, %89 : vector<8x128xf32>
    %cst_75 = arith.constant 0.000000e+00 : f32
    %103 = vector.broadcast %cst_75 : f32 to vector<8x128xf32>
    %104 = arith.maximumf %102, %103 : vector<8x128xf32>
    %c0_76 = arith.constant 0 : index
    %c0_77 = arith.constant 0 : index
    %105 = vector.load %arg19[%c0_76, %c0_77] : memref<16x128xf32, #tpu.memory_space<vmem>>, vector<8x128xf32>
    tpu.vector_store %arg19[%c0_76, %c0_77], %104 {strides = array<i32>} : memref<16x128xf32, #tpu.memory_space<vmem>>, vector<8x128xf32>,
    %106 = vector.extract_strided_slice %88 {offsets = [16, 0], sizes = [16, 256], strides = [1, 1]} : vector<32x256xf32> to vector<16x256xf32>
    %107 = vector.extract_strided_slice %106 {offsets = [0, 0], sizes = [16, 128], strides = [1, 1]} : vector<16x256xf32> to vector<16x128xf32>
    %108 = arith.truncf %107 : vector<16x128xf32> to vector<16x128xbf16>
    %c0_78 = arith.constant 0 : index
    %c0_79 = arith.constant 0 : index
    %c0_80 = arith.constant 0 : index
    %109 = vector.load %arg9[%c0_78, %c0_79, %c0_80] : memref<2x8x16xbf16, #tpu.memory_space<vmem>>, vector<1x8x16xbf16>
    %110 = vector.shape_cast %109 : vector<1x8x16xbf16> to vector<8x16xbf16>
    %cst_81 = arith.constant dense<0.000000e+00> : vector<8x128xf32>
    %111 = tpu.matmul %110, %108, %cst_81 {dimension_numbers = #tpu.dot_dimension_numbers<[1], [0], [0], [1], [0, 0, 1, 1], [], []>} : vector<8x16xbf16>, vector<16x128xbf16>, vector<8x128xf32> -> vector<8x128xf32>
    %112 = vector.extract_strided_slice %106 {offsets = [0, 128], sizes = [16, 128], strides = [1, 1]} : vector<16x256xf32> to vector<16x128xf32>
    %113 = arith.truncf %112 : vector<16x128xf32> to vector<16x128xbf16>
    %c1_82 = arith.constant 1 : index
    %c0_83 = arith.constant 0 : index
    %c0_84 = arith.constant 0 : index
    %114 = vector.load %arg9[%c1_82, %c0_83, %c0_84] : memref<2x8x16xbf16, #tpu.memory_space<vmem>>, vector<1x8x16xbf16>
    %115 = vector.shape_cast %114 : vector<1x8x16xbf16> to vector<8x16xbf16>
    %cst_85 = arith.constant dense<0.000000e+00> : vector<8x128xf32>
    %116 = tpu.matmul %115, %113, %cst_85 {dimension_numbers = #tpu.dot_dimension_numbers<[1], [0], [0], [1], [0, 0, 1, 1], [], []>} : vector<8x16xbf16>, vector<16x128xbf16>, vector<8x128xf32> -> vector<8x128xf32>
    %117 = arith.addf %111, %116 : vector<8x128xf32>
    %118 = arith.addf %117, %89 : vector<8x128xf32>
    %cst_86 = arith.constant 0.000000e+00 : f32
    %119 = vector.broadcast %cst_86 : f32 to vector<8x128xf32>
    %120 = arith.maximumf %118, %119 : vector<8x128xf32>
    %c8 = arith.constant 8 : index
    %c0_87 = arith.constant 0 : index
    %121 = vector.load %arg19[%c8, %c0_87] : memref<16x128xf32, #tpu.memory_space<vmem>>, vector<8x128xf32>
    tpu.vector_store %arg19[%c8, %c0_87], %120 {strides = array<i32>} : memref<16x128xf32, #tpu.memory_space<vmem>>, vector<8x128xf32>,
    %c0_88 = arith.constant 0 : index
    %c0_89 = arith.constant 0 : index
    %122 = vector.load %arg19[%c0_88, %c0_89] : memref<16x128xf32, #tpu.memory_space<vmem>>, vector<16x128xf32>
    %123 = arith.truncf %122 : vector<16x128xf32> to vector<16x128xbf16>
    %c0_90 = arith.constant 0 : index
    %c0_91 = arith.constant 0 : index
    %124 = vector.load %arg11[%c0_90, %c0_91] : memref<128x80xbf16, #tpu.memory_space<vmem>>, vector<128x80xbf16>
    %cst_92 = arith.constant dense<0.000000e+00> : vector<16x80xf32>
    %125 = tpu.matmul %123, %124, %cst_92 {dimension_numbers = #tpu.dot_dimension_numbers<[1], [0], [0], [1], [0, 0, 1, 1], [], []>} : vector<16x128xbf16>, vector<128x80xbf16>, vector<16x80xf32> -> vector<16x80xf32>
    %c0_93 = arith.constant 0 : index
    %c0_94 = arith.constant 0 : index
    %126 = vector.load %arg12[%c0_93, %c0_94] : memref<16x80xf32, #tpu.memory_space<vmem>>, vector<16x80xf32>
    %127 = arith.mulf %125, %126 : vector<16x80xf32>
    %128 = arith.truncf %127 : vector<16x80xf32> to vector<16x80xbf16>
    %c0_95 = arith.constant 0 : index
    %c0_96 = arith.constant 0 : index
    %129 = vector.load %arg13[%c0_95, %c0_96] : memref<80x10xbf16, #tpu.memory_space<vmem>>, vector<80x10xbf16>
    %cst_97 = arith.constant dense<0.000000e+00> : vector<16x10xf32>
    %130 = tpu.matmul %128, %129, %cst_97 {dimension_numbers = #tpu.dot_dimension_numbers<[1], [0], [0], [1], [0, 0, 1, 1], [], []>} : vector<16x80xbf16>, vector<80x10xbf16>, vector<16x10xf32> -> vector<16x10xf32>
    %c0_98 = arith.constant 0 : index
    %c0_99 = arith.constant 0 : index
    %131 = vector.load %arg14[%c0_98, %c0_99] : memref<2x16xf32, #tpu.memory_space<vmem>>, vector<2x16xf32>
    %cst_100 = arith.constant dense<0.000000e+00> : vector<2x10xf32>
    %132 = tpu.matmul %131, %130, %cst_100 {dimension_numbers = #tpu.dot_dimension_numbers<[1], [0], [0], [1], [0, 0, 1, 1], [], []>} : vector<2x16xf32>, vector<16x10xf32>, vector<2x10xf32> -> vector<2x10xf32>
    %c0_101 = arith.constant 0 : index
    %c0_102 = arith.constant 0 : index
    %133 = vector.load %arg15[%c0_101, %c0_102] : memref<1x10xf32, #tpu.memory_space<vmem>>, vector<1x10xf32>
    %134 = vector.broadcast %133 : vector<1x10xf32> to vector<2x10xf32>
    %135 = arith.addf %132, %134 : vector<2x10xf32>
    %c0_103 = arith.constant 0 : index
    %c0_104 = arith.constant 0 : index
    %136 = vector.load %arg16[%c0_103, %c0_104] : memref<2x10xf32, #tpu.memory_space<vmem>>, vector<2x10xf32>
    tpu.vector_store %arg16[%c0_103, %c0_104], %135 {strides = array<i32>} : memref<2x10xf32, #tpu.memory_space<vmem>>, vector<2x10xf32>,
    return
  }
  func.func @transform_0(%arg0: i32) -> (i32, i32) {
    %c0_i32 = arith.constant 0 : i32
    %c0_i32_0 = arith.constant 0 : i32
    return %arg0, %c0_i32 : i32, i32
  }
  func.func @transform_1(%arg0: i32) -> (i32, i32) {
    %c0_i32 = arith.constant 0 : i32
    %c0_i32_0 = arith.constant 0 : i32
    %c0_i32_1 = arith.constant 0 : i32
    return %c0_i32, %c0_i32_0 : i32, i32
  }
  func.func @transform_2(%arg0: i32) -> (i32, i32, i32) {
    %c0_i32 = arith.constant 0 : i32
    %c0_i32_0 = arith.constant 0 : i32
    %c0_i32_1 = arith.constant 0 : i32
    %c0_i32_2 = arith.constant 0 : i32
    return %c0_i32, %c0_i32_0, %c0_i32_1 : i32, i32, i32
  }
  func.func @transform_3(%arg0: i32) -> (i32, i32) {
    %c0_i32 = arith.constant 0 : i32
    %c0_i32_0 = arith.constant 0 : i32
    %c0_i32_1 = arith.constant 0 : i32
    return %c0_i32, %c0_i32_0 : i32, i32
  }
  func.func @transform_4(%arg0: i32) -> (i32, i32) {
    %c0_i32 = arith.constant 0 : i32
    %c0_i32_0 = arith.constant 0 : i32
    %c0_i32_1 = arith.constant 0 : i32
    return %c0_i32, %c0_i32_0 : i32, i32
  }
  func.func @transform_5(%arg0: i32) -> (i32, i32, i32) {
    %c0_i32 = arith.constant 0 : i32
    %c0_i32_0 = arith.constant 0 : i32
    %c0_i32_1 = arith.constant 0 : i32
    %c0_i32_2 = arith.constant 0 : i32
    return %c0_i32, %c0_i32_0, %c0_i32_1 : i32, i32, i32
  }
  func.func @transform_6(%arg0: i32) -> (i32, i32) {
    %c0_i32 = arith.constant 0 : i32
    %c0_i32_0 = arith.constant 0 : i32
    %c0_i32_1 = arith.constant 0 : i32
    return %c0_i32, %c0_i32_0 : i32, i32
  }
  func.func @transform_7(%arg0: i32) -> (i32, i32) {
    %c0_i32 = arith.constant 0 : i32
    %c0_i32_0 = arith.constant 0 : i32
    %c0_i32_1 = arith.constant 0 : i32
    return %c0_i32, %c0_i32_0 : i32, i32
  }
  func.func @transform_8(%arg0: i32) -> (i32, i32, i32) {
    %c0_i32 = arith.constant 0 : i32
    %c0_i32_0 = arith.constant 0 : i32
    %c0_i32_1 = arith.constant 0 : i32
    %c0_i32_2 = arith.constant 0 : i32
    return %c0_i32, %c0_i32_0, %c0_i32_1 : i32, i32, i32
  }
  func.func @transform_9(%arg0: i32) -> (i32, i32) {
    %c0_i32 = arith.constant 0 : i32
    %c0_i32_0 = arith.constant 0 : i32
    %c0_i32_1 = arith.constant 0 : i32
    return %c0_i32, %c0_i32_0 : i32, i32
  }
  func.func @transform_10(%arg0: i32) -> (i32, i32) {
    %c0_i32 = arith.constant 0 : i32
    %c0_i32_0 = arith.constant 0 : i32
    %c0_i32_1 = arith.constant 0 : i32
    return %c0_i32, %c0_i32_0 : i32, i32
  }
  func.func @transform_11(%arg0: i32) -> (i32, i32) {
    %c0_i32 = arith.constant 0 : i32
    %c0_i32_0 = arith.constant 0 : i32
    %c0_i32_1 = arith.constant 0 : i32
    return %c0_i32, %c0_i32_0 : i32, i32
  }
  func.func @transform_12(%arg0: i32) -> (i32, i32) {
    %c0_i32 = arith.constant 0 : i32
    %c0_i32_0 = arith.constant 0 : i32
    %c0_i32_1 = arith.constant 0 : i32
    return %c0_i32, %c0_i32_0 : i32, i32
  }
  func.func @transform_13(%arg0: i32) -> (i32, i32) {
    %c0_i32 = arith.constant 0 : i32
    %c0_i32_0 = arith.constant 0 : i32
    %c0_i32_1 = arith.constant 0 : i32
    return %c0_i32, %c0_i32_0 : i32, i32
  }
  func.func @transform_14(%arg0: i32) -> (i32, i32) {
    %c0_i32 = arith.constant 0 : i32
    %c0_i32_0 = arith.constant 0 : i32
    %c0_i32_1 = arith.constant 0 : i32
    return %c0_i32, %c0_i32_0 : i32, i32
  }
  func.func @transform_15(%arg0: i32) -> (i32, i32) {
    %c0_i32 = arith.constant 0 : i32
    %c0_i32_0 = arith.constant 0 : i32
    return %arg0, %c0_i32 : i32, i32
  }
}

</mosaic_0001>

<bundles_post_ra>
// kernel: basic_tt_forward_pallas.1
= control target key start
LH: loop header
LB: loop body
LE: loop exit
PB: predicated region body
PF: predicated region fallthrough
CT: control target
= control target key end

     0   :  { %v5878_v2 = vmov 0   ;;  %s5862_s0 = inlined_call_operand.vmem [shape: bf16[512,256], index: 0, kind: input, shape index: {}]   ;;  %s5863_s1 = inlined_call_operand.vmem [shape: bf16[256,384], index: 1, kind: input, shape index: {}]   ;;  %s5864_s2 = inlined_call_operand.vmem [shape: bf16[3,64,256], index: 2, kind: input, shape index: {}]   ;;  %s5865_s3 = inlined_call_operand.vmem [shape: f32[64,128], index: 3, kind: input, shape index: {}]   ;;  %s5866_s4 = inlined_call_operand.vmem [shape: bf16[128,256], index: 4, kind: input, shape index: {}]   ;;  %s5867_s5 = inlined_call_operand.vmem [shape: bf16[2,16,64], index: 5, kind: input, shape index: {}]   ;;  %s5868_s6 = inlined_call_operand.vmem [shape: f32[16,128], index: 6, kind: input, shape index: {}]   ;;  %s5869_s7 = inlined_call_operand.vmem [shape: bf16[128,256], index: 7, kind: input, shape index: {}]   ;;  %s5870_s8 = inlined_call_operand.vmem [shape: bf16[2,8,16], index: 8, kind: input, shape index: {}]   ;;  %s5871_s9 = inlined_call_operand.vmem [shape: f32[8,128], index: 9, kind: input, shape index: {}]   ;;  %s5872_s10 = inlined_call_operand.vmem [shape: bf16[128,80], index: 10, kind: input, shape index: {}]   ;;  %s5873_s11 = inlined_call_operand.vmem [shape: f32[16,80], index: 11, kind: input, shape index: {}]   ;;  %s5874_s12 = inlined_call_operand.vmem [shape: bf16[80,10], index: 12, kind: input, shape index: {}]   ;;  %s5875_s13 = inlined_call_operand.vmem [shape: f32[2,16], index: 13, kind: input, shape index: {}]   ;;  %s5876_s14 = inlined_call_operand.vmem [shape: f32[1,10], index: 14, kind: input, shape index: {}]   ;;  %s5877_s15 = inlined_call_operand.hbm [shape: f32[2,10], index: 15, kind: output, shape index: {}]  }
   0x1   :  { %v4015_v0 = vld [vmem:[%s5863_s1 + $0xac] ss:$12 sps:$4 sm:$0xff]   ;;  %v4017_v1 = vld [vmem:[%s5863_s1 + $0xa8] ss:$12 sps:$4 sm:$0xff]   ;;  %1109 = vmatprep.subr.bf16.mxu1 %v5878_v2  ;;  %v4020_v4 = vld [vmem:[%s5863_s1 + $0x90] ss:$12 sps:$4 sm:$0xff]  }
   0x2   :  { %756 = vmatprep.subr.bf16.mxu0 %v4015_v0  ;;  %v4018_v3 = vld [vmem:[%s5863_s1 + $0x94] ss:$12 sps:$4 sm:$0xff]   ;;  %v4021_v5 = vld [vmem:[%s5863_s1 + $0x7c] ss:$12 sps:$4 sm:$0xff]   ;;  %v4023_v6 = vld [vmem:[%s5863_s1 + $0x78] ss:$12 sps:$4 sm:$0xff]  }
   0x3   :  { %757 = vmatpush1.bf16.msra.mxu0 %v4017_v1  ;;  %v4024_v7 = vld [vmem:[%s5863_s1 + $0x64] ss:$12 sps:$4 sm:$0xff]   ;;  %v4026_v8 = vld [vmem:[%s5863_s1 + $0x60] ss:$12 sps:$4 sm:$0xff]   ;;  %v4029_v11 = vld [vmem:[%s5863_s1 + $0x48] ss:$12 sps:$4 sm:$0xff]  }
   0x4   :  { %758 = vmatprep.subr.bf16.mxu0 %v4018_v3  ;;  %v4027_v9 = vld [vmem:[%s5863_s1 + $0x4c] ss:$12 sps:$4 sm:$0xff]   ;;  %v4042_v10 = vld [vmem:[%s5863_s1 + $0xb0] ss:$12 sps:$4 sm:$0xff]   ;;  %v4030_v13 = vld [vmem:[%s5863_s1 + $0x34] ss:$12 sps:$4 sm:$0xff]  }
   0x5   :  { %1110 = vmatpush1.bf16.msra.mxu1 %v4042_v10  ;;  %v4046_v12 = vld [vmem:[%s5863_s1 + $0x98] ss:$12 sps:$4 sm:$0xff]   ;;  %v4050_v14 = vld [vmem:[%s5863_s1 + $0x80] ss:$12 sps:$4 sm:$0xff]   ;;  %v4032_v15 = vld [vmem:[%s5863_s1 + $0x30] ss:$12 sps:$4 sm:$0xff]  }
   0x6   :  { %1111 = vmatprep.subr.bf16.mxu1 %v5878_v2  ;;  %v4033_v16 = vld [vmem:[%s5863_s1 + $0x1c] ss:$12 sps:$4 sm:$0xff]   ;;  %v4035_v18 = vld [vmem:[%s5863_s1 + $0x18] ss:$12 sps:$4 sm:$0xff]   ;;  %v4038_v21 = vld [vmem:[%s5863_s1] ss:$12 sps:$4 sm:$0xff]  }
   0x7   :  { %759 = vmatpush1.bf16.msra.mxu0 %v4020_v4  ;;  %v4054_v17 = vld [vmem:[%s5863_s1 + $0x68] ss:$12 sps:$4 sm:$0xff]   ;;  %v4036_v19 = vld [vmem:[%s5863_s1 + $0x4] ss:$12 sps:$4 sm:$0xff]   ;;  %v4039_v22 = vld [vmem:[%s5863_s1 + $0x16c] ss:$12 sps:$4 sm:$0xff]  }
   0x8   :  { %760 = vmatprep.subr.bf16.mxu0 %v4021_v5  ;;  %v4058_v20 = vld [vmem:[%s5863_s1 + $0x50] ss:$12 sps:$4 sm:$0xff]   ;;  %v4072_v23 = vld [vmem:[%s5862_s0 + $0x4] ss:$8 sps:$4 sm:$0xff]   ;;  %v4041_v25 = vld [vmem:[%s5863_s1 + $0x168] ss:$12 sps:$4 sm:$0xff]  }
   0x9   :  { %1112 = vmatpush1.bf16.msra.mxu1 %v4046_v12  ;;  %v4062_v24 = vld [vmem:[%s5863_s1 + $0x38] ss:$12 sps:$4 sm:$0xff]   ;;  %v4043_v26 = vld [vmem:[%s5863_s1 + $0x154] ss:$12 sps:$4 sm:$0xff]   ;;  %788 = vmatprep.mubr.bf16.mxu0 %v4072_v23  ;;  %v4045_v28 = vld [vmem:[%s5863_s1 + $0x150] ss:$12 sps:$4 sm:$0xff]  }
   0xa   :  { %1113 = vmatprep.subr.bf16.mxu1 %v5878_v2  ;;  %1141 = vmatprep.mubr.bf16.mxu1 %v4072_v23  ;;  %v4066_v27 = vld [vmem:[%s5863_s1 + $0x20] ss:$12 sps:$4 sm:$0xff]   ;;  %v4047_v29 = vld [vmem:[%s5863_s1 + $0x13c] ss:$12 sps:$4 sm:$0xff]   ;;  %v4049_v31 = vld [vmem:[%s5863_s1 + $0x138] ss:$12 sps:$4 sm:$0xff]  }
   0xb   :  { %761 = vmatpush1.bf16.msra.mxu0 %v4023_v6  ;;  %v4073_v30 = vld [vmem:[%s5863_s1 + $0x8] ss:$12 sps:$4 sm:$0xff]   ;;  %v4051_v32 = vld [vmem:[%s5863_s1 + $0x124] ss:$12 sps:$4 sm:$0xff]   ;;  %v4053_v34 = vld [vmem:[%s5863_s1 + $0x120] ss:$12 sps:$4 sm:$0xff]  }
   0xc   :  { %762 = vmatprep.subr.bf16.mxu0 %v4024_v7  ;;  %v4074_v33 = vld [vmem:[%s5863_s1 + $0x170] ss:$12 sps:$4 sm:$0xff]   ;;  %v4055_v35 = vld [vmem:[%s5863_s1 + $0x10c] ss:$12 sps:$4 sm:$0xff]   ;;  %v4057_v37 = vld [vmem:[%s5863_s1 + $0x108] ss:$12 sps:$4 sm:$0xff]  }
   0xd   :  { %1114 = vmatpush1.bf16.msra.mxu1 %v4050_v14  ;;  %v4077_v36 = vld [vmem:[%s5863_s1 + $0x158] ss:$12 sps:$4 sm:$0xff]   ;;  %v4059_v38 = vld [vmem:[%s5863_s1 + $0xf4] ss:$12 sps:$4 sm:$0xff]   ;;  %v4061_v40 = vld [vmem:[%s5863_s1 + $0xf0] ss:$12 sps:$4 sm:$0xff]  }
   0xe   :  { %1115 = vmatprep.subr.bf16.mxu1 %v5878_v2  ;;  %v4079_v39 = vld [vmem:[%s5863_s1 + $0x140] ss:$12 sps:$4 sm:$0xff]   ;;  %v4063_v41 = vld [vmem:[%s5863_s1 + $0xdc] ss:$12 sps:$4 sm:$0xff]   ;;  %v4065_v43 = vld [vmem:[%s5863_s1 + $0xd8] ss:$12 sps:$4 sm:$0xff]  }
   0xf   :  { %763 = vmatpush1.bf16.msra.mxu0 %v4026_v8  ;;  %v4082_v42 = vld [vmem:[%s5863_s1 + $0x128] ss:$12 sps:$4 sm:$0xff]   ;;  %v4067_v44 = vld [vmem:[%s5863_s1 + $0xc4] ss:$12 sps:$4 sm:$0xff]   ;;  %v4069_v46 = vld [vmem:[%s5863_s1 + $0xc0] ss:$12 sps:$4 sm:$0xff]  }
  0x10   :  { %764 = vmatprep.subr.bf16.mxu0 %v4027_v9  ;;  %v4084_v45 = vld [vmem:[%s5863_s1 + $0x110] ss:$12 sps:$4 sm:$0xff]   ;;  %v4070_v47 = vld [vmem:[%s5862_s0] ss:$8 sps:$4 sm:$0xff]   ;;  %v4087_v48 = vld [vmem:[%s5863_s1 + $0xf8] ss:$12 sps:$4 sm:$0xff]  }
  0x11   :  { %1116 = vmatpush1.bf16.msra.mxu1 %v4054_v17  ;;  %v4075_v49 = vld [vmem:[%s5862_s0 + $0x14] ss:$8 sps:$4 sm:$0xff]   ;;  %v4089_v50 = vld [vmem:[%s5863_s1 + $0xe0] ss:$12 sps:$4 sm:$0xff]   ;;  %v4078_v51 = vld [vmem:[%s5862_s0 + $0x10] ss:$8 sps:$4 sm:$0xff]  }
  0x12   :  { %1117 = vmatprep.subr.bf16.mxu1 %v5878_v2  ;;  %v4092_v52 = vld [vmem:[%s5863_s1 + $0xc8] ss:$12 sps:$4 sm:$0xff]   ;;  %v4080_v53 = vld [vmem:[%s5862_s0 + $0x24] ss:$8 sps:$4 sm:$0xff]   ;;  %v4088_v56 = vld [vmem:[%s5862_s0 + $0x30] ss:$8 sps:$4 sm:$0xff]  }
  0x13   :  { %765 = vmatpush1.bf16.msra.mxu0 %v4029_v11  ;;  %v4083_v54 = vld [vmem:[%s5862_s0 + $0x20] ss:$8 sps:$4 sm:$0xff]   ;;  %v4085_v55 = vld [vmem:[%s5862_s0 + $0x34] ss:$8 sps:$4 sm:$0xff]   ;;  %v4090_v57 = vld [vmem:[%s5862_s0 + $0x44] ss:$8 sps:$4 sm:$0xff]  }
  0x14   :  { %766 = vmatprep.subr.bf16.mxu0 %v4030_v13  ;;  %v4093_v58 = vld [vmem:[%s5862_s0 + $0x40] ss:$8 sps:$4 sm:$0xff]   ;;  %v4094_v59 = vld [vmem:[%s5862_s0 + $0x54] ss:$8 sps:$4 sm:$0xff]   ;;  %v4096_v60 = vld [vmem:[%s5862_s0 + $0x50] ss:$8 sps:$4 sm:$0xff]  }
  0x15   :  { %1118 = vmatpush1.bf16.msra.mxu1 %v4058_v20  ;;  %v4097_v61 = vld [vmem:[%s5862_s0 + $0x64] ss:$8 sps:$4 sm:$0xff]  }
  0x16   :  { %1119 = vmatprep.subr.bf16.mxu1 %v5878_v2 }
  0x17   :  { %767 = vmatpush1.bf16.msra.mxu0 %v4032_v15 }
  0x18   :  { %768 = vmatprep.subr.bf16.mxu0 %v4033_v16 }
  0x19   :  { %1120 = vmatpush1.bf16.msra.mxu1 %v4062_v24 }
  0x1a   :  { %1121 = vmatprep.subr.bf16.mxu1 %v5878_v2 }
  0x1b   :  { %769 = vmatpush1.bf16.msra.mxu0 %v4035_v18 }
  0x1c   :  { %770 = vmatprep.subr.bf16.mxu0 %v4036_v19 }
  0x1d   :  { %1122 = vmatpush1.bf16.msra.mxu1 %v4066_v27 }
  0x1e   :  { %1123 = vmatprep.subr.bf16.mxu1 %v5878_v2 }
  0x1f   :  { %771 = vmatpush1.bf16.msra.mxu0 %v4038_v21 }
  0x20   :  { %772 = vmatprep.subr.bf16.mxu0 %v4039_v22 }
  0x21   :  { %1124 = vmatpush1.bf16.msra.mxu1 %v4073_v30 }
  0x22   :  { %1125 = vmatprep.subr.bf16.mxu1 %v5878_v2 }
  0x23   :  { %773 = vmatpush2.bf16.msra.mxu0 %v4041_v25 }
  0x24   :  { %774 = vmatprep.subr.bf16.mxu0 %v4043_v26 }
  0x25   :  { %1126 = vmatpush2.bf16.msra.mxu1 %v4074_v33 }
  0x26   :  { %1127 = vmatprep.subr.bf16.mxu1 %v5878_v2 }
  0x27   :  { %775 = vmatpush2.bf16.msra.mxu0 %v4045_v28 }
  0x28   :  { %776 = vmatprep.subr.bf16.mxu0 %v4047_v29 }
  0x29   :  { %1128 = vmatpush2.bf16.msra.mxu1 %v4077_v36 }
  0x2a   :  { %1129 = vmatprep.subr.bf16.mxu1 %v5878_v2 }
  0x2b   :  { %777 = vmatpush2.bf16.msra.mxu0 %v4049_v31 }
  0x2c   :  { %778 = vmatprep.subr.bf16.mxu0 %v4051_v32 }
  0x2d   :  { %1130 = vmatpush2.bf16.msra.mxu1 %v4079_v39 }
  0x2e   :  { %1131 = vmatprep.subr.bf16.mxu1 %v5878_v2 }
  0x2f   :  { %779 = vmatpush2.bf16.msra.mxu0 %v4053_v34 }
  0x30   :  { %780 = vmatprep.subr.bf16.mxu0 %v4055_v35 }
  0x31   :  { %1132 = vmatpush2.bf16.msra.mxu1 %v4082_v42 }
  0x32   :  { %1133 = vmatprep.subr.bf16.mxu1 %v5878_v2 }
  0x33   :  { %781 = vmatpush2.bf16.msra.mxu0 %v4057_v37 }
  0x34   :  { %782 = vmatprep.subr.bf16.mxu0 %v4059_v38 }
  0x35   :  { %1134 = vmatpush2.bf16.msra.mxu1 %v4084_v45 }
  0x36   :  { %1135 = vmatprep.subr.bf16.mxu1 %v5878_v2 }
  0x37   :  { %783 = vmatpush2.bf16.msra.mxu0 %v4061_v40 }
  0x38   :  { %784 = vmatprep.subr.bf16.mxu0 %v4063_v41 }
  0x39   :  { %1136 = vmatpush2.bf16.msra.mxu1 %v4087_v48 }
  0x3a   :  { %1137 = vmatprep.subr.bf16.mxu1 %v5878_v2 }
  0x3b   :  { %785 = vmatpush2.bf16.msra.mxu0 %v4065_v43 }
  0x3c   :  { %786 = vmatprep.subr.bf16.mxu0 %v4067_v44 }
  0x3d   :  { %1138 = vmatpush2.bf16.msra.mxu1 %v4089_v50 }
  0x3e   :  { %1139 = vmatprep.subr.bf16.mxu1 %v5878_v2 }
  0x3f   :  { %787 = vmatpush2.bf16.msra.mxu0 %v4069_v46 }
  0x41   :  { %1140 = vmatpush2.bf16.msra.mxu1 %v4092_v52 }
  0x42   :  { %789 = vmatmul.mubr.bf16.vlgmr.msra.gmra.mxu0 %v4070_v47 }
  0x43   :  { %798 = vmatprep.mubr.bf16.mxu0 %v4075_v49 }
  0x44   :  { %1142 = vmatmul.mubr.bf16.vlgmr.msra.gmra.mxu1 %v4070_v47 }
  0x45   :  { %1149 = vmatprep.mubr.bf16.mxu1 %v4075_v49 }
  0x4a   :  { %799 = vmatmul.mubr.bf16.gmra.mxu0 %v4078_v51 }
  0x4b   :  { %808 = vmatprep.mubr.bf16.mxu0 %v4080_v53 }
  0x4c   :  { %1150 = vmatmul.mubr.bf16.gmra.mxu1 %v4078_v51 }
  0x4d   :  { %1157 = vmatprep.mubr.bf16.mxu1 %v4080_v53 }
  0x52   :  { %809 = vmatmul.mubr.bf16.gmra.mxu0 %v4083_v54 }
  0x53   :  { %818 = vmatprep.mubr.bf16.mxu0 %v4085_v55 }
  0x54   :  { %1158 = vmatmul.mubr.bf16.gmra.mxu1 %v4083_v54 }
  0x55   :  { %1165 = vmatprep.mubr.bf16.mxu1 %v4085_v55 }
  0x5a   :  { %819 = vmatmul.mubr.bf16.gmra.mxu0 %v4088_v56 }
  0x5b   :  { %828 = vmatprep.mubr.bf16.mxu0 %v4090_v57 }
  0x5c   :  { %1166 = vmatmul.mubr.bf16.gmra.mxu1 %v4088_v56 }
  0x5d   :  { %1173 = vmatprep.mubr.bf16.mxu1 %v4090_v57 }
  0x62   :  { %829 = vmatmul.mubr.bf16.gmra.mxu0 %v4093_v58 }
  0x63   :  { %838 = vmatprep.mubr.bf16.mxu0 %v4094_v59 }
  0x64   :  { %20 = vsyncpa [#allocation6], 0  ;;  %1174 = vmatmul.mubr.bf16.gmra.mxu1 %v4093_v58  ;;  %v4099_v62 = vld [vmem:[%s5862_s0 + $0x60] ss:$8 sps:$4 sm:$0xff]   ;;  %v4100_v63 = vld [vmem:[%s5862_s0 + $0x74] ss:$8 sps:$4 sm:$0xff]  }
  0x65   :  { %1181 = vmatprep.mubr.bf16.mxu1 %v4094_v59  ;;  %v4102_v0 = vld [vmem:[%s5862_s0 + $0x70] ss:$8 sps:$4 sm:$0xff]   ;;  %v4103_v1 = vld [vmem:[%s5862_s0 + $0x84] ss:$8 sps:$4 sm:$0xff]   ;;  %v4105_v3 = vld [vmem:[%s5862_s0 + $0x80] ss:$8 sps:$4 sm:$0xff]  }
  0x66   :  { %v4106_v4 = vld [vmem:[%s5862_s0 + $0x94] ss:$8 sps:$4 sm:$0xff]   ;;  %v4108_v5 = vld [vmem:[%s5862_s0 + $0x90] ss:$8 sps:$4 sm:$0xff]   ;;  %v4109_v6 = vld [vmem:[%s5862_s0 + $0xa4] ss:$8 sps:$4 sm:$0xff]  }
  0x67   :  { %v4111_v7 = vld [vmem:[%s5862_s0 + $0xa0] ss:$8 sps:$4 sm:$0xff]   ;;  %v4112_v8 = vld [vmem:[%s5862_s0 + $0xb4] ss:$8 sps:$4 sm:$0xff]   ;;  %v4114_v9 = vld [vmem:[%s5862_s0 + $0xb0] ss:$8 sps:$4 sm:$0xff]  }
  0x68   :  { %v4115_v10 = vld [vmem:[%s5862_s0 + $0xc4] ss:$8 sps:$4 sm:$0xff]   ;;  %v4117_v11 = vld [vmem:[%s5862_s0 + $0xc0] ss:$8 sps:$4 sm:$0xff]   ;;  %v4118_v12 = vld [vmem:[%s5862_s0 + $0xd4] ss:$8 sps:$4 sm:$0xff]  }
  0x69   :  { %v4120_v13 = vld [vmem:[%s5862_s0 + $0xd0] ss:$8 sps:$4 sm:$0xff]   ;;  %v4121_v14 = vld [vmem:[%s5862_s0 + $0xe4] ss:$8 sps:$4 sm:$0xff]   ;;  %v4123_v15 = vld [vmem:[%s5862_s0 + $0xe0] ss:$8 sps:$4 sm:$0xff]  }
  0x6a   :  { %839 = vmatmul.mubr.bf16.gmra.mxu0 %v4096_v60  ;;  %v4124_v16 = vld [vmem:[%s5862_s0 + $0xf4] ss:$8 sps:$4 sm:$0xff]   ;;  %v4126_v17 = vld [vmem:[%s5862_s0 + $0xf0] ss:$8 sps:$4 sm:$0xff]   ;;  %v4127_v18 = vld [vmem:[%s5862_s0 + $0x104] ss:$8 sps:$4 sm:$0xff]  }
  0x6b   :  { %848 = vmatprep.mubr.bf16.mxu0 %v4097_v61  ;;  %v4129_v19 = vld [vmem:[%s5862_s0 + $0x100] ss:$8 sps:$4 sm:$0xff]   ;;  %v4130_v20 = vld [vmem:[%s5862_s0 + $0x114] ss:$8 sps:$4 sm:$0xff]   ;;  %v4132_v21 = vld [vmem:[%s5862_s0 + $0x110] ss:$8 sps:$4 sm:$0xff]  }
  0x6c   :  { %1182 = vmatmul.mubr.bf16.gmra.mxu1 %v4096_v60  ;;  %v4133_v22 = vld [vmem:[%s5862_s0 + $0x124] ss:$8 sps:$4 sm:$0xff]   ;;  %v4135_v23 = vld [vmem:[%s5862_s0 + $0x120] ss:$8 sps:$4 sm:$0xff]   ;;  %v4136_v24 = vld [vmem:[%s5862_s0 + $0x134] ss:$8 sps:$4 sm:$0xff]  }
  0x6d   :  { %1189 = vmatprep.mubr.bf16.mxu1 %v4097_v61  ;;  %v4138_v25 = vld [vmem:[%s5862_s0 + $0x130] ss:$8 sps:$4 sm:$0xff]   ;;  %v4139_v26 = vld [vmem:[%s5862_s0 + $0x144] ss:$8 sps:$4 sm:$0xff]   ;;  %v4141_v27 = vld [vmem:[%s5862_s0 + $0x140] ss:$8 sps:$4 sm:$0xff]  }
  0x6e   :  { %v4142_v28 = vld [vmem:[%s5862_s0 + $0x154] ss:$8 sps:$4 sm:$0xff]   ;;  %v4144_v29 = vld [vmem:[%s5862_s0 + $0x150] ss:$8 sps:$4 sm:$0xff]   ;;  %v4145_v30 = vld [vmem:[%s5862_s0 + $0x164] ss:$8 sps:$4 sm:$0xff]  }
  0x6f   :  { %v4147_v31 = vld [vmem:[%s5862_s0 + $0x160] ss:$8 sps:$4 sm:$0xff]   ;;  %v4148_v32 = vld [vmem:[%s5862_s0 + $0x174] ss:$8 sps:$4 sm:$0xff]   ;;  %v4150_v33 = vld [vmem:[%s5862_s0 + $0x170] ss:$8 sps:$4 sm:$0xff]  }
  0x70   :  { %v4151_v34 = vld [vmem:[%s5862_s0 + $0x184] ss:$8 sps:$4 sm:$0xff]   ;;  %v4153_v35 = vld [vmem:[%s5862_s0 + $0x180] ss:$8 sps:$4 sm:$0xff]   ;;  %v4154_v36 = vld [vmem:[%s5862_s0 + $0x194] ss:$8 sps:$4 sm:$0xff]  }
  0x71   :  { %v4156_v40 = vld [vmem:[%s5862_s0 + $0x190] ss:$8 sps:$4 sm:$0xff]   ;;  %v4157_v42 = vld [vmem:[%s5862_s0 + $0x1a4] ss:$8 sps:$4 sm:$0xff]   ;;  %v4159_v49 = vld [vmem:[%s5862_s0 + $0x1a0] ss:$8 sps:$4 sm:$0xff]  }
  0x72   :  { %849 = vmatmul.mubr.bf16.gmra.mxu0 %v4099_v62  ;;  %v4160_v51 = vld [vmem:[%s5862_s0 + $0x1b4] ss:$8 sps:$4 sm:$0xff]   ;;  %vm4300_vm0 = vmmov 0   ;;  %vm2499_vm1 = vcmask 523264   ;;  %vm2876_vm2 = vcmask 130048   ;;  %vm3212_vm3 = vcmask 654336  }
  0x73   :  { %858 = vmatprep.mubr.bf16.mxu0 %v4100_v63  ;;  %vm3338_vm4 = vcmask 74752  }
  0x74   :  { %1190 = vmatmul.mubr.bf16.gmra.mxu1 %v4099_v62  ;;  %v4162_v62 = vld [vmem:[%s5862_s0 + $0x1b0] ss:$8 sps:$4 sm:$0xff]  }
  0x75   :  { %1197 = vmatprep.mubr.bf16.mxu1 %v4100_v63 }
  0x7a   :  { %859 = vmatmul.mubr.bf16.gmra.mxu0 %v4102_v0 }
  0x7b   :  { %868 = vmatprep.mubr.bf16.mxu0 %v4103_v1 }
  0x7c   :  { %1198 = vmatmul.mubr.bf16.gmra.mxu1 %v4102_v0  ;;  %v4165_v0 = vld [vmem:[%s5862_s0 + $0x1c4] ss:$8 sps:$4 sm:$0xff]  }
  0x7d   :  { %1205 = vmatprep.mubr.bf16.mxu1 %v4103_v1 }
  0x82   :  { %869 = vmatmul.mubr.bf16.gmra.mxu0 %v4105_v3 }
  0x83   :  { %878 = vmatprep.mubr.bf16.mxu0 %v4106_v4 }
  0x84   :  { %1206 = vmatmul.mubr.bf16.gmra.mxu1 %v4105_v3 }
  0x85   :  { %1213 = vmatprep.mubr.bf16.mxu1 %v4106_v4 }
  0x8a   :  { %879 = vmatmul.mubr.bf16.gmra.mxu0 %v4108_v5 }
  0x8b   :  { %888 = vmatprep.mubr.bf16.mxu0 %v4109_v6 }
  0x8c   :  { %1214 = vmatmul.mubr.bf16.gmra.mxu1 %v4108_v5 }
  0x8d   :  { %1221 = vmatprep.mubr.bf16.mxu1 %v4109_v6 }
  0x92   :  { %889 = vmatmul.mubr.bf16.gmra.mxu0 %v4111_v7 }
  0x93   :  { %898 = vmatprep.mubr.bf16.mxu0 %v4112_v8 }
  0x94   :  { %1222 = vmatmul.mubr.bf16.gmra.mxu1 %v4111_v7 }
  0x95   :  { %1229 = vmatprep.mubr.bf16.mxu1 %v4112_v8 }
  0x9a   :  { %899 = vmatmul.mubr.bf16.gmra.mxu0 %v4114_v9 }
  0x9b   :  { %908 = vmatprep.mubr.bf16.mxu0 %v4115_v10 }
  0x9c   :  { %1230 = vmatmul.mubr.bf16.gmra.mxu1 %v4114_v9 }
  0x9d   :  { %1237 = vmatprep.mubr.bf16.mxu1 %v4115_v10 }
  0xa2   :  { %909 = vmatmul.mubr.bf16.gmra.mxu0 %v4117_v11 }
  0xa3   :  { %918 = vmatprep.mubr.bf16.mxu0 %v4118_v12 }
  0xa4   :  { %1238 = vmatmul.mubr.bf16.gmra.mxu1 %v4117_v11 }
  0xa5   :  { %1245 = vmatprep.mubr.bf16.mxu1 %v4118_v12  ;;  %v4163_v12 = vld [vmem:[%s5862_s0 + $0x1c0] ss:$8 sps:$4 sm:$0xff]  }
  0xaa   :  { %919 = vmatmul.mubr.bf16.gmra.mxu0 %v4120_v13 }
  0xab   :  { %928 = vmatprep.mubr.bf16.mxu0 %v4121_v14 }
  0xac   :  { %1246 = vmatmul.mubr.bf16.gmra.mxu1 %v4120_v13 }
  0xad   :  { %1253 = vmatprep.mubr.bf16.mxu1 %v4121_v14  ;;  %v4168_v14 = vld [vmem:[%s5862_s0 + $0x1d4] ss:$8 sps:$4 sm:$0xff]  }
  0xb2   :  { %929 = vmatmul.mubr.bf16.gmra.mxu0 %v4123_v15 }
  0xb3   :  { %938 = vmatprep.mubr.bf16.mxu0 %v4124_v16 }
  0xb4   :  { %1254 = vmatmul.mubr.bf16.gmra.mxu1 %v4123_v15 }
  0xb5   :  { %1261 = vmatprep.mubr.bf16.mxu1 %v4124_v16 }
  0xba   :  { %939 = vmatmul.mubr.bf16.gmra.mxu0 %v4126_v17 }
  0xbb   :  { %948 = vmatprep.mubr.bf16.mxu0 %v4127_v18 }
  0xbc   :  { %1262 = vmatmul.mubr.bf16.gmra.mxu1 %v4126_v17 }
  0xbd   :  { %1269 = vmatprep.mubr.bf16.mxu1 %v4127_v18 }
  0xc2   :  { %949 = vmatmul.mubr.bf16.gmra.mxu0 %v4129_v19 }
  0xc3   :  { %958 = vmatprep.mubr.bf16.mxu0 %v4130_v20 }
  0xc4   :  { %1270 = vmatmul.mubr.bf16.gmra.mxu1 %v4129_v19 }
  0xc5   :  { %1277 = vmatprep.mubr.bf16.mxu1 %v4130_v20 }
  0xca   :  { %959 = vmatmul.mubr.bf16.gmra.mxu0 %v4132_v21 }
  0xcb   :  { %968 = vmatprep.mubr.bf16.mxu0 %v4133_v22 }
  0xcc   :  { %1278 = vmatmul.mubr.bf16.gmra.mxu1 %v4132_v21 }
  0xcd   :  { %1285 = vmatprep.mubr.bf16.mxu1 %v4133_v22 }
  0xd2   :  { %969 = vmatmul.mubr.bf16.gmra.mxu0 %v4135_v23 }
  0xd3   :  { %978 = vmatprep.mubr.bf16.mxu0 %v4136_v24 }
  0xd4   :  { %1286 = vmatmul.mubr.bf16.gmra.mxu1 %v4135_v23 }
  0xd5   :  { %1293 = vmatprep.mubr.bf16.mxu1 %v4136_v24 }
  0xda   :  { %979 = vmatmul.mubr.bf16.gmra.mxu0 %v4138_v25 }
  0xdb   :  { %988 = vmatprep.mubr.bf16.mxu0 %v4139_v26 }
  0xdc   :  { %1294 = vmatmul.mubr.bf16.gmra.mxu1 %v4138_v25  ;;  %v4166_v25 = vld [vmem:[%s5862_s0 + $0x1d0] ss:$8 sps:$4 sm:$0xff]  }
  0xdd   :  { %1301 = vmatprep.mubr.bf16.mxu1 %v4139_v26 }
  0xe2   :  { %989 = vmatmul.mubr.bf16.gmra.mxu0 %v4141_v27 }
  0xe3   :  { %998 = vmatprep.mubr.bf16.mxu0 %v4142_v28 }
  0xe4   :  { %1302 = vmatmul.mubr.bf16.gmra.mxu1 %v4141_v27  ;;  %v4171_v27 = vld [vmem:[%s5862_s0 + $0x1e4] ss:$8 sps:$4 sm:$0xff]  }
  0xe5   :  { %1309 = vmatprep.mubr.bf16.mxu1 %v4142_v28 }
  0xea   :  { %999 = vmatmul.mubr.bf16.gmra.mxu0 %v4144_v29 }
  0xeb   :  { %1008 = vmatprep.mubr.bf16.mxu0 %v4145_v30 }
  0xec   :  { %1310 = vmatmul.mubr.bf16.gmra.mxu1 %v4144_v29 }
  0xed   :  { %1317 = vmatprep.mubr.bf16.mxu1 %v4145_v30 }
  0xf2   :  { %1009 = vmatmul.mubr.bf16.gmra.mxu0 %v4147_v31 }
  0xf3   :  { %1018 = vmatprep.mubr.bf16.mxu0 %v4148_v32 }
  0xf4   :  { %1318 = vmatmul.mubr.bf16.gmra.mxu1 %v4147_v31 }
  0xf5   :  { %1325 = vmatprep.mubr.bf16.mxu1 %v4148_v32 }
  0xfa   :  { %1019 = vmatmul.mubr.bf16.gmra.mxu0 %v4150_v33 }
  0xfb   :  { %1028 = vmatprep.mubr.bf16.mxu0 %v4151_v34 }
  0xfc   :  { %1326 = vmatmul.mubr.bf16.gmra.mxu1 %v4150_v33 }
  0xfd   :  { %1333 = vmatprep.mubr.bf16.mxu1 %v4151_v34 }
 0x102   :  { %v4695_v37 = vpop.f32.mrf.mxu0  ;;  %1029 = vmatmul.mubr.bf16.gmra.mxu0 %v4153_v35 }
 0x103   :  { %5966 = vst [vmem:[#allocation8_spill] sm:$0xff] %v4695_v37  ;;  %1038 = vmatprep.mubr.bf16.mxu0 %v4154_v36 }
 0x104   :  { %v4697_v38 = vpop.f32.mrf.mxu0  ;;  %v4717_v47 = vpop.f32.mrf.mxu1  ;;  %1334 = vmatmul.mubr.bf16.gmra.mxu1 %v4153_v35 }
 0x105   :  { %5967 = vst [vmem:[#allocation9_spill] sm:$0xff] %v4697_v38  ;;  %5971 = vst [vmem:[#allocation13_spill] sm:$0xff] %v4717_v47  ;;  %1341 = vmatprep.mubr.bf16.mxu1 %v4154_v36 }
 0x106   :  { %v4699_v39 = vpop.f32.mrf.mxu0  ;;  %v1145_v52 = vpop.f32.mrf.mxu1 }
 0x107   :  { %5968 = vst [vmem:[#allocation10_spill] sm:$0xff] %v4699_v39 }
 0x108   :  { %v4709_v43 = vpop.f32.mrf.mxu0  ;;  %v4733_v55 = vpop.f32.mrf.mxu1 }
 0x109   :  { %5969 = vst [vmem:[#allocation11_spill] sm:$0xff] %v4709_v43  ;;  %5973 = vst [vmem:[#allocation15_spill] sm:$0xff] %v4733_v55 }
 0x10a   :  { %v4713_v45 = vpop.f32.mrf.mxu0  ;;  %1039 = vmatmul.mubr.bf16.gmra.mxu0 %v4156_v40  ;;  %v1148_v58 = vpop.f32.mrf.mxu1 }
 0x10b   :  { %1048 = vmatprep.mubr.bf16.mxu0 %v4157_v42 }
 0x10c   :  { %v4715_v46 = vpop.f32.mrf.mxu0  ;;  %v4741_v60 = vpop.f32.mrf.mxu1  ;;  %1342 = vmatmul.mubr.bf16.gmra.mxu1 %v4156_v40  ;;  %v4169_v40 = vld [vmem:[%s5862_s0 + $0x1e0] ss:$8 sps:$4 sm:$0xff]  }
 0x10d   :  { %5970 = vst [vmem:[#allocation12_spill] sm:$0xff] %v4715_v46  ;;  %5974 = vst [vmem:[#allocation16_spill] sm:$0xff] %v4741_v60  ;;  %1349 = vmatprep.mubr.bf16.mxu1 %v4157_v42 }
 0x10e   :  { %v4719_v48 = vpop.f32.mrf.mxu0  ;;  %v1153_v1 = vpop.f32.mrf.mxu1 }
 0x110   :  { %v4729_v53 = vpop.f32.mrf.mxu0  ;;  %v4757_v5 = vpop.f32.mrf.mxu1 }
 0x111   :  { %5972 = vst [vmem:[#allocation14_spill] sm:$0xff] %v4729_v53  ;;  %5975 = vst [vmem:[#allocation17_spill] sm:$0xff] %v4757_v5 }
 0x112   :  { %v4735_v56 = vpop.f32.mrf.mxu0  ;;  %1049 = vmatmul.mubr.bf16.gmra.mxu0 %v4159_v49  ;;  %v1156_v8 = vpop.f32.mrf.mxu1 }
 0x113   :  { %1058 = vmatprep.mubr.bf16.mxu0 %v4160_v51 }
 0x114   :  { %v4739_v59 = vpop.f32.mrf.mxu0  ;;  %v4765_v10 = vpop.f32.mrf.mxu1  ;;  %1350 = vmatmul.mubr.bf16.gmra.mxu1 %v4159_v49  ;;  %v4174_v49 = vld [vmem:[%s5862_s0 + $0x1f4] ss:$8 sps:$4 sm:$0xff]  }
 0x115   :  { %5976 = vst [vmem:[#allocation18_spill] sm:$0xff] %v4765_v10  ;;  %1357 = vmatprep.mubr.bf16.mxu1 %v4160_v51 }
 0x116   :  { %v4743_v61 = vpop.f32.mrf.mxu0  ;;  %v1161_v15 = vpop.f32.mrf.mxu1 }
 0x117   :  { %v4172_v15 = vld [vmem:[%s5862_s0 + $0x1f0] ss:$8 sps:$4 sm:$0xff]  }
 0x118   :  { %v4753_v3 = vpop.f32.mrf.mxu0  ;;  %v4781_v18 = vpop.f32.mrf.mxu1 }
 0x119   :  { %5977 = vst [vmem:[#allocation19_spill] sm:$0xff] %v4781_v18 }
 0x11a   :  { %v4759_v6 = vpop.f32.mrf.mxu0  ;;  %1059 = vmatmul.mubr.bf16.gmra.mxu0 %v4162_v62  ;;  %v1164_v21 = vpop.f32.mrf.mxu1 }
 0x11b   :  { %1068 = vmatprep.mubr.bf16.mxu0 %v4165_v0 }
 0x11c   :  { %v4763_v9 = vpop.f32.mrf.mxu0  ;;  %v4789_v23 = vpop.f32.mrf.mxu1  ;;  %1358 = vmatmul.mubr.bf16.gmra.mxu1 %v4162_v62 }
 0x11d   :  { %5978 = vst [vmem:[#allocation20_spill] sm:$0xff] %v4789_v23  ;;  %1365 = vmatprep.mubr.bf16.mxu1 %v4165_v0 }
 0x11e   :  { %v4767_v11 = vpop.f32.mrf.mxu0  ;;  %v1169_v28 = vpop.f32.mrf.mxu1 }
 0x120   :  { %v4777_v16 = vpop.f32.mrf.mxu0  ;;  %v4803_v30 = vpop.f32.mrf.mxu1 }
 0x121   :  { %5979 = vst [vmem:[#allocation21_spill] sm:$0xff] %v4803_v30 }
 0x122   :  { %v4783_v19 = vpop.f32.mrf.mxu0  ;;  %1069 = vmatmul.mubr.bf16.gmra.mxu0 %v4163_v12  ;;  %v1172_v33 = vpop.f32.mrf.mxu1 }
 0x123   :  { %1078 = vmatprep.mubr.bf16.mxu0 %v4168_v14  ;;  %v4845_v33 = vld [vmem:[%s5864_s2 + $0x44] ss:$8 sps:$4 sm:$0xff]  }
 0x124   :  { %v4787_v22 = vpop.f32.mrf.mxu0  ;;  %v4811_v35 = vpop.f32.mrf.mxu1  ;;  %1366 = vmatmul.mubr.bf16.gmra.mxu1 %v4163_v12  ;;  %5983 = vst [vmem:[#allocation25_spill] sm:$0xff] %v4845_v33 }
 0x125   :  { %5980 = vst [vmem:[#allocation22_spill] sm:$0xff] %v4811_v35  ;;  %1373 = vmatprep.mubr.bf16.mxu1 %v4168_v14 }
 0x126   :  { %v4791_v24 = vpop.f32.mrf.mxu0  ;;  %v1177_v51 = vpop.f32.mrf.mxu1 }
 0x128   :  { %v4801_v29 = vpop.f32.mrf.mxu0  ;;  %v4825_v58 = vpop.f32.mrf.mxu1 }
 0x129   :  { %5981 = vst [vmem:[#allocation23_spill] sm:$0xff] %v4825_v58 }
 0x12a   :  { %v4805_v31 = vpop.f32.mrf.mxu0  ;;  %1079 = vmatmul.mubr.bf16.gmra.mxu0 %v4166_v25  ;;  %v1180_v1 = vpop.f32.mrf.mxu1 }
 0x12b   :  { %1088 = vmatprep.mubr.bf16.mxu0 %v4171_v27 }
 0x12c   :  { %v4809_v34 = vpop.f32.mrf.mxu0  ;;  %v4833_v12 = vpop.f32.mrf.mxu1  ;;  %1374 = vmatmul.mubr.bf16.gmra.mxu1 %v4166_v25 }
 0x12d   :  { %5982 = vst [vmem:[#allocation24_spill] sm:$0xff] %v4833_v12  ;;  %1381 = vmatprep.mubr.bf16.mxu1 %v4171_v27 }
 0x12e   :  { %v4813_v36 = vpop.f32.mrf.mxu0  ;;  %v1185_v28 = vpop.f32.mrf.mxu1 }
 0x130   :  { %v4823_v52 = vpop.f32.mrf.mxu0  ;;  %v4849_v1 = vpop.f32.mrf.mxu1 }
 0x131   :  { %5984 = vst [vmem:[#allocation26_spill] sm:$0xff] %v4849_v1 }
 0x132   :  { %v4827_v62 = vpop.f32.mrf.mxu0  ;;  %1089 = vmatmul.mubr.bf16.gmra.mxu0 %v4169_v40  ;;  %v1188_v27 = vpop.f32.mrf.mxu1 }
 0x133   :  { %1098 = vmatprep.mubr.bf16.mxu0 %v4174_v49 }
 0x134   :  { %v4831_v8 = vpop.f32.mrf.mxu0  ;;  %v4858_v28 = vpop.f32.mrf.mxu1  ;;  %1382 = vmatmul.mubr.bf16.gmra.mxu1 %v4169_v40  ;;  %v4875_v40 = vld [vmem:[%s5864_s2 + $0x4] ss:$8 sps:$4 sm:$0xff]  }
 0x135   :  { %5985 = vst [vmem:[#allocation27_spill] sm:$0xff] %v4858_v28  ;;  %1389 = vmatprep.mubr.bf16.mxu1 %v4174_v49  ;;  %5988 = vst [vmem:[#allocation30_spill] sm:$0xff] %v4875_v40 }
 0x136   :  { %v4835_v14 = vpop.f32.mrf.mxu0  ;;  %v1193_v32 = vpop.f32.mrf.mxu1 }
 0x138   :  { %v4847_v51 = vpop.f32.mrf.mxu0  ;;  %v4866_v44 = vpop.f32.mrf.mxu1 }
 0x139   :  { %5986 = vst [vmem:[#allocation28_spill] sm:$0xff] %v4866_v44 }
 0x13a   :  { %v4851_v25 = vpop.f32.mrf.mxu0  ;;  %1099 = vmatmul.mubr.bf16.gmra.mxu0 %v4172_v15  ;;  %v1196_v41 = vpop.f32.mrf.mxu1 }
 0x13b   :  { %1527 = vmatprep.mubr.bf16.mxu0 %v4845_v33 }
 0x13c   :  { %v4856_v57 = vpop.f32.mrf.mxu0  ;;  %v4879_v54 = vpop.f32.mrf.mxu1  ;;  %1390 = vmatmul.mubr.bf16.gmra.mxu1 %v4172_v15 }
 0x13d   :  { %5990 = vst [vmem:[#allocation32_spill] sm:$0xff] %v4879_v54  ;;  %1632 = vmatprep.mubr.bf16.mxu1 %v4875_v40 }
 0x13e   :  { %v4860_v7 = vpop.f32.mrf.mxu0  ;;  %v1201_v4 = vpop.f32.mrf.mxu1 }
 0x140   :  { %v4864_v0 = vpop.f32.mrf.mxu0  ;;  %v4888_v63 = vpop.f32.mrf.mxu1 }
 0x141   :  { %5993 = vst [vmem:[#allocation35_spill] sm:$0xff] %v4888_v63 }
 0x142   :  { %v4868_v2 = vpop.f32.mrf.mxu0  ;;  %v1204_v13 = vpop.f32.mrf.mxu1 }
 0x143   :  { %5987 = vst [vmem:[#allocation29_spill] sm:$0xff] %v4868_v2 }
 0x144   :  { %v4877_v49 = vpop.f32.mrf.mxu0  ;;  %v4896_v15 = vpop.f32.mrf.mxu1 }
 0x145   :  { %5989 = vst [vmem:[#allocation31_spill] sm:$0xff] %v4877_v49  ;;  %5994 = vst [vmem:[#allocation36_spill] sm:$0xff] %v4896_v15 }
 0x146   :  { %v4881_v32 = vpop.f32.mrf.mxu0  ;;  %v1209_v4 = vpop.f32.mrf.mxu1 }
 0x147   :  { %5991 = vst [vmem:[#allocation33_spill] sm:$0xff] %v4881_v32 }
 0x148   :  { %v4886_v27 = vpop.f32.mrf.mxu0  ;;  %v4904_v20 = vpop.f32.mrf.mxu1 }
 0x149   :  { %5992 = vst [vmem:[#allocation34_spill] sm:$0xff] %v4886_v27  ;;  %5995 = vst [vmem:[#allocation37_spill] sm:$0xff] %v4904_v20 }
 0x14a   :  { %v4890_v17 = vpop.f32.mrf.mxu0  ;;  %v1212_v13 = vpop.f32.mrf.mxu1 }
 0x14c   :  { %v4894_v26 = vpop.f32.mrf.mxu0  ;;  %v4912_v55 = vpop.f32.mrf.mxu1 }
 0x14d   :  { %5996 = vst [vmem:[#allocation38_spill] sm:$0xff] %v4912_v55 }
 0x14e   :  { %v4898_v42 = vpop.f32.mrf.mxu0  ;;  %v1217_v5 = vpop.f32.mrf.mxu1 }
 0x150   :  { %v4902_v21 = vpop.f32.mrf.mxu0  ;;  %v4918_v4 = vpop.f32.mrf.mxu1 }
 0x151   :  { %5997 = vst [vmem:[#allocation39_spill] sm:$0xff] %v4918_v4 }
 0x152   :  { %v4906_v40 = vpop.f32.mrf.mxu0  ;;  %v1220_v18 = vpop.f32.mrf.mxu1 }
 0x154   :  { %v4910_v47 = vpop.f32.mrf.mxu0  ;;  %v4926_v13 = vpop.f32.mrf.mxu1 }
 0x155   :  { %5998 = vst [vmem:[#allocation40_spill] sm:$0xff] %v4926_v13 }
 0x156   :  { %v4914_v60 = vpop.f32.mrf.mxu0  ;;  %v1225_v15 = vpop.f32.mrf.mxu1 }
 0x158   :  { %v4916_v33 = vpop.f32.mrf.mxu0  ;;  %v4932_v5 = vpop.f32.mrf.mxu1 }
 0x159   :  { %5999 = vst [vmem:[#allocation41_spill] sm:$0xff] %v4932_v5 }
 0x15a   :  { %v4920_v50 = vpop.f32.mrf.mxu0  ;;  %v1228_v58 = vpop.f32.mrf.mxu1 }
 0x15c   :  { %v4924_v23 = vpop.f32.mrf.mxu0  ;;  %v4940_v18 = vpop.f32.mrf.mxu1 }
 0x15d   :  { %6000 = vst [vmem:[#allocation42_spill] sm:$0xff] %v4940_v18 }
 0x15e   :  { %v4928_v41 = vpop.f32.mrf.mxu0  ;;  %v1233_v55 = vpop.f32.mrf.mxu1 }
 0x160   :  { %v4930_v20 = vpop.f32.mrf.mxu0  ;;  %v4944_v1 = vpop.f32.mrf.mxu1 }
 0x161   :  { %6001 = vst [vmem:[#allocation43_spill] sm:$0xff] %v4944_v1 }
 0x162   :  { %v4934_v30 = vpop.f32.mrf.mxu0  ;;  %v1236_v44 = vpop.f32.mrf.mxu1 }
 0x164   :  { %v4938_v12 = vpop.f32.mrf.mxu0  ;;  %v4948_v63 = vpop.f32.mrf.mxu1 }
 0x165   :  { %6002 = vst [vmem:[#allocation44_spill] sm:$0xff] %v4948_v63 }
 0x166   :  { %v914_v10 = vpop.f32.mrf.mxu0  ;;  %v1241_v58 = vpop.f32.mrf.mxu1 }
 0x168   :  { %v4942_v4 = vpop.f32.mrf.mxu0  ;;  %v4950_v5 = vpop.f32.mrf.mxu1 }
 0x169   :  { %6003 = vst [vmem:[#allocation45_spill] sm:$0xff] %v4950_v5 }
 0x16a   :  { %v920_v15 = vpop.f32.mrf.mxu0  ;;  %v1244_v43 = vpop.f32.mrf.mxu1 }
 0x16c   :  { %v922_v54 = vpop.f32.mrf.mxu0  ;;  %v4952_v37 = vpop.f32.mrf.mxu1 }
 0x16d   :  { %6004 = vst [vmem:[#allocation46_spill] sm:$0xff] %v4952_v37 }
 0x16e   :  { %v924_v35 = vpop.f32.mrf.mxu0  ;;  %v1249_v46 = vpop.f32.mrf.mxu1 }
 0x16f   :  { %v1437_v46 = vpack.c.bf16 %v4864_v0, %v4856_v57  ;;  %v1436_v57 = vpack.c.bf16 %v4847_v51, %v4831_v8  ;;  %v1435_v8 = vpack.c.bf16 %v4823_v52, %v4809_v34  ;;  %v1434_v34 = vpack.c.bf16 %v4801_v29, %v4787_v22 }
 0x170   :  { %v926_v13 = vpop.f32.mrf.mxu0  ;;  %v4954_v2 = vpop.f32.mrf.mxu1  ;;  %v1416_v22 = vpack.c.bf16 %v4914_v60, %v4906_v40  ;;  %v6019_v60 = vpack.c.bf16 %v4777_v16, %v4763_v9 }
 0x171   :  { %6005 = vst [vmem:[#allocation47_spill] sm:$0xff] %v4954_v2 }
 0x172   :  { %v930_v38 = vpop.f32.mrf.mxu0  ;;  %v1252_v44 = vpop.f32.mrf.mxu1 }
 0x173   :  { %v6007_v44 = vpack.c.bf16 %v4860_v7, %v4851_v25  ;;  %v6010_v7 = vpack.c.bf16 %v4835_v14, %v4827_v62  ;;  %v1442_v62 = vpack.c.bf16 %v4942_v4, %v4938_v12  ;;  %v5248_v25 = vld [vmem:[%s5864_s2 + $0x84] ss:$8 sps:$4 sm:$0xff]   ;;  %v6090_v12 = vld [vmem:[#allocation39_spill] sm:$0xff] }
 0x174   :  { %v932_v55 = vpop.f32.mrf.mxu0  ;;  %v4956_v1 = vpop.f32.mrf.mxu1 }
 0x176   :  { %v934_v39 = vpop.f32.mrf.mxu0  ;;  %v1257_v32 = vpop.f32.mrf.mxu1 }
 0x177   :  { %v1420_v5 = vpack.c.bf16 %v934_v39, %v930_v38  ;;  %v1419_v38 = vpack.c.bf16 %v924_v35, %v920_v15 }
 0x178   :  { %v936_v53 = vpop.f32.mrf.mxu0  ;;  %v4958_v43 = vpop.f32.mrf.mxu1 }
 0x179   :  { %v1444_v2 = vpack.c.bf16 %v936_v53, %v932_v55  ;;  %v1443_v53 = vpack.c.bf16 %v926_v13, %v922_v54  ;;  %v6013_v54 = vpack.c.bf16 %v4813_v36, %v4805_v31  ;;  %v6016_v31 = vpack.c.bf16 %v4791_v24, %v4783_v19  ;;  %v6028_v55 = vld [vmem:[#allocation33_spill] sm:$0xff] }
 0x17a   :  { %v940_v28 = vpop.f32.mrf.mxu0  ;;  %v1441_v36 = vpack.c.bf16 %v4930_v20, %v4924_v23  ;;  %v6018_v19 = vpack.c.bf16 %v4767_v11, %v4759_v6  ;;  %v1440_v23 = vpack.c.bf16 %v4916_v33, %v4910_v47  ;;  %v6021_v6 = vpack.c.bf16 %v4743_v61, %v4735_v56  ;;  %v6078_v20 = vld [vmem:[#allocation20_spill] sm:$0xff]  ;;  %v6091_v11 = vld [vmem:[#allocation38_spill] sm:$0xff] }
 0x17b   :  { %v1439_v47 = vpack.c.bf16 %v4902_v21, %v4894_v26  ;;  %v6022_v33 = vpack.c.bf16 %v4898_v42, %v4890_v17  ;;  %v6025_v26 = vpack.c.bf16 %v4719_v48, %v4713_v45  ;;  %v6026_v42 = vld [vmem:[#allocation31_spill] sm:$0xff]  ;;  %v6027_v21 = vld [vmem:[#allocation34_spill] sm:$0xff] }
 0x17c   :  { %v942_v18 = vpop.f32.mrf.mxu0  ;;  %v1438_v15 = vpack.c.bf16 %v6027_v21, %v6026_v42  ;;  %v5074_v48 = vld [vmem:[%s5864_s2] ss:$8 sps:$4 sm:$0xff]  }
 0x17d   :  { %6035 = vst [vmem:[#allocation34_spill] sm:$0xff] %v5074_v48 }
 0x17e   :  { %v944_v63 = vpop.f32.mrf.mxu0 }
 0x17f   :  { %v1421_v58 = vpack.c.bf16 %v944_v63, %v940_v28  ;;  %v1260_v63 = vpop.f32.mrf.mxu1 }
 0x180   :  { %v946_v27 = vpop.f32.mrf.mxu0  ;;  %v6032_v63 = vld [vmem:[#allocation12_spill] sm:$0xff] }
 0x181   :  { %v1445_v49 = vpack.c.bf16 %v946_v27, %v942_v18  ;;  %3652 = vmatprep.subr.bf16.mxu1 %v1421_v58  ;;  %v4969_v39 = vpop.f32.mrf.mxu1  ;;  %v6023_v18 = vpack.c.bf16 %v4753_v3, %v4739_v59  ;;  %v6029_v58 = vld [vmem:[#allocation29_spill] sm:$0xff] }
 0x182   :  { %v4962_v37 = vpop.f32.mrf.mxu0  ;;  %3653 = vmatpush3.bf16.msra.mxu1 %v6007_v44  ;;  %v6031_v44 = vld [vmem:[#allocation14_spill] sm:$0xff] }
 0x183   :  { %6006 = vst [vmem:[#allocation48_spill] sm:$0xff] %v4962_v37  ;;  %3612 = vmatprep.subr.bf16.mxu0 %v1445_v49  ;;  %3654 = vmatprep.subr.bf16.mxu1 %v1420_v5  ;;  %v1265_v27 = vpop.f32.mrf.mxu1 }
 0x184   :  { %v4967_v28 = vpop.f32.mrf.mxu0  ;;  %3613 = vmatpush3.bf16.msra.mxu0 %v1437_v46  ;;  %v6030_v46 = vpack.c.bf16 %v6028_v55, %v6029_v58  ;;  %v5143_v55 = vld [vmem:[%s5864_s2 + $0x50] ss:$8 sps:$4 sm:$0xff]  }
 0x185   :  { %6008 = vst [vmem:[#allocation49_spill] sm:$0xff] %v4967_v28  ;;  %3614 = vmatprep.subr.bf16.mxu0 %v1444_v2  ;;  %v1418_v2 = vpack.c.bf16 %v914_v10, %v4934_v30  ;;  %v4983_v35 = vpop.f32.mrf.mxu1  ;;  %v1417_v10 = vpack.c.bf16 %v4928_v41, %v4920_v50 }
 0x186   :  { %v4973_v0 = vpop.f32.mrf.mxu0  ;;  %3655 = vmatpush3.bf16.msra.mxu1 %v6010_v7  ;;  %v6036_v7 = vld [vmem:[#allocation10_spill] sm:$0xff] }
 0x187   :  { %6009 = vst [vmem:[#allocation50_spill] sm:$0xff] %v4973_v0  ;;  %3656 = vmatprep.subr.bf16.mxu1 %v1419_v38  ;;  %v1268_v14 = vpop.f32.mrf.mxu1  ;;  %v6033_v38 = vpack.c.bf16 %v6031_v44, %v6032_v63  ;;  %v5153_v63 = vld [vmem:[%s5864_s2 + $0x64] ss:$8 sps:$4 sm:$0xff]  }
 0x188   :  { %v4980_v49 = vpop.f32.mrf.mxu0  ;;  %3615 = vmatpush3.bf16.msra.mxu0 %v1436_v57 }
 0x189   :  { %6011 = vst [vmem:[#allocation51_spill] sm:$0xff] %v4980_v49  ;;  %3616 = vmatprep.subr.bf16.mxu0 %v1443_v53  ;;  %v4998_v30 = vpop.f32.mrf.mxu1  ;;  %v6037_v53 = vld [vmem:[#allocation8_spill] sm:$0xff] }
 0x18a   :  { %v4987_v51 = vpop.f32.mrf.mxu0  ;;  %3657 = vmatpush3.bf16.msra.mxu1 %v6013_v54  ;;  %6014 = vst [vmem:[#allocation53_spill] sm:$0xff] %v4998_v30  ;;  %v6038_v27 = vpack.c.bf16 %v6036_v7, %v6037_v53  ;;  %v1680_v54 = vpack.c.bf16 %v4983_v35, %v4969_v39  ;;  %v6096_v30 = vld [vmem:[#allocation16_spill] sm:$0xff] }
 0x18b   :  { %6012 = vst [vmem:[#allocation52_spill] sm:$0xff] %v4987_v51  ;;  %3658 = vmatprep.subr.bf16.mxu1 %v1418_v2  ;;  %v1273_v50 = vpop.f32.mrf.mxu1  ;;  %v5084_v2 = vld [vmem:[%s5864_s2 + $0x14] ss:$8 sps:$4 sm:$0xff]  }
 0x18c   :  { %v4994_v32 = vpop.f32.mrf.mxu0  ;;  %3617 = vmatpush3.bf16.msra.mxu0 %v1435_v8  ;;  %6039 = vst [vmem:[#allocation33_spill] sm:$0xff] %v5084_v2  ;;  %v5103_v50 = vld [vmem:[%s5864_s2 + $0x54] ss:$8 sps:$4 sm:$0xff]   ;;  %v6092_v8 = vpack.c.bf16 %v6090_v12, %v6091_v11  ;;  %v6098_v11 = vld [vmem:[#allocation37_spill] sm:$0xff] }
 0x18d   :  { %3618 = vmatprep.subr.bf16.mxu0 %v1442_v62  ;;  %v5015_v29 = vpop.f32.mrf.mxu1  ;;  %v5093_v62 = vld [vmem:[%s5864_s2 + $0x40] ss:$8 sps:$4 sm:$0xff]   ;;  %6044 = vst [vmem:[#allocation14_spill] sm:$0xff] %v5103_v50 }
 0x18e   :  { %v5002_v52 = vpop.f32.mrf.mxu0  ;;  %3659 = vmatpush3.bf16.msra.mxu1 %v6016_v31  ;;  %6017 = vst [vmem:[#allocation55_spill] sm:$0xff] %v5015_v29  ;;  %6040 = vst [vmem:[#allocation29_spill] sm:$0xff] %v5093_v62  ;;  %v6042_v31 = vld [vmem:[#allocation9_spill] sm:$0xff] }
 0x18f   :  { %6015 = vst [vmem:[#allocation54_spill] sm:$0xff] %v5002_v52  ;;  %3660 = vmatprep.subr.bf16.mxu1 %v1417_v10  ;;  %v1276_v24 = vpop.f32.mrf.mxu1  ;;  %6054 = vst [vmem:[#allocation9_spill] sm:$0xff] %v5143_v55 }
 0x190   :  { %v5011_v41 = vpop.f32.mrf.mxu0  ;;  %3619 = vmatpush3.bf16.msra.mxu0 %v1434_v34  ;;  %v6041_v34 = vld [vmem:[#allocation11_spill] sm:$0xff] }
 0x191   :  { %3620 = vmatprep.subr.bf16.mxu0 %v1441_v36  ;;  %v5031_v40 = vpop.f32.mrf.mxu1  ;;  %v6043_v36 = vpack.c.bf16 %v6041_v34, %v6042_v31 }
 0x192   :  { %v5017_v4 = vpop.f32.mrf.mxu0  ;;  %3661 = vmatpush3.bf16.msra.mxu1 %v6018_v19  ;;  %6020 = vst [vmem:[#allocation56_spill] sm:$0xff] %v5031_v40  ;;  %v1679_v19 = vpack.c.bf16 %v4958_v43, %v4956_v1  ;;  %v5134_v43 = vld [vmem:[%s5864_s2 + $0x24] ss:$8 sps:$4 sm:$0xff]  }
 0x193   :  { %3662 = vmatprep.subr.bf16.mxu1 %v1416_v22  ;;  %v1281_v9 = vpop.f32.mrf.mxu1  ;;  %6051 = vst [vmem:[#allocation11_spill] sm:$0xff] %v5134_v43 }
 0x194   :  { %v5026_v13 = vpop.f32.mrf.mxu0  ;;  %3621 = vmatpush3.bf16.msra.mxu0 %v6019_v60  ;;  %v6046_v60 = vld [vmem:[#allocation35_spill] sm:$0xff] }
 0x195   :  { %3622 = vmatprep.subr.bf16.mxu0 %v1440_v23  ;;  %v5050_v56 = vpop.f32.mrf.mxu1  ;;  %v5127_v9 = vld [vmem:[%s5864_s2 + $0x10] ss:$8 sps:$4 sm:$0xff]   ;;  %6058 = vst [vmem:[#allocation35_spill] sm:$0xff] %v5153_v63 }
 0x196   :  { %v5033_v5 = vpop.f32.mrf.mxu0  ;;  %3663 = vmatpush3.bf16.msra.mxu1 %v6021_v6  ;;  %6024 = vst [vmem:[#allocation57_spill] sm:$0xff] %v5050_v56  ;;  %v6047_v6 = vld [vmem:[#allocation32_spill] sm:$0xff]  ;;  %6050 = vst [vmem:[#allocation8_spill] sm:$0xff] %v5127_v9 }
 0x197   :  { %3664 = vmatprep.subr.bf16.mxu1 %v6022_v33  ;;  %v1284_v59 = vpop.f32.mrf.mxu1  ;;  %v5280_v56 = vld [vmem:[%s5864_s2 + $0x80] ss:$8 sps:$4 sm:$0xff]  }
 0x198   :  { %v5045_v16 = vpop.f32.mrf.mxu0  ;;  %3623 = vmatpush3.bf16.msra.mxu0 %v6023_v18  ;;  %v6052_v18 = vld [vmem:[#allocation46_spill] sm:$0xff]  ;;  %v6056_v59 = vld [vmem:[#allocation27_spill] sm:$0xff] }
 0x199   :  { %3624 = vmatprep.subr.bf16.mxu0 %v1439_v47  ;;  %v5069_v45 = vpop.f32.mrf.mxu1  ;;  %v6048_v47 = vpack.c.bf16 %v6046_v60, %v6047_v6  ;;  %v5177_v6 = vld [vmem:[%s5864_s2 + $0x20] ss:$8 sps:$4 sm:$0xff]  }
 0x19a   :  { %v5052_v61 = vpop.f32.mrf.mxu0  ;;  %3665 = vmatpush3.bf16.msra.mxu1 %v6025_v26  ;;  %6034 = vst [vmem:[#allocation31_spill] sm:$0xff] %v5069_v45  ;;  %v6053_v26 = vld [vmem:[#allocation47_spill] sm:$0xff] }
 0x19b   :  { %3666 = vmatprep.subr.bf16.mxu1 %v6030_v46  ;;  %v1289_v14 = vpop.f32.mrf.mxu1  ;;  %v1678_v42 = vpack.c.bf16 %v6053_v26, %v6052_v18  ;;  %v6055_v46 = vld [vmem:[#allocation28_spill] sm:$0xff]  ;;  %6066 = vst [vmem:[#allocation47_spill] sm:$0xff] %v5177_v6  ;;  %v5184_v18 = vld [vmem:[%s5864_s2 + $0x34] ss:$8 sps:$4 sm:$0xff]   ;;  %v5311_v45 = vld [vmem:[%s5864_s2 + $0x90] ss:$8 sps:$4 sm:$0xff]  }
 0x19c   :  { %v5064_v3 = vpop.f32.mrf.mxu0  ;;  %3625 = vmatpush3.bf16.msra.mxu0 %v6033_v38  ;;  %v6057_v44 = vpack.c.bf16 %v6055_v46, %v6056_v59  ;;  %6067 = vst [vmem:[#allocation28_spill] sm:$0xff] %v5184_v18  ;;  %v6069_v59 = vld [vmem:[#allocation23_spill] sm:$0xff]  ;;  %6112 = vst [vmem:[#allocation38_spill] sm:$0xff] %v5311_v45 }
 0x19d   :  { %3626 = vmatprep.subr.bf16.mxu0 %v1438_v15  ;;  %v5105_v22 = vpop.f32.mrf.mxu1 }
 0x19e   :  { %v5076_v57 = vpop.f32.mrf.mxu0  ;;  %3667 = vmatpush3.bf16.msra.mxu1 %v6038_v27  ;;  %6045 = vst [vmem:[#allocation12_spill] sm:$0xff] %v5105_v22  ;;  %v6060_v27 = vld [vmem:[#allocation44_spill] sm:$0xff] }
 0x19f   :  { %v1292_v23 = vpop.f32.mrf.mxu1 }
 0x1a0   :  { %v5095_v10 = vpop.f32.mrf.mxu0  ;;  %3627 = vmatpush3.bf16.msra.mxu0 %v6043_v36  ;;  %v6062_v36 = vld [vmem:[#allocation26_spill] sm:$0xff] }
 0x1a1   :  { %3692 = vmatprep.subr.bf16.mxu0 %v1680_v54  ;;  %1633 = vmatmul.mubr.bf16.vlgmr.msra.gmra.mxu1 %v5074_v48  ;;  %v5122_v33 = vpop.f32.mrf.mxu1  ;;  %v6061_v54 = vld [vmem:[#allocation45_spill] sm:$0xff] }
 0x1a2   :  { %v5108_v39 = vpop.f32.mrf.mxu0  ;;  %1640 = vmatprep.mubr.bf16.mxu1 %v5084_v2  ;;  %6049 = vst [vmem:[#allocation10_spill] sm:$0xff] %v5122_v33  ;;  %v1677_v14 = vpack.c.bf16 %v6061_v54, %v6060_v27  ;;  %v5201_v54 = vld [vmem:[%s5864_s2 + $0x74] ss:$8 sps:$4 sm:$0xff]  }
 0x1a3   :  { %1528 = vmatmul.mubr.bf16.vlgmr.msra.gmra.mxu0 %v5093_v62  ;;  %v1297_v15 = vpop.f32.mrf.mxu1  ;;  %6072 = vst [vmem:[#allocation44_spill] sm:$0xff] %v5201_v54 }
 0x1a4   :  { %v5116_v24 = vpop.f32.mrf.mxu0  ;;  %3693 = vmatpush3.bf16.msra.mxu0 %v6048_v47  ;;  %1535 = vmatprep.mubr.bf16.mxu0 %v5103_v50  ;;  %v5191_v15 = vld [vmem:[%s5864_s2 + $0x60] ss:$8 sps:$4 sm:$0xff]  }
 0x1a5   :  { %3694 = vmatprep.subr.bf16.mxu0 %v1679_v19  ;;  %v5155_v38 = vpop.f32.mrf.mxu1  ;;  %v6063_v19 = vld [vmem:[#allocation24_spill] sm:$0xff]  ;;  %6068 = vst [vmem:[#allocation27_spill] sm:$0xff] %v5191_v15 }
 0x1a6   :  { %v5129_v1 = vpop.f32.mrf.mxu0  ;;  %6059 = vst [vmem:[#allocation32_spill] sm:$0xff] %v5155_v38  ;;  %v6064_v23 = vpack.c.bf16 %v6062_v36, %v6063_v19 }
 0x1a7   :  { %v1300_v34 = vpop.f32.mrf.mxu1 }
 0x1a8   :  { %v5145_v58 = vpop.f32.mrf.mxu0  ;;  %3695 = vmatpush3.bf16.msra.mxu0 %v6057_v44  ;;  %v6070_v44 = vld [vmem:[#allocation22_spill] sm:$0xff] }
 0x1a9   :  { %3696 = vmatprep.subr.bf16.mxu0 %v1678_v42  ;;  %1641 = vmatmul.mubr.bf16.gmra.mxu1 %v5127_v9  ;;  %v5172_v60 = vpop.f32.mrf.mxu1  ;;  %v6071_v27 = vpack.c.bf16 %v6069_v59, %v6070_v44  ;;  %v6074_v34 = vld [vmem:[#allocation42_spill] sm:$0xff]  ;;  %6089 = vst [vmem:[#allocation22_spill] sm:$0xff] %v5248_v25 }
 0x1aa   :  { %v5158_v7 = vpop.f32.mrf.mxu0  ;;  %1648 = vmatprep.mubr.bf16.mxu1 %v5134_v43  ;;  %6065 = vst [vmem:[#allocation46_spill] sm:$0xff] %v5172_v60 }
 0x1ab   :  { %1536 = vmatmul.mubr.bf16.gmra.mxu0 %v5143_v55  ;;  %v1305_v42 = vpop.f32.mrf.mxu1 }
 0x1ac   :  { %v5166_v31 = vpop.f32.mrf.mxu0  ;;  %3697 = vmatpush3.bf16.msra.mxu0 %v6064_v23  ;;  %1543 = vmatprep.mubr.bf16.mxu0 %v5153_v63  ;;  %v6095_v42 = vld [vmem:[#allocation17_spill] sm:$0xff] }
 0x1ad   :  { %3698 = vmatprep.subr.bf16.mxu0 %v1677_v14  ;;  %v6073_v14 = vld [vmem:[#allocation43_spill] sm:$0xff]  ;;  %v5206_v19 = vpop.f32.mrf.mxu1  ;;  %v6097_v12 = vpack.c.bf16 %v6095_v42, %v6096_v30 }
 0x1ae   :  { %v5179_v47 = vpop.f32.mrf.mxu0  ;;  %v6075_v36 = vpack.c.bf16 %v6073_v14, %v6074_v34  ;;  %6076 = vst [vmem:[#allocation45_spill] sm:$0xff] %v5206_v19  ;;  %v6080_v34 = vld [vmem:[#allocation41_spill] sm:$0xff]  ;;  %v6103_v42 = vld [vmem:[#allocation15_spill] sm:$0xff] }
 0x1af   :  { %v1308_v59 = vpop.f32.mrf.mxu1 }
 0x1b0   :  { %v5193_v46 = vpop.f32.mrf.mxu0  ;;  %3699 = vmatpush3.bf16.msra.mxu0 %v6071_v27  ;;  %v6077_v27 = vld [vmem:[#allocation21_spill] sm:$0xff] }
 0x1b1   :  { %3700 = vmatprep.subr.bf16.mxu0 %v6075_v36  ;;  %1649 = vmatmul.mubr.bf16.gmra.mxu1 %v5177_v6  ;;  %v6079_v14 = vpack.c.bf16 %v6077_v27, %v6078_v20  ;;  %v6081_v36 = vld [vmem:[#allocation40_spill] sm:$0xff]  ;;  %v5224_v35 = vpop.f32.mrf.mxu1  ;;  %v5229_v59 = vld [vmem:[%s5864_s2 + $0x30] ss:$8 sps:$4 sm:$0xff]   ;;  %6102 = vst [vmem:[#allocation21_spill] sm:$0xff] %v5280_v56 }
 0x1b2   :  { %v5209_v23 = vpop.f32.mrf.mxu0  ;;  %1656 = vmatprep.mubr.bf16.mxu1 %v5184_v18  ;;  %v6082_v17 = vpack.c.bf16 %v6080_v34, %v6081_v36  ;;  %6083 = vst [vmem:[#allocation26_spill] sm:$0xff] %v5224_v35  ;;  %6084 = vst [vmem:[#allocation24_spill] sm:$0xff] %v5229_v59  ;;  %v5238_v27 = vld [vmem:[%s5864_s2 + $0x70] ss:$8 sps:$4 sm:$0xff]   ;;  %v5339_v18 = vld [vmem:[%s5864_s2 + $0xa0] ss:$8 sps:$4 sm:$0xff]  }
 0x1b3   :  { %1544 = vmatmul.mubr.bf16.gmra.mxu0 %v5191_v15  ;;  %v1313_v20 = vpop.f32.mrf.mxu1  ;;  %6085 = vst [vmem:[#allocation23_spill] sm:$0xff] %v5238_v27  ;;  %v6087_v34 = vld [vmem:[#allocation18_spill] sm:$0xff] }
 0x1b4   :  { %v5215_v44 = vpop.f32.mrf.mxu0  ;;  %3701 = vmatpush3.bf16.msra.mxu0 %v6079_v14  ;;  %1551 = vmatprep.mubr.bf16.mxu0 %v5201_v54  ;;  %v5365_v35 = vld [vmem:[%s5864_s2 + $0xb0] ss:$8 sps:$4 sm:$0xff]  }
 0x1b5   :  { %3702 = vmatprep.subr.bf16.mxu0 %v6082_v17  ;;  %v6086_v17 = vld [vmem:[#allocation19_spill] sm:$0xff]  ;;  %v5253_v20 = vpop.f32.mrf.mxu1  ;;  %6121 = vst [vmem:[#allocation59_spill] sm:$0xff] %v5365_v35 }
 0x1b6   :  { %v5231_v53 = vpop.f32.mrf.mxu0  ;;  %v6088_v36 = vpack.c.bf16 %v6086_v17, %v6087_v34  ;;  %6093 = vst [vmem:[#allocation43_spill] sm:$0xff] %v5253_v20  ;;  %v6094_v17 = vld [vmem:[#allocation25_spill] sm:$0xff] }
 0x1b7   :  { %v1316_v34 = vpop.f32.mrf.mxu1 }
 0x1b8   :  { %v5240_v14 = vpop.f32.mrf.mxu0  ;;  %3703 = vmatpush3.bf16.msra.mxu0 %v6088_v36 }
 0x1b9   :  { %3704 = vmatprep.subr.bf16.mxu0 %v6092_v8  ;;  %1657 = vmatmul.mubr.bf16.gmra.mxu1 %v5229_v59  ;;  %v6099_v8 = vld [vmem:[#allocation36_spill] sm:$0xff]  ;;  %v5271_v40 = vpop.f32.mrf.mxu1 }
 0x1ba   :  { %v5256_v21 = vpop.f32.mrf.mxu0  ;;  %1947 = vmatprep.mubr.bf16.mxu1 %v6094_v17  ;;  %v6100_v29 = vpack.c.bf16 %v6098_v11, %v6099_v8  ;;  %6101 = vst [vmem:[#allocation42_spill] sm:$0xff] %v5271_v40  ;;  %6117 = vst [vmem:[#allocation36_spill] sm:$0xff] %v5339_v18 }
 0x1bb   :  { %1552 = vmatmul.mubr.bf16.gmra.mxu0 %v5238_v27  ;;  %v1321_v34 = vpop.f32.mrf.mxu1 }
 0x1bc   :  { %v5262_v36 = vpop.f32.mrf.mxu0  ;;  %3705 = vmatpush3.bf16.msra.mxu0 %v6097_v12  ;;  %1762 = vmatprep.mubr.bf16.mxu0 %v5248_v25  ;;  %v6104_v12 = vld [vmem:[#allocation13_spill] sm:$0xff] }
 0x1bd   :  { %3706 = vmatprep.subr.bf16.mxu0 %v6100_v29  ;;  %v6105_v25 = vpack.c.bf16 %v6103_v42, %v6104_v12  ;;  %v5290_v29 = vld [vmem:[%s5864_s2 + $0x94] ss:$8 sps:$4 sm:$0xff]   ;;  %v5292_v11 = vpop.f32.mrf.mxu1  ;;  %v5318_v34 = vld [vmem:[%s5864_s2 + $0xa4] ss:$8 sps:$4 sm:$0xff]  }
 0x1be   :  { %v5273_v26 = vpop.f32.mrf.mxu0  ;;  %6106 = vst [vmem:[#allocation20_spill] sm:$0xff] %v5290_v29  ;;  %6107 = vst [vmem:[#allocation41_spill] sm:$0xff] %v5292_v11  ;;  %v5346_v12 = vld [vmem:[%s5864_s2 + $0xb4] ss:$8 sps:$4 sm:$0xff]  }
 0x1bf   :  { %v1324_v17 = vpop.f32.mrf.mxu1  ;;  %6114 = vst [vmem:[#allocation17_spill] sm:$0xff] %v5318_v34  ;;  %6118 = vst [vmem:[#allocation15_spill] sm:$0xff] %v5346_v12 }
 0x1c0   :  { %v5282_v30 = vpop.f32.mrf.mxu0  ;;  %3707 = vmatpush3.bf16.msra.mxu0 %v6105_v25 }
 0x1c1   :  { %v5302_v25 = vpop.f32.mrf.mxu1 }
 0x1c2   :  { %v5294_v8 = vpop.f32.mrf.mxu0  ;;  %6110 = vst [vmem:[#allocation18_spill] sm:$0xff] %v5302_v25 }
 0x1c3   :  { %6108 = vst [vmem:[#allocation40_spill] sm:$0xff] %v5294_v8  ;;  %1763 = vmatmul.mubr.bf16.vlgmr.msra.gmra.mxu0 %v5280_v56  ;;  %v1329_v59 = vpop.f32.mrf.mxu1 }
 0x1c4   :  { %v5299_v27 = vpop.f32.mrf.mxu0  ;;  %1770 = vmatprep.mubr.bf16.mxu0 %v5290_v29 }
 0x1c5   :  { %6109 = vst [vmem:[#allocation19_spill] sm:$0xff] %v5299_v27  ;;  %v5320_v29 = vpop.f32.mrf.mxu1 }
 0x1c6   :  { %v5304_v42 = vpop.f32.mrf.mxu0  ;;  %6115 = vst [vmem:[#allocation16_spill] sm:$0xff] %v5320_v29 }
 0x1c7   :  { %6111 = vst [vmem:[#allocation39_spill] sm:$0xff] %v5304_v42  ;;  %v1332_v59 = vpop.f32.mrf.mxu1 }
 0x1c8   :  { %v5313_v17 = vpop.f32.mrf.mxu0 }
 0x1c9   :  { %6113 = vst [vmem:[#allocation25_spill] sm:$0xff] %v5313_v17  ;;  %v5330_v54 = vpop.f32.mrf.mxu1 }
 0x1ca   :  { %v5322_v56 = vpop.f32.mrf.mxu0  ;;  %6116 = vst [vmem:[#allocation37_spill] sm:$0xff] %v5330_v54 }
 0x1cb   :  { %1771 = vmatmul.mubr.bf16.gmra.mxu0 %v5311_v45  ;;  %v1337_v15 = vpop.f32.mrf.mxu1 }
 0x1cc   :  { %v5327_v22 = vpop.f32.mrf.mxu0  ;;  %1778 = vmatprep.mubr.bf16.mxu0 %v5318_v34 }
 0x1cd   :  { %v5348_v34 = vpop.f32.mrf.mxu1 }
 0x1ce   :  { %v5332_v33 = vpop.f32.mrf.mxu0  ;;  %6119 = vst [vmem:[#allocation13_spill] sm:$0xff] %v5348_v34 }
 0x1cf   :  { %v1340_v15 = vpop.f32.mrf.mxu1 }
 0x1d0   :  { %v5341_v59 = vpop.f32.mrf.mxu0 }
 0x1d1   :  { %v5358_v60 = vpop.f32.mrf.mxu1 }
 0x1d2   :  { %v5350_v45 = vpop.f32.mrf.mxu0  ;;  %6120 = vst [vmem:[#allocation58_spill] sm:$0xff] %v5358_v60 }
 0x1d3   :  { %1779 = vmatmul.mubr.bf16.gmra.mxu0 %v5339_v18  ;;  %v1345_v63 = vpop.f32.mrf.mxu1 }
 0x1d4   :  { %v5355_v6 = vpop.f32.mrf.mxu0  ;;  %1786 = vmatprep.mubr.bf16.mxu0 %v5346_v12  ;;  %v6123_v63 = vld [vmem:[#allocation30_spill] sm:$0xff] }
 0x1d5   :  { %v5369_v38 = vpop.f32.mrf.mxu1 }
 0x1d6   :  { %v5360_v19 = vpop.f32.mrf.mxu0  ;;  %6122 = vst [vmem:[#allocation60_spill] sm:$0xff] %v5369_v38 }
 0x1d7   :  { %v1348_v12 = vpop.f32.mrf.mxu1 }
 0x1d8   :  { %v5367_v20 = vpop.f32.mrf.mxu0 }
 0x1d9   :  { %v5379_v34 = vpop.f32.mrf.mxu1 }
 0x1da   :  { %v5371_v15 = vpop.f32.mrf.mxu0  ;;  %6124 = vst [vmem:[#allocation30_spill] sm:$0xff] %v5379_v34 }
 0x1db   :  { %1787 = vmatmul.mubr.bf16.gmra.mxu0 %v5365_v35  ;;  %v1353_v43 = vpop.f32.mrf.mxu1 }
 0x1dc   :  { %v5376_v54 = vpop.f32.mrf.mxu0  ;;  %2052 = vmatprep.mubr.bf16.mxu0 %v6123_v63 }
 0x1dd   :  { %v5385_v40 = vpop.f32.mrf.mxu1 }
 0x1de   :  { %v5381_v55 = vpop.f32.mrf.mxu0  ;;  %6125 = vst [vmem:[#allocation61_spill] sm:$0xff] %v5385_v40 }
 0x1df   :  { %v1356_v12 = vpop.f32.mrf.mxu1 }
 0x1e0   :  { %v5383_v9 = vpop.f32.mrf.mxu0 }
 0x1e1   :  { %v5389_v35 = vpop.f32.mrf.mxu1 }
 0x1e2   :  { %v1070_v11 = vpop.f32.mrf.mxu0  ;;  %6126 = vst [vmem:[#allocation62_spill] sm:$0xff] %v5389_v35 }
 0x1e3   :  { %v1361_v50 = vpop.f32.mrf.mxu1 }
 0x1e4   :  { %v1072_v60 = vpop.f32.mrf.mxu0 }
 0x1e5   :  { %v5391_v25 = vpop.f32.mrf.mxu1 }
 0x1e6   :  { %v1074_v38 = vpop.f32.mrf.mxu0  ;;  %6127 = vst [vmem:[#allocation63_spill] sm:$0xff] %v5391_v25 }
 0x1e7   :  { %v1364_v62 = vpop.f32.mrf.mxu1 }
 0x1e8   :  { %v1076_v63 = vpop.f32.mrf.mxu0 }
 0x1e9   :  { %v5395_v48 = vpop.f32.mrf.mxu1 }
 0x1ea   :  { %v1080_v29 = vpop.f32.mrf.mxu0  ;;  %6128 = vst [vmem:[#allocation64_spill] sm:$0xff] %v5395_v48 }
 0x1eb   :  { %v1369_v0 = vpop.f32.mrf.mxu1 }
 0x1ec   :  { %v1082_v2 = vpop.f32.mrf.mxu0 }
 0x1ed   :  { %v5397_v12 = vpop.f32.mrf.mxu1 }
 0x1ee   :  { %v1084_v37 = vpop.f32.mrf.mxu0  ;;  %6129 = vst [vmem:[#allocation65_spill] sm:$0xff] %v5397_v12 }
 0x1ef   :  { %v1372_v40 = vpop.f32.mrf.mxu1 }
 0x1f0   :  { %v1086_v18 = vpop.f32.mrf.mxu0 }
 0x1f1   :  { %v5399_v50 = vpop.f32.mrf.mxu1 }
 0x1f2   :  { %v1090_v34 = vpop.f32.mrf.mxu0  ;;  %6130 = vst [vmem:[#allocation66_spill] sm:$0xff] %v5399_v50 }
 0x1f3   :  { %v1377_v8 = vpop.f32.mrf.mxu1 }
 0x1f4   :  { %v1092_v49 = vpop.f32.mrf.mxu0  ;;  %v1858_v8 = vpack.c.bf16 %v5282_v30, %v5262_v36 }
 0x1f5   :  { %v5401_v17 = vpop.f32.mrf.mxu1 }
 0x1f6   :  { %v1094_v28 = vpop.f32.mrf.mxu0  ;;  %6131 = vst [vmem:[#allocation67_spill] sm:$0xff] %v5401_v17  ;;  %v6132_v17 = vpack.c.bf16 %v5273_v26, %v5256_v21  ;;  %v1839_v21 = vpack.c.bf16 %v1074_v38, %v1070_v11  ;;  %v1863_v26 = vpack.c.bf16 %v1076_v63, %v1072_v60  ;;  %v1855_v38 = vpack.c.bf16 %v5145_v58, %v5116_v24  ;;  %v6145_v58 = vld [vmem:[#allocation40_spill] sm:$0xff]  ;;  %v4219_v11 = vld [vmem:[%s5866_s4 + $0x54] ss:$8 sps:$4 sm:$0xff]  }
 0x1f7   :  { %v1380_v62 = vpop.f32.mrf.mxu1  ;;  %v1841_v12 = vpack.c.bf16 %v1094_v28, %v1090_v34  ;;  %v1857_v28 = vpack.c.bf16 %v5240_v14, %v5215_v44  ;;  %v6136_v60 = vpack.c.bf16 %v5076_v57, %v5052_v61  ;;  %v1853_v24 = vpack.c.bf16 %v5045_v16, %v5026_v13  ;;  %v6142_v13 = vld [vmem:[#allocation19_spill] sm:$0xff]  ;;  %v6143_v16 = vld [vmem:[#allocation25_spill] sm:$0xff]  ;;  %v6155_v34 = vld [vmem:[#allocation16_spill] sm:$0xff] }
 0x1f8   :  { %v1096_v42 = vpop.f32.mrf.mxu0  ;;  %v6138_v61 = vpack.c.bf16 %v5332_v33, %v5322_v56  ;;  %v1852_v57 = vpack.c.bf16 %v5011_v41, %v4994_v32  ;;  %v4213_v56 = vld [vmem:[%s5866_s4 + $0x74] ss:$8 sps:$4 sm:$0xff]   ;;  %v6153_v14 = vld [vmem:[#allocation33_spill] sm:$0xff] }
 0x1f9   :  { %v5403_v25 = vpop.f32.mrf.mxu1  ;;  %v1865_v62 = vpack.c.bf16 %v1096_v42, %v1092_v49  ;;  %v6148_v33 = vld [vmem:[#allocation51_spill] sm:$0xff]  ;;  %v6149_v41 = vld [vmem:[#allocation50_spill] sm:$0xff] }
 0x1fa   :  { %v1100_v43 = vpop.f32.mrf.mxu0  ;;  %v6156_v42 = vld [vmem:[#allocation18_spill] sm:$0xff] }
 0x1fb   :  { %v1385_v27 = vpop.f32.mrf.mxu1 }
 0x1fc   :  { %v1102_v35 = vpop.f32.mrf.mxu0 }
 0x1fd   :  { %v5405_v40 = vpop.f32.mrf.mxu1  ;;  %v6160_v63 = vld [vmem:[#allocation67_spill] sm:$0xff] }
 0x1fe   :  { %v1104_v48 = vpop.f32.mrf.mxu0  ;;  %v2099_v30 = vpack.c.bf16 %v5405_v40, %v5403_v25  ;;  %v6159_v25 = vld [vmem:[#allocation66_spill] sm:$0xff] }
 0x1ff   :  { %v1842_v0 = vpack.c.bf16 %v1104_v48, %v1100_v43  ;;  %v1388_v50 = vpop.f32.mrf.mxu1  ;;  %v1840_v48 = vpack.c.bf16 %v1084_v37, %v1080_v29  ;;  %v6134_v37 = vpack.c.bf16 %v5179_v47, %v5158_v7  ;;  %v1837_v7 = vpack.c.bf16 %v5360_v19, %v5350_v45  ;;  %v6150_v47 = vld [vmem:[#allocation48_spill] sm:$0xff]  ;;  %v6154_v29 = vld [vmem:[#allocation29_spill] sm:$0xff] }
 0x200   :  { %v1106_v51 = vpop.f32.mrf.mxu0  ;;  %v6137_v45 = vpack.c.bf16 %v5033_v5, %v5017_v4  ;;  %v1859_v4 = vpack.c.bf16 %v6143_v16, %v6142_v13  ;;  %v6144_v5 = vld [vmem:[#allocation39_spill] sm:$0xff]  ;;  %v4216_v19 = vld [vmem:[%s5866_s4 + $0x64] ss:$8 sps:$4 sm:$0xff]   ;;  %v2098_v43 = vpack.c.bf16 %v6160_v63, %v6159_v25  ;;  %v6187_v13 = vld [vmem:[#allocation30_spill] sm:$0xff] }
 0x201   :  { %v1866_v52 = vpack.c.bf16 %v1106_v51, %v1102_v35  ;;  %3772 = vmatprep.subr.bf16.mxu0 %v1842_v0  ;;  %v1391_v27 = vpop.f32.mrf.mxu1  ;;  %v6133_v51 = vpack.c.bf16 %v5231_v53, %v5209_v23  ;;  %v1864_v35 = vpack.c.bf16 %v1086_v18, %v1082_v2  ;;  %v1838_v2 = vpack.c.bf16 %v5381_v55, %v5371_v15  ;;  %v6152_v23 = vld [vmem:[#allocation34_spill] sm:$0xff]  ;;  %v6161_v50 = vld [vmem:[#allocation41_spill] sm:$0xff]  ;;  %v6212_v63 = vld [vmem:[#allocation36_spill] sm:$0xff] }
 0x202   :  { %3773 = vmatpush3.bf16.msra.mxu0 %v6132_v17  ;;  %v6135_v53 = vpack.c.bf16 %v5129_v1, %v5108_v39  ;;  %v1854_v55 = vpack.c.bf16 %v5095_v10, %v5064_v3  ;;  %v1861_v39 = vpack.c.bf16 %v5367_v20, %v5355_v6  ;;  %v1860_v3 = vpack.c.bf16 %v5341_v59, %v5327_v22  ;;  %v6139_v10 = vld [vmem:[#allocation54_spill] sm:$0xff]  ;;  %v6147_v22 = vld [vmem:[#allocation49_spill] sm:$0xff] }
 0x203   :  { %3732 = vmatprep.subr.bf16.mxu1 %v1866_v52  ;;  %3774 = vmatprep.subr.bf16.mxu0 %v1841_v12  ;;  %v1393_v36 = vpop.f32.mrf.mxu1  ;;  %v1856_v52 = vpack.c.bf16 %v5193_v46, %v5166_v31  ;;  %v1862_v31 = vpack.c.bf16 %v5383_v9, %v5376_v54  ;;  %v6140_v9 = vld [vmem:[#allocation52_spill] sm:$0xff]  ;;  %v6146_v6 = vpack.c.bf16 %v6144_v5, %v6145_v58  ;;  %v4211_v46 = vld [vmem:[%s5866_s4 + $0x70] ss:$8 sps:$4 sm:$0xff]  }
 0x204   :  { %3733 = vmatpush3.bf16.msra.mxu1 %v1858_v8  ;;  %v6141_v1 = vpack.c.bf16 %v6139_v10, %v6140_v9  ;;  %v1851_v32 = vpack.c.bf16 %v6148_v33, %v6147_v22  ;;  %v6151_v18 = vpack.c.bf16 %v6149_v41, %v6150_v47  ;;  %v4214_v20 = vld [vmem:[%s5866_s4 + $0x60] ss:$8 sps:$4 sm:$0xff]   ;;  %v6157_v17 = vpack.c.bf16 %v6155_v34, %v6156_v42  ;;  %v6158_v59 = vld [vmem:[#allocation14_spill] sm:$0xff]  ;;  %v4222_v12 = vld [vmem:[%s5866_s4 + $0x44] ss:$8 sps:$4 sm:$0xff]  }
 0x205   :  { %3734 = vmatprep.subr.bf16.mxu1 %v1865_v62  ;;  %v1394_v49 = vpop.f32.mrf.mxu1  ;;  %v4217_v15 = vld [vmem:[%s5866_s4 + $0x50] ss:$8 sps:$4 sm:$0xff]   ;;  %v6164_v8 = vld [vmem:[#allocation8_spill] sm:$0xff]  ;;  %v4225_v36 = vld [vmem:[%s5866_s4 + $0x34] ss:$8 sps:$4 sm:$0xff]  }
 0x206   :  { %3775 = vmatpush3.bf16.msra.mxu0 %v6133_v51  ;;  %v2100_v54 = vpack.c.bf16 %v1394_v49, %v1391_v27  ;;  %v6162_v0 = vld [vmem:[#allocation42_spill] sm:$0xff]  ;;  %v6165_v62 = vld [vmem:[#allocation11_spill] sm:$0xff]  ;;  %v6166_v27 = vld [vmem:[#allocation64_spill] sm:$0xff] }
 0x207   :  { %3776 = vmatprep.subr.bf16.mxu0 %v1840_v48  ;;  %v1396_v44 = vpop.f32.mrf.mxu1  ;;  %v6163_v40 = vpack.c.bf16 %v6161_v50, %v6162_v0  ;;  %v4220_v48 = vld [vmem:[%s5866_s4 + $0x40] ss:$8 sps:$4 sm:$0xff]   ;;  %v6170_v49 = vld [vmem:[#allocation26_spill] sm:$0xff]  ;;  %v4234_v5 = vld [vmem:[%s5866_s4 + $0x4] ss:$8 sps:$4 sm:$0xff]  }
 0x208   :  { %3735 = vmatpush3.bf16.msra.mxu1 %v1857_v28  ;;  %v6167_v28 = vld [vmem:[#allocation65_spill] sm:$0xff]  ;;  %v6185_v9 = vld [vmem:[#allocation44_spill] sm:$0xff]  ;;  %v6193_v33 = vld [vmem:[#allocation58_spill] sm:$0xff] }
 0x209   :  { %3736 = vmatprep.subr.bf16.mxu1 %v1864_v35  ;;  %v2097_v51 = vpack.c.bf16 %v6167_v28, %v6166_v27  ;;  %v6168_v35 = vld [vmem:[#allocation9_spill] sm:$0xff]  ;;  %v6189_v58 = vld [vmem:[#allocation12_spill] sm:$0xff] }
 0x20a   :  { %3777 = vmatpush3.bf16.msra.mxu0 %v6134_v37  ;;  %v6172_v37 = vld [vmem:[#allocation35_spill] sm:$0xff]  ;;  %v4228_v44 = vld [vmem:[%s5866_s4 + $0x24] ss:$8 sps:$4 sm:$0xff]  }
 0x20b   :  { %3778 = vmatprep.subr.bf16.mxu0 %v1839_v21  ;;  %v6169_v21 = vld [vmem:[#allocation43_spill] sm:$0xff]  ;;  %v6192_v22 = vld [vmem:[#allocation60_spill] sm:$0xff]  ;;  %v6206_v34 = vld [vmem:[#allocation53_spill] sm:$0xff] }
 0x20c   :  { %3737 = vmatpush3.bf16.msra.mxu1 %v1856_v52  ;;  %v6171_v52 = vpack.c.bf16 %v6169_v21, %v6170_v49  ;;  %v6195_v41 = vld [vmem:[#allocation24_spill] sm:$0xff]  ;;  %v6211_v25 = vld [vmem:[#allocation17_spill] sm:$0xff] }
 0x20d   :  { %3738 = vmatprep.subr.bf16.mxu1 %v1863_v26  ;;  %v4223_v26 = vld [vmem:[%s5866_s4 + $0x30] ss:$8 sps:$4 sm:$0xff]   ;;  %v4232_v47 = vld [vmem:[%s5866_s4] ss:$8 sps:$4 sm:$0xff]  }
 0x20e   :  { %3779 = vmatpush3.bf16.msra.mxu0 %v6135_v53 }
 0x20f   :  { %3780 = vmatprep.subr.bf16.mxu0 %v1838_v2  ;;  %v6173_v2 = vld [vmem:[#allocation45_spill] sm:$0xff] }
 0x210   :  { %3739 = vmatpush3.bf16.msra.mxu1 %v1855_v38  ;;  %v6174_v38 = vld [vmem:[#allocation46_spill] sm:$0xff] }
 0x211   :  { %3740 = vmatprep.subr.bf16.mxu1 %v1862_v31  ;;  %v6175_v53 = vpack.c.bf16 %v6173_v2, %v6174_v38  ;;  %v6176_v31 = vld [vmem:[#allocation63_spill] sm:$0xff] }
 0x212   :  { %3781 = vmatpush3.bf16.msra.mxu0 %v6136_v60  ;;  %v6179_v60 = vld [vmem:[#allocation47_spill] sm:$0xff] }
 0x213   :  { %3782 = vmatprep.subr.bf16.mxu0 %v1837_v7  ;;  %v6177_v7 = vld [vmem:[#allocation62_spill] sm:$0xff] }
 0x214   :  { %3741 = vmatpush3.bf16.msra.mxu1 %v1854_v55  ;;  %v6178_v55 = vpack.c.bf16 %v6176_v31, %v6177_v7 }
 0x215   :  { %3742 = vmatprep.subr.bf16.mxu1 %v1861_v39  ;;  %v6180_v39 = vld [vmem:[#allocation28_spill] sm:$0xff] }
 0x216   :  { %3783 = vmatpush3.bf16.msra.mxu0 %v6137_v45  ;;  %v6181_v45 = vld [vmem:[#allocation27_spill] sm:$0xff] }
 0x217   :  { %3784 = vmatprep.subr.bf16.mxu0 %v6138_v61  ;;  %v6182_v61 = vld [vmem:[#allocation32_spill] sm:$0xff] }
 0x218   :  { %3743 = vmatpush3.bf16.msra.mxu1 %v1853_v24  ;;  %v4226_v24 = vld [vmem:[%s5866_s4 + $0x20] ss:$8 sps:$4 sm:$0xff]  }
 0x219   :  { %3744 = vmatprep.subr.bf16.mxu1 %v1860_v3  ;;  %v4231_v3 = vld [vmem:[%s5866_s4 + $0x14] ss:$8 sps:$4 sm:$0xff]  }
 0x21a   :  { %3785 = vmatpush3.bf16.msra.mxu0 %v6141_v1  ;;  %v6186_v1 = vld [vmem:[#allocation61_spill] sm:$0xff] }
 0x21b   :  { %3786 = vmatprep.subr.bf16.mxu0 %v6146_v6  ;;  %v6188_v16 = vpack.c.bf16 %v6186_v1, %v6187_v13  ;;  %v6190_v6 = vld [vmem:[#allocation31_spill] sm:$0xff] }
 0x21c   :  { %3745 = vmatpush3.bf16.msra.mxu1 %v1852_v57  ;;  %v6183_v57 = vld [vmem:[#allocation10_spill] sm:$0xff] }
 0x21d   :  { %3746 = vmatprep.subr.bf16.mxu1 %v1859_v4  ;;  %v6184_v10 = vpack.c.bf16 %v6182_v61, %v6183_v57  ;;  %v4229_v4 = vld [vmem:[%s5866_s4 + $0x10] ss:$8 sps:$4 sm:$0xff]  }
 0x21e   :  { %3787 = vmatpush3.bf16.msra.mxu0 %v6151_v18  ;;  %v6196_v18 = vmov 0  }
 0x21f   :  { %2366 = vmatprep.subr.bf16.mxu0 %v4213_v56  ;;  %v6191_v56 = vpack.c.bf16 %v6189_v58, %v6190_v6 }
 0x220   :  { %3747 = vmatpush3.bf16.msra.mxu1 %v1851_v32  ;;  %v6194_v32 = vpack.c.bf16 %v6192_v22, %v6193_v33 }
 0x221   :  { %3812 = vmatprep.subr.bf16.mxu1 %v2100_v54  ;;  %2053 = vmatmul.mubr.bf16.vlgmr.msra.gmra.mxu0 %v6152_v23  ;;  %v6198_v54 = vld [vmem:[#allocation57_spill] sm:$0xff] }
 0x222   :  { %2060 = vmatprep.mubr.bf16.mxu0 %v6153_v14  ;;  %2367 = vmatpush1.bf16.msra.mxu0 %v4211_v46  ;;  %v6197_v46 = vld [vmem:[#allocation23_spill] sm:$0xff]  ;;  %v6201_v14 = vld [vmem:[#allocation22_spill] sm:$0xff] }
 0x223   :  { %1948 = vmatmul.mubr.bf16.vlgmr.msra.gmra.mxu1 %v6154_v29  ;;  %2368 = vmatprep.subr.bf16.mxu0 %v4216_v19  ;;  %v6199_v19 = vld [vmem:[#allocation56_spill] sm:$0xff] }
 0x224   :  { %3813 = vmatpush3.bf16.msra.mxu1 %v6157_v17  ;;  %1955 = vmatprep.mubr.bf16.mxu1 %v6158_v59  ;;  %v6200_v23 = vpack.c.bf16 %v6198_v54, %v6199_v19  ;;  %v6208_v17 = vld [vmem:[#allocation21_spill] sm:$0xff]  ;;  %v6209_v59 = vld [vmem:[#allocation20_spill] sm:$0xff] }
 0x225   :  { %3814 = vmatprep.subr.bf16.mxu1 %v2099_v30  ;;  %v6203_v30 = vld [vmem:[#allocation37_spill] sm:$0xff] }
 0x226   :  { %2369 = vmatpush1.bf16.msra.mxu0 %v4214_v20  ;;  %v6202_v20 = vld [vmem:[#allocation13_spill] sm:$0xff] }
 0x227   :  { %2370 = vmatprep.subr.bf16.mxu0 %v4219_v11  ;;  %v6204_v29 = vpack.c.bf16 %v6202_v20, %v6203_v30  ;;  %v6205_v11 = vld [vmem:[#allocation55_spill] sm:$0xff]  ;;  %v5593_v19 = vld [vmem:[%s5865_s3 + $0x8] sm:$0xff] }
 0x228   :  { %3815 = vmatpush3.bf16.msra.mxu1 %v6163_v40  ;;  %v6207_v42 = vpack.c.bf16 %v6205_v11, %v6206_v34 }
 0x229   :  { %3816 = vmatprep.subr.bf16.mxu1 %v2098_v43  ;;  %2061 = vmatmul.mubr.bf16.gmra.mxu0 %v6164_v8  ;;  %v6213_v43 = vld [vmem:[#allocation15_spill] sm:$0xff] }
 0x22a   :  { %2068 = vmatprep.mubr.bf16.mxu0 %v6165_v62  ;;  %2371 = vmatpush1.bf16.msra.mxu0 %v4217_v15  ;;  %v6210_v15 = vld [vmem:[#allocation38_spill] sm:$0xff] }
 0x22b   :  { %1956 = vmatmul.mubr.bf16.gmra.mxu1 %v6168_v35  ;;  %2372 = vmatprep.subr.bf16.mxu0 %v4222_v12  ;;  %v6214_v12 = vld [vmem:[#allocation59_spill] sm:$0xff] }
 0x22c   :  { %3817 = vmatpush3.bf16.msra.mxu1 %v6171_v52  ;;  %1963 = vmatprep.mubr.bf16.mxu1 %v6172_v37 }
 0x22d   :  { %3818 = vmatprep.subr.bf16.mxu1 %v2097_v51 }
 0x22e   :  { %2373 = vmatpush1.bf16.msra.mxu0 %v4220_v48 }
 0x22f   :  { %2374 = vmatprep.subr.bf16.mxu0 %v4225_v36 }
 0x230   :  { %3819 = vmatpush3.bf16.msra.mxu1 %v6175_v53 }
 0x231   :  { %3820 = vmatprep.subr.bf16.mxu1 %v6178_v55  ;;  %2069 = vmatmul.mubr.bf16.gmra.mxu0 %v6179_v60 }
 0x232   :  { %2076 = vmatprep.mubr.bf16.mxu0 %v6180_v39  ;;  %2375 = vmatpush1.bf16.msra.mxu0 %v4223_v26 }
 0x233   :  { %1964 = vmatmul.mubr.bf16.gmra.mxu1 %v6181_v45  ;;  %2376 = vmatprep.subr.bf16.mxu0 %v4228_v44 }
 0x234   :  { %3821 = vmatpush3.bf16.msra.mxu1 %v6184_v10  ;;  %1971 = vmatprep.mubr.bf16.mxu1 %v6185_v9 }
 0x235   :  { %3822 = vmatprep.subr.bf16.mxu1 %v6188_v16 }
 0x236   :  { %2377 = vmatpush1.bf16.msra.mxu0 %v4226_v24 }
 0x237   :  { %2378 = vmatprep.subr.bf16.mxu0 %v4231_v3 }
 0x238   :  { %3823 = vmatpush3.bf16.msra.mxu1 %v6191_v56 }
 0x239   :  { %3824 = vmatprep.subr.bf16.mxu1 %v6194_v32  ;;  %2077 = vmatmul.mubr.bf16.gmra.mxu0 %v6195_v41 }
 0x23a   :  { %2379 = vmatpush1.bf16.msra.mxu0 %v4229_v4  ;;  %2398 = vmatprep.mubr.bf16.mxu0 %v6196_v18  ;;  %v5587_v4 = vld [vmem:[%s5865_s3] sm:$0xff] }
 0x23b   :  { %1972 = vmatmul.mubr.bf16.gmra.mxu1 %v6197_v46  ;;  %2380 = vmatprep.subr.bf16.mxu0 %v4234_v5 }
 0x23c   :  { %3825 = vmatpush3.bf16.msra.mxu1 %v6200_v23  ;;  %2181 = vmatprep.mubr.bf16.mxu1 %v6201_v14 }
 0x23d   :  { %3826 = vmatprep.subr.bf16.mxu1 %v6204_v29 }
 0x23e   :  { %2381 = vmatpush1.bf16.msra.mxu0 %v4232_v47 }
 0x240   :  { %3827 = vmatpush3.bf16.msra.mxu1 %v6207_v42 }
 0x243   :  { %2182 = vmatmul.mubr.bf16.vlgmr.msra.gmra.mxu1 %v6208_v17 }
 0x244   :  { %2189 = vmatprep.mubr.bf16.mxu1 %v6209_v59  ;;  %v5599_v59 = vld [vmem:[%s5865_s3 + $0x10] sm:$0xff] }
 0x24b   :  { %2190 = vmatmul.mubr.bf16.gmra.mxu1 %v6210_v15 }
 0x24c   :  { %2197 = vmatprep.mubr.bf16.mxu1 %v6211_v25 }
 0x253   :  { %2198 = vmatmul.mubr.bf16.gmra.mxu1 %v6212_v63 }
 0x254   :  { %2205 = vmatprep.mubr.bf16.mxu1 %v6213_v43 }
 0x25b   :  { %2206 = vmatmul.mubr.bf16.gmra.mxu1 %v6214_v12 }
 0x261   :  { %v3668_v50 = vpop.f32.mrf.mxu1 }
 0x263   :  { %v3628_v0 = vpop.f32.mrf.mxu0  ;;  %v3669_v40 = vpop.f32.mrf.mxu1 }
 0x264   :  { %v3670_v24 = vadd.f32 %v3669_v40, %v3668_v50 }
 0x265   :  { %v3629_v8 = vpop.f32.mrf.mxu0  ;;  %v3671_v62 = vpop.f32.mrf.mxu1 }
 0x266   :  { %v3630_v39 = vadd.f32 %v3629_v8, %v3628_v0 }
 0x267   :  { %v3631_v48 = vpop.f32.mrf.mxu0  ;;  %v3672_v28 = vpop.f32.mrf.mxu1 }
 0x268   :  { %v1635_v10 = vadd.f32 %v3670_v24, %v3630_v39  ;;  %v3673_v9 = vadd.f32 %v3672_v28, %v3671_v62  ;;  %v5605_v28 = vld [vmem:[%s5865_s3 + $0x18] sm:$0xff] }
 0x269   :  { %v3632_v27 = vpop.f32.mrf.mxu0  ;;  %v3674_v36 = vpop.f32.mrf.mxu1 }
 0x26a   :  { %v3633_v57 = vadd.f32 %v3632_v27, %v3631_v48 }
 0x26b   :  { %v3634_v51 = vpop.f32.mrf.mxu0  ;;  %v3675_v52 = vpop.f32.mrf.mxu1 }
 0x26c   :  { %v1638_v6 = vadd.f32 %v3673_v9, %v3633_v57  ;;  %v3676_v56 = vadd.f32 %v3675_v52, %v3674_v36 }
 0x26d   :  { %v3635_v35 = vpop.f32.mrf.mxu0  ;;  %v3677_v26 = vpop.f32.mrf.mxu1 }
 0x26e   :  { %v3636_v58 = vadd.f32 %v3635_v35, %v3634_v51 }
 0x26f   :  { %v3637_v21 = vpop.f32.mrf.mxu0  ;;  %v3678_v38 = vpop.f32.mrf.mxu1 }
 0x270   :  { %v3679_v54 = vadd.f32 %v3678_v38, %v3677_v26  ;;  %v1643_v14 = vadd.f32 %v3676_v56, %v3636_v58 }
 0x271   :  { %v3638_v49 = vpop.f32.mrf.mxu0  ;;  %v3680_v7 = vpop.f32.mrf.mxu1 }
 0x272   :  { %v3639_v46 = vadd.f32 %v3638_v49, %v3637_v21 }
 0x273   :  { %v3640_v37 = vpop.f32.mrf.mxu0  ;;  %v3681_v45 = vpop.f32.mrf.mxu1 }
 0x274   :  { %v1646_v17 = vadd.f32 %v3679_v54, %v3639_v46  ;;  %v3682_v63 = vadd.f32 %v3681_v45, %v3680_v7 }
 0x275   :  { %v3641_v44 = vpop.f32.mrf.mxu0  ;;  %v3683_v1 = vpop.f32.mrf.mxu1 }
 0x276   :  { %v3642_v25 = vadd.f32 %v3641_v44, %v3640_v37 }
 0x277   :  { %v3643_v2 = vpop.f32.mrf.mxu0  ;;  %v3684_v33 = vpop.f32.mrf.mxu1 }
 0x278   :  { %v3685_v27 = vadd.f32 %v3684_v33, %v3683_v1  ;;  %v1651_v35 = vadd.f32 %v3682_v63, %v3642_v25  ;;  %v5619_v1 = vld [vmem:[%s5865_s3 + $0x28] sm:$0xff]  ;;  %v5628_v33 = vld [vmem:[%s5865_s3 + $0x30] sm:$0xff] }
 0x279   :  { %v3644_v53 = vpop.f32.mrf.mxu0  ;;  %v3686_v30 = vpop.f32.mrf.mxu1 }
 0x27a   :  { %v3645_v48 = vadd.f32 %v3644_v53, %v3643_v2  ;;  %v5612_v2 = vld [vmem:[%s5865_s3 + $0x20] sm:$0xff] }
 0x27b   :  { %v5578_v31 = vpop.f32.mrf.mxu0  ;;  %v3687_v50 = vpop.f32.mrf.mxu1 }
 0x27c   :  { %v1654_v44 = vadd.f32 %v3685_v27, %v3645_v48  ;;  %v3688_v7 = vadd.f32 %v3687_v50, %v3686_v30 }
 0x27d   :  { %v3647_v55 = vpop.f32.mrf.mxu0  ;;  %v3689_v21 = vpop.f32.mrf.mxu1 }
 0x27e   :  { %v3648_v53 = vadd.f32 %v3647_v55, %v5578_v31 }
 0x27f   :  { %v5580_v60 = vpop.f32.mrf.mxu0  ;;  %v3690_v45 = vpop.f32.mrf.mxu1 }
 0x280   :  { %v3691_v31 = vadd.f32 %v3690_v45, %v3689_v21 }
 0x281   :  { %v5582_v3 = vpop.f32.mrf.mxu0 }
 0x283   :  { %v3708_v61 = vpop.f32.mrf.mxu0 }
 0x285   :  { %v3709_v13 = vpop.f32.mrf.mxu0 }
 0x286   :  { %v3710_v16 = vadd.f32 %v3709_v13, %v3708_v61 }
 0x287   :  { %v3711_v5 = vpop.f32.mrf.mxu0 }
 0x288   :  { %v1795_v22 = vadd.f32 %v3710_v16, %v1635_v10  ;;  %v3651_v16 = vadd.f32 %v5582_v3, %v5580_v60 }
 0x289   :  { %v3712_v32 = vpop.f32.mrf.mxu0 }
 0x28a   :  { %v1803_v41 = vadd.f32 %v1795_v22, %v5587_v4  ;;  %v3713_v47 = vadd.f32 %v3712_v32, %v3711_v5  ;;  %v1659_v5 = vadd.f32 %v3688_v7, %v3648_v53 }
 0x28b   :  { %v3714_v23 = vpop.f32.mrf.mxu0 }
 0x28c   :  { %v1796_v20 = vadd.f32 %v3713_v47, %v1638_v6  ;;  %v1811_v11 = vmax.f32 %v1803_v41, 0.0  ;;  %v1662_v41 = vadd.f32 %v3691_v31, %v3651_v16 }
 0x28d   :  { %v3715_v29 = vpop.f32.mrf.mxu0 }
 0x28e   :  { %v1804_v34 = vadd.f32 %v1796_v20, %v5593_v19  ;;  %v3716_v42 = vadd.f32 %v3715_v29, %v3714_v23 }
 0x28f   :  { %v3717_v15 = vpop.f32.mrf.mxu0 }
 0x290   :  { %v1812_v43 = vmax.f32 %v1804_v34, 0.0  ;;  %v1797_v12 = vadd.f32 %v3716_v42, %v1643_v14  ;;  %v5634_v14 = vld [vmem:[%s5865_s3 + $0x38] sm:$0xff] }
 0x291   :  { %v3718_v0 = vpop.f32.mrf.mxu0 }
 0x292   :  { %v2262_v40 = vpack.c.bf16 %v1812_v43, %v1811_v11  ;;  %v1805_v8 = vadd.f32 %v1797_v12, %v5599_v59  ;;  %v3719_v62 = vadd.f32 %v3718_v0, %v3717_v15 }
 0x293   :  { %v3720_v51 = vpop.f32.mrf.mxu0 }
 0x294   :  { %v1798_v36 = vadd.f32 %v3719_v62, %v1646_v17  ;;  %2399 = vmatmul.mubr.bf16.vlgmr.msra.gmra.mxu0 %v2262_v40  ;;  %v1813_v52 = vmax.f32 %v1805_v8, 0.0 }
 0x295   :  { %v3721_v49 = vpop.f32.mrf.mxu0  ;;  %2408 = vmatprep.mubr.bf16.mxu0 %v6196_v18 }
 0x296   :  { %v1806_v37 = vadd.f32 %v1798_v36, %v5605_v28  ;;  %v3722_v26 = vadd.f32 %v3721_v49, %v3720_v51 }
 0x297   :  { %v3723_v38 = vpop.f32.mrf.mxu0 }
 0x298   :  { %v1814_v39 = vmax.f32 %v1806_v37, 0.0  ;;  %v1799_v24 = vadd.f32 %v3722_v26, %v1651_v35  ;;  %v4299_v35 = vmov 0.0  }
 0x299   :  { %v3724_v61 = vpop.f32.mrf.mxu0  ;;  %3898 = vmatprep.subr.bf16.mxu1 %v4299_v35  ;;  %3906 = vmatprep.mubr.msk.bf16.mxu1 %vm4300_vm0, %v4299_v35 }
 0x29a   :  { %v2263_v57 = vpack.c.bf16 %v1814_v39, %v1813_v52  ;;  %v1807_v10 = vadd.f32 %v1799_v24, %v5612_v2  ;;  %v3725_v9 = vadd.f32 %v3724_v61, %v3723_v38 }
 0x29b   :  { %v3726_v13 = vpop.f32.mrf.mxu0 }
 0x29c   :  { %v1800_v55 = vadd.f32 %v3725_v9, %v1654_v44  ;;  %2409 = vmatmul.mubr.bf16.gmra.mxu0 %v2263_v57  ;;  %v1815_v6 = vmax.f32 %v1807_v10, 0.0 }
 0x29d   :  { %v3727_v58 = vpop.f32.mrf.mxu0  ;;  %2418 = vmatprep.mubr.bf16.mxu0 %v6196_v18 }
 0x29e   :  { %v1808_v56 = vadd.f32 %v1800_v55, %v5619_v1  ;;  %v3728_v22 = vadd.f32 %v3727_v58, %v3726_v13 }
 0x29f   :  { %v3729_v32 = vpop.f32.mrf.mxu0 }
 0x2a0   :  { %v1816_v47 = vmax.f32 %v1808_v56, 0.0  ;;  %v1801_v60 = vadd.f32 %v3728_v22, %v1659_v5 }
 0x2a1   :  { %v3730_v3 = vpop.f32.mrf.mxu0 }
 0x2a2   :  { %v2264_v46 = vpack.c.bf16 %v1816_v47, %v1815_v6  ;;  %v1809_v54 = vadd.f32 %v1801_v60, %v5628_v33  ;;  %v3731_v23 = vadd.f32 %v3730_v3, %v3729_v32 }
 0x2a4   :  { %v1802_v20 = vadd.f32 %v3731_v23, %v1662_v41  ;;  %2419 = vmatmul.mubr.bf16.gmra.mxu0 %v2264_v46  ;;  %v1817_v30 = vmax.f32 %v1809_v54, 0.0 }
 0x2a5   :  { %2428 = vmatprep.mubr.bf16.mxu0 %v6196_v18 }
 0x2a6   :  { %v1810_v29 = vadd.f32 %v1802_v20, %v5634_v14 }
 0x2a8   :  { %v1818_v11 = vmax.f32 %v1810_v29, 0.0 }
 0x2aa   :  { %v2265_v34 = vpack.c.bf16 %v1818_v11, %v1817_v30 }
 0x2ac   :  { %2429 = vmatmul.mubr.bf16.gmra.mxu0 %v2265_v34 }
 0x2ad   :  { %2438 = vmatprep.mubr.bf16.mxu0 %v6196_v18 }
 0x2e1   :  { %v3788_v42 = vpop.f32.mrf.mxu0 }
 0x2e3   :  { %v3748_v17 = vpop.f32.mrf.mxu1  ;;  %v3789_v15 = vpop.f32.mrf.mxu0 }
 0x2e4   :  { %v3790_v24 = vadd.f32 %v3789_v15, %v3788_v42 }
 0x2e5   :  { %v3749_v25 = vpop.f32.mrf.mxu1  ;;  %v3791_v43 = vpop.f32.mrf.mxu0 }
 0x2e6   :  { %v3750_v39 = vadd.f32 %v3749_v25, %v3748_v17 }
 0x2e7   :  { %v3751_v63 = vpop.f32.mrf.mxu1  ;;  %v3792_v0 = vpop.f32.mrf.mxu0 }
 0x2e8   :  { %v2055_v9 = vadd.f32 %v3790_v24, %v3750_v39  ;;  %v3793_v16 = vadd.f32 %v3792_v0, %v3791_v43 }
 0x2e9   :  { %v3752_v12 = vpop.f32.mrf.mxu1  ;;  %v3794_v62 = vpop.f32.mrf.mxu0 }
 0x2ea   :  { %v3753_v10 = vadd.f32 %v3752_v12, %v3751_v63 }
 0x2eb   :  { %v3754_v50 = vpop.f32.mrf.mxu1  ;;  %v3795_v51 = vpop.f32.mrf.mxu0 }
 0x2ec   :  { %v3796_v56 = vadd.f32 %v3795_v51, %v3794_v62  ;;  %v2058_v22 = vadd.f32 %v3793_v16, %v3753_v10 }
 0x2ed   :  { %v3755_v40 = vpop.f32.mrf.mxu1  ;;  %v3797_v49 = vpop.f32.mrf.mxu0 }
 0x2ee   :  { %v3756_v58 = vadd.f32 %v3755_v40, %v3754_v50 }
 0x2ef   :  { %v3757_v8 = vpop.f32.mrf.mxu1  ;;  %v3798_v26 = vpop.f32.mrf.mxu0 }
 0x2f0   :  { %v2063_v46 = vadd.f32 %v3796_v56, %v3756_v58  ;;  %v3799_v29 = vadd.f32 %v3798_v26, %v3797_v49 }
 0x2f1   :  { %v3758_v48 = vpop.f32.mrf.mxu1  ;;  %v3800_v53 = vpop.f32.mrf.mxu0 }
 0x2f2   :  { %v3759_v23 = vadd.f32 %v3758_v48, %v3757_v8 }
 0x2f3   :  { %v3760_v27 = vpop.f32.mrf.mxu1  ;;  %v3801_v61 = vpop.f32.mrf.mxu0 }
 0x2f4   :  { %v3802_v43 = vadd.f32 %v3801_v61, %v3800_v53  ;;  %v2066_v50 = vadd.f32 %v3799_v29, %v3759_v23 }
 0x2f5   :  { %v3761_v36 = vpop.f32.mrf.mxu1  ;;  %v3803_v31 = vpop.f32.mrf.mxu0 }
 0x2f6   :  { %v3762_v25 = vadd.f32 %v3761_v36, %v3760_v27 }
 0x2f7   :  { %v3763_v21 = vpop.f32.mrf.mxu1  ;;  %v3804_v47 = vpop.f32.mrf.mxu0 }
 0x2f8   :  { %v3805_v27 = vadd.f32 %v3804_v47, %v3803_v31 }
 0x2f9   :  { %v3764_v52 = vpop.f32.mrf.mxu1  ;;  %v3806_v34 = vpop.f32.mrf.mxu0 }
 0x2fa   :  { %v3765_v51 = vadd.f32 %v3764_v52, %v3763_v21 }
 0x2fb   :  { %v5640_v37 = vpop.f32.mrf.mxu1  ;;  %v3807_v40 = vpop.f32.mrf.mxu0 }
 0x2fd   :  { %v3767_v44 = vpop.f32.mrf.mxu1  ;;  %v3809_v53 = vpop.f32.mrf.mxu0 }
 0x2fe   :  { %v3768_v61 = vadd.f32 %v3767_v44, %v5640_v37 }
 0x2ff   :  { %v5642_v38 = vpop.f32.mrf.mxu1 }
 0x301   :  { %v5644_v7 = vpop.f32.mrf.mxu1 }
 0x303   :  { %v3828_v45 = vpop.f32.mrf.mxu1 }
 0x305   :  { %v3829_v57 = vpop.f32.mrf.mxu1 }
 0x306   :  { %v3830_v13 = vadd.f32 %v3829_v57, %v3828_v45 }
 0x307   :  { %v3831_v5 = vpop.f32.mrf.mxu1 }
 0x308   :  { %v2214_v55 = vadd.f32 %v3830_v13, %v2055_v9  ;;  %v2074_v9 = vadd.f32 %v3805_v27, %v3765_v51  ;;  %v4239_v27 = vld [vmem:[%s5869_s7 + $0x70] ss:$8 sps:$4 sm:$0xff]  }
 0x309   :  { %v3832_v6 = vpop.f32.mrf.mxu1 }
 0x30a   :  { %v3833_v32 = vadd.f32 %v3832_v6, %v3831_v5  ;;  %v2222_v60 = vadd.f32 %v2214_v55, %v5587_v4  ;;  %v3810_v5 = vpop.f32.mrf.mxu0  ;;  %v3771_v55 = vadd.f32 %v5644_v7, %v5642_v38 }
 0x30b   :  { %v3834_v41 = vpop.f32.mrf.mxu1  ;;  %v3811_v58 = vadd.f32 %v3810_v5, %v3809_v53  ;;  %v4244_v53 = vld [vmem:[%s5869_s7 + $0x64] ss:$8 sps:$4 sm:$0xff]   ;;  %v4254_v5 = vld [vmem:[%s5869_s7 + $0x20] ss:$8 sps:$4 sm:$0xff]  }
 0x30c   :  { %v2215_v3 = vadd.f32 %v3833_v32, %v2058_v22  ;;  %v2230_v42 = vmax.f32 %v2222_v60, 0.0 }
 0x30d   :  { %v3835_v54 = vpop.f32.mrf.mxu1 }
 0x30e   :  { %v2223_v20 = vadd.f32 %v2215_v3, %v5593_v19  ;;  %v3836_v30 = vadd.f32 %v3835_v54, %v3834_v41  ;;  %v2071_v19 = vadd.f32 %v3802_v43, %v3762_v25 }
 0x30f   :  { %v3837_v11 = vpop.f32.mrf.mxu1 }
 0x310   :  { %v2231_v17 = vmax.f32 %v2223_v20, 0.0  ;;  %v2216_v15 = vadd.f32 %v3836_v30, %v2063_v46 }
 0x311   :  { %v3838_v63 = vpop.f32.mrf.mxu1 }
 0x312   :  { %v2266_v12 = vpack.c.bf16 %v2231_v17, %v2230_v42  ;;  %v3839_v0 = vadd.f32 %v3838_v63, %v3837_v11  ;;  %v2224_v62 = vadd.f32 %v2216_v15, %v5599_v59  ;;  %v3808_v59 = vadd.f32 %v3807_v40, %v3806_v34 }
 0x313   :  { %v3840_v4 = vpop.f32.mrf.mxu1 }
 0x314   :  { %v2217_v8 = vadd.f32 %v3839_v0, %v2066_v50  ;;  %2439 = vmatmul.mubr.bf16.gmra.mxu0 %v2266_v12  ;;  %v2232_v39 = vmax.f32 %v2224_v62, 0.0 }
 0x315   :  { %v3841_v48 = vpop.f32.mrf.mxu1  ;;  %2448 = vmatprep.mubr.bf16.mxu0 %v6196_v18 }
 0x316   :  { %v2225_v49 = vadd.f32 %v2217_v8, %v5605_v28  ;;  %v3842_v26 = vadd.f32 %v3841_v48, %v3840_v4  ;;  %v2079_v28 = vadd.f32 %v3808_v59, %v3768_v61  ;;  %v4235_v8 = vld [vmem:[%s5867_s5 + $0x8] sm:$0xff]   ;;  %v4251_v59 = vld [vmem:[%s5869_s7 + $0x30] ss:$8 sps:$4 sm:$0xff]  }
 0x317   :  { %v3843_v36 = vpop.f32.mrf.mxu1  ;;  %v4248_v61 = vld [vmem:[%s5869_s7 + $0x40] ss:$8 sps:$4 sm:$0xff]  }
 0x318   :  { %v2233_v24 = vmax.f32 %v2225_v49, 0.0  ;;  %v2218_v45 = vadd.f32 %v3842_v26, %v2071_v19  ;;  %v4236_v26 = vld [vmem:[%s5867_s5] sm:$0xff]  }
 0x319   :  { %v3844_v57 = vpop.f32.mrf.mxu1 }
 0x31a   :  { %v2267_v10 = vpack.c.bf16 %v2233_v24, %v2232_v39  ;;  %v3845_v13 = vadd.f32 %v3844_v57, %v3843_v36  ;;  %v2226_v21 = vadd.f32 %v2218_v45, %v5612_v2  ;;  %v2082_v2 = vadd.f32 %v3811_v58, %v3771_v55  ;;  %v4241_v36 = vld [vmem:[%s5869_s7 + $0x74] ss:$8 sps:$4 sm:$0xff]   ;;  %v4242_v39 = vld [vmem:[%s5869_s7 + $0x60] ss:$8 sps:$4 sm:$0xff]   ;;  %v4245_v45 = vld [vmem:[%s5869_s7 + $0x50] ss:$8 sps:$4 sm:$0xff]  }
 0x31b   :  { %v3846_v16 = vpop.f32.mrf.mxu1  ;;  %2817 = vmatprep.subr.bf16.mxu0 %v4241_v36  ;;  %v4247_v24 = vld [vmem:[%s5869_s7 + $0x54] ss:$8 sps:$4 sm:$0xff]   ;;  %v4250_v57 = vld [vmem:[%s5869_s7 + $0x44] ss:$8 sps:$4 sm:$0xff]   ;;  %v4257_v55 = vld [vmem:[%s5869_s7 + $0x10] ss:$8 sps:$4 sm:$0xff]  }
 0x31c   :  { %v2219_v52 = vadd.f32 %v3845_v13, %v2074_v9  ;;  %2449 = vmatmul.mubr.bf16.gmra.mxu0 %v2267_v10  ;;  %v2234_v56 = vmax.f32 %v2226_v21, 0.0  ;;  %v4253_v10 = vld [vmem:[%s5869_s7 + $0x34] ss:$8 sps:$4 sm:$0xff]   ;;  %v4256_v21 = vld [vmem:[%s5869_s7 + $0x24] ss:$8 sps:$4 sm:$0xff]  }
 0x31d   :  { %v3847_v31 = vpop.f32.mrf.mxu1  ;;  %2458 = vmatprep.mubr.bf16.mxu0 %v6196_v18  ;;  %2818 = vmatpush1.bf16.msra.mxu0 %v4239_v27  ;;  %v4262_v58 = vld [vmem:[%s5869_s7 + $0x4] ss:$8 sps:$4 sm:$0xff]  }
 0x31e   :  { %v2227_v37 = vadd.f32 %v2219_v52, %v5619_v1  ;;  %v3848_v44 = vadd.f32 %v3847_v31, %v3846_v16  ;;  %2819 = vmatprep.subr.bf16.mxu0 %v4244_v53 }
 0x31f   :  { %v3849_v6 = vpop.f32.mrf.mxu1 }
 0x320   :  { %v2235_v22 = vmax.f32 %v2227_v37, 0.0  ;;  %v2220_v32 = vadd.f32 %v3848_v44, %v2079_v28  ;;  %v4259_v37 = vld [vmem:[%s5869_s7 + $0x14] ss:$8 sps:$4 sm:$0xff]  }
 0x321   :  { %v3850_v41 = vpop.f32.mrf.mxu1  ;;  %2820 = vmatpush1.bf16.msra.mxu0 %v4242_v39 }
 0x322   :  { %v2268_v47 = vpack.c.bf16 %v2235_v22, %v2234_v56  ;;  %v3851_v60 = vadd.f32 %v3850_v41, %v3849_v6  ;;  %v2228_v3 = vadd.f32 %v2220_v32, %v5628_v33  ;;  %2821 = vmatprep.subr.bf16.mxu0 %v4247_v24  ;;  %v4260_v56 = vld [vmem:[%s5869_s7] ss:$8 sps:$4 sm:$0xff]   ;;  %s4301_s7 = smov [#allocation5]  }
 0x323   :  { %s3346_s26 = sshll.u32 %s4301_s7, 4  ;;  %s3347_s26 = int_to_ptr.vmem [resolvable:$true] %s3346_s26 }
 0x324   :  { %v2221_v46 = vadd.f32 %v3851_v60, %v2082_v2  ;;  %2459 = vmatmul.mubr.bf16.gmra.mxu0 %v2268_v47  ;;  %v2236_v7 = vmax.f32 %v2228_v3, 0.0  ;;  %s4276_s27 = scalar_lea.vmem %s3347_s26, 32  ;;  %p4281_p1 = scmp.lt.s32.totalorder %s3347_s26, %s3347_s26 }
 0x325   :  { %2468 = vmatprep.mubr.bf16.mxu0 %v6196_v18  ;;  %2822 = vmatpush1.bf16.msra.mxu0 %v4245_v45  ;;  %p4277_p0 = scmp.ne.s32.totalorder %s3347_s26, %s4276_s27  ;;  %p4282_p2 = scmp.lt.s32.totalorder %s4276_s27, %s4276_s27 }
 0x326   :  { %v2229_v38 = vadd.f32 %v2221_v46, %v5634_v14  ;;  %2823 = vmatprep.subr.bf16.mxu0 %v4250_v57 }
 0x327   :  { %p4283_p3 = por %p4282_p2, %p4281_p1 }
 0x328   :  { %v2237_v1 = vmax.f32 %v2229_v38, 0.0 }
 0x329   :  { %2824 = vmatpush1.bf16.msra.mxu0 %v4248_v61  ;;  %p4284_p4 = pnand %p4283_p3, %p4277_p0 }
 0x32a   :  { %v2269_v54 = vpack.c.bf16 %v2237_v1, %v2236_v7  ;;  %2825 = vmatprep.subr.bf16.mxu0 %v4253_v10 }
 0x32c   :  { %2469 = vmatmul.mubr.bf16.gmra.mxu0 %v2269_v54 }
 0x32d   :  { %2849 = vmatprep.mubr.bf16.mxu0 %v6196_v18  ;;  %2826 = vmatpush1.bf16.msra.mxu0 %v4251_v59 }
 0x32e   :  { %2827 = vmatprep.subr.bf16.mxu0 %v4256_v21 }
 0x331   :  { %2828 = vmatpush1.bf16.msra.mxu0 %v4254_v5 }
 0x332   :  { %2829 = vmatprep.subr.bf16.mxu0 %v4259_v37 }
 0x335   :  { %2830 = vmatpush1.bf16.msra.mxu0 %v4257_v55  ;;  %v2872_v55 = vld [vmem:[%s5870_s8] sm:$0xf] }
 0x336   :  { %2831 = vmatprep.subr.bf16.mxu0 %v4262_v58 }
 0x339   :  { %2832 = vmatpush1.bf16.msra.mxu0 %v4260_v56 }
 0x33a   :  { %3964 = vmatprep.subr.bf16.mxu0 %v4299_v35 }
 0x354   :  { %v2400_v23 = vpop.f32.mrf.mxu0 }
 0x356   :  { %v2402_v20 = vpop.f32.mrf.mxu0 }
 0x358   :  { %v2404_v30 = vpop.f32.mrf.mxu0 }
 0x359   :  { %v2481_v49 = vpack.c.bf16 %v2404_v30, %v2400_v23  ;;  %v4237_v23 = vld [vmem:[%s5867_s5 + $0x8] sm:$0xff]  }
 0x35a   :  { %v2406_v29 = vpop.f32.mrf.mxu0 }
 0x35b   :  { %v2487_v62 = vpack.c.bf16 %v2406_v29, %v2402_v20 }
 0x35c   :  { %v2410_v11 = vpop.f32.mrf.mxu0 }
 0x35e   :  { %v2412_v34 = vpop.f32.mrf.mxu0 }
 0x360   :  { %v2414_v42 = vpop.f32.mrf.mxu0 }
 0x361   :  { %v2482_v51 = vpack.c.bf16 %v2414_v42, %v2410_v11 }
 0x362   :  { %v2416_v33 = vpop.f32.mrf.mxu0 }
 0x363   :  { %v2488_v40 = vpack.c.bf16 %v2416_v33, %v2412_v34  ;;  %v4238_v34 = vld [vmem:[%s5867_s5] sm:$0xff]  }
 0x364   :  { %v2420_v17 = vpop.f32.mrf.mxu0 }
 0x366   :  { %v2422_v15 = vpop.f32.mrf.mxu0 }
 0x368   :  { %v2424_v25 = vpop.f32.mrf.mxu0 }
 0x369   :  { %v2483_v48 = vpack.c.bf16 %v2424_v25, %v2420_v17  ;;  %v2479_v25 = vld [vmem:[%s5868_s6] sm:$0xff] }
 0x36a   :  { %v2426_v63 = vpop.f32.mrf.mxu0 }
 0x36b   :  { %v2489_v4 = vpack.c.bf16 %v2426_v63, %v2422_v15 }
 0x36c   :  { %v2430_v43 = vpop.f32.mrf.mxu0 }
 0x36e   :  { %v2432_v14 = vpop.f32.mrf.mxu0 }
 0x370   :  { %v2434_v12 = vpop.f32.mrf.mxu0 }
 0x371   :  { %v2484_v19 = vpack.c.bf16 %v2434_v12, %v2430_v43 }
 0x372   :  { %v2436_v50 = vpop.f32.mrf.mxu0 }
 0x373   :  { %v2490_v0 = vpack.c.bf16 %v2436_v50, %v2432_v14  ;;  %v2480_v50 = vld [vmem:[%s5868_s6 + $0x8] sm:$0xff] }
 0x375   :  { %3899 = vmatpush3.bf16.msra.mxu1 %v2490_v0 }
 0x376   :  { %3900 = vmatprep.subr.bf16.mxu1 %v4299_v35 }
 0x379   :  { %3901 = vmatpush3.bf16.msra.mxu1 %v2489_v4 }
 0x37a   :  { %3902 = vmatprep.subr.bf16.mxu1 %v4299_v35 }
 0x37d   :  { %3903 = vmatpush3.bf16.msra.mxu1 %v2488_v40 }
 0x37e   :  { %3904 = vmatprep.subr.bf16.mxu1 %v4299_v35 }
 0x381   :  { %3905 = vmatpush3.bf16.msra.mxu1 %v2487_v62 }
 0x382   :  { %3910 = vmatprep.subr.bf16.mxu1 %v4299_v35 }
 0x384   :  { %3907 = vmatmul.mubr.msk.bf16.vlgmr.msra.gmra.mxu1 %vm2499_vm1, %v4235_v8 }
 0x385   :  { %3911 = vmatpush3.bf16.msra.mxu1 %v2484_v19  ;;  %3918 = vmatprep.mubr.msk.bf16.mxu1 %vm4300_vm0, %v4299_v35 }
 0x386   :  { %3912 = vmatprep.subr.bf16.mxu1 %v4299_v35 }
 0x389   :  { %3913 = vmatpush3.bf16.msra.mxu1 %v2483_v48 }
 0x38a   :  { %3914 = vmatprep.subr.bf16.mxu1 %v4299_v35 }
 0x38d   :  { %3915 = vmatpush3.bf16.msra.mxu1 %v2482_v51 }
 0x38e   :  { %3916 = vmatprep.subr.bf16.mxu1 %v4299_v35 }
 0x391   :  { %3917 = vmatpush3.bf16.msra.mxu1 %v2481_v49 }
 0x392   :  { %3922 = vmatprep.subr.bf16.mxu1 %v4299_v35 }
 0x394   :  { %3919 = vmatmul.mubr.msk.bf16.vlgmr.msra.gmra.mxu1 %vm2499_vm1, %v4236_v26 }
 0x395   :  { %3930 = vmatprep.mubr.msk.bf16.mxu1 %vm4300_vm0, %v4299_v35 }
 0x3d4   :  { %v2440_v9 = vpop.f32.mrf.mxu0 }
 0x3d6   :  { %v2442_v13 = vpop.f32.mrf.mxu0 }
 0x3d8   :  { %v2444_v16 = vpop.f32.mrf.mxu0 }
 0x3d9   :  { %v2599_v11 = vpack.c.bf16 %v2444_v16, %v2440_v9 }
 0x3da   :  { %v2446_v52 = vpop.f32.mrf.mxu0 }
 0x3db   :  { %v2605_v54 = vpack.c.bf16 %v2446_v52, %v2442_v13 }
 0x3dc   :  { %v2450_v28 = vpop.f32.mrf.mxu0 }
 0x3de   :  { %v2452_v31 = vpop.f32.mrf.mxu0 }
 0x3e0   :  { %v2454_v44 = vpop.f32.mrf.mxu0 }
 0x3e1   :  { %v2600_v29 = vpack.c.bf16 %v2454_v44, %v2450_v28 }
 0x3e2   :  { %v2456_v6 = vpop.f32.mrf.mxu0 }
 0x3e3   :  { %v2606_v1 = vpack.c.bf16 %v2456_v6, %v2452_v31  ;;  %v3590_v31 = vld [vmem:[%s5870_s8 + $0x4] sm:$0xf] }
 0x3e4   :  { %v2460_v22 = vpop.f32.mrf.mxu0 }
 0x3e6   :  { %v2462_v32 = vpop.f32.mrf.mxu0 }
 0x3e8   :  { %v2464_v41 = vpop.f32.mrf.mxu0 }
 0x3e9   :  { %v2601_v30 = vpack.c.bf16 %v2464_v41, %v2460_v22  ;;  %v3593_v41 = vld [vmem:[%s5870_s8 + $0x4] sm:$0xf] }
 0x3ea   :  { %v2466_v47 = vpop.f32.mrf.mxu0 }
 0x3eb   :  { %v2607_v7 = vpack.c.bf16 %v2466_v47, %v2462_v32  ;;  %v2967_v32 = vld [vmem:[%s5870_s8] sm:$0xf]  ;;  %v4263_v47 = vld [vmem:[%s5872_s10 + $0x38] sm:$0xff]  }
 0x3ec   :  { %v2470_v2 = vpop.f32.mrf.mxu0 }
 0x3ee   :  { %v2472_v60 = vpop.f32.mrf.mxu0 }
 0x3f0   :  { %v2474_v3 = vpop.f32.mrf.mxu0 }
 0x3f1   :  { %v2602_v20 = vpack.c.bf16 %v2474_v3, %v2470_v2  ;;  %v4264_v2 = vld [vmem:[%s5872_s10 + $0x30] sm:$0xff]   ;;  %v4266_v3 = vld [vmem:[%s5872_s10 + $0x20] sm:$0xff]  }
 0x3f2   :  { %v2476_v46 = vpop.f32.mrf.mxu0 }
 0x3f3   :  { %v2608_v38 = vpack.c.bf16 %v2476_v46, %v2472_v60  ;;  %v4265_v60 = vld [vmem:[%s5872_s10 + $0x28] sm:$0xff]   ;;  %v4267_v46 = vld [vmem:[%s5872_s10 + $0x18] sm:$0xff]  }
 0x3f5   :  { %3923 = vmatpush3.bf16.msra.mxu1 %v2608_v38  ;;  %v4268_v38 = vld [vmem:[%s5872_s10 + $0x10] sm:$0xff]  }
 0x3f6   :  { %3924 = vmatprep.subr.bf16.mxu1 %v4299_v35 }
 0x3f9   :  { %3925 = vmatpush3.bf16.msra.mxu1 %v2607_v7 }
 0x3fa   :  { %3926 = vmatprep.subr.bf16.mxu1 %v4299_v35 }
 0x3fd   :  { %3927 = vmatpush3.bf16.msra.mxu1 %v2606_v1  ;;  %v4269_v1 = vld [vmem:[%s5872_s10 + $0x8] sm:$0xff]  }
 0x3fe   :  { %3928 = vmatprep.subr.bf16.mxu1 %v4299_v35 }
 0x401   :  { %3929 = vmatpush3.bf16.msra.mxu1 %v2605_v54 }
 0x402   :  { %3934 = vmatprep.subr.bf16.mxu1 %v4299_v35 }
 0x404   :  { %3931 = vmatmul.mubr.msk.bf16.vlgmr.msra.gmra.mxu1 %vm2499_vm1, %v4237_v23 }
 0x405   :  { %3935 = vmatpush3.bf16.msra.mxu1 %v2602_v20  ;;  %3942 = vmatprep.mubr.msk.bf16.mxu1 %vm4300_vm0, %v4299_v35  ;;  %v4270_v20 = vld [vmem:[%s5872_s10] sm:$0xff]  }
 0x406   :  { %3936 = vmatprep.subr.bf16.mxu1 %v4299_v35 }
 0x409   :  { %3937 = vmatpush3.bf16.msra.mxu1 %v2601_v30 }
 0x40a   :  { %3938 = vmatprep.subr.bf16.mxu1 %v4299_v35 }
 0x40d   :  { %3939 = vmatpush3.bf16.msra.mxu1 %v2600_v29 }
 0x40e   :  { %3940 = vmatprep.subr.bf16.mxu1 %v4299_v35 }
 0x411   :  { %3941 = vmatpush3.bf16.msra.mxu1 %v2599_v11 }
 0x412   :  { %3946 = vmatprep.subr.bf16.mxu1 %v4299_v35 }
 0x414   :  { %3943 = vmatmul.mubr.msk.bf16.vlgmr.msra.gmra.mxu1 %vm2499_vm1, %v4238_v34  ;;  %v4271_v34 = vld [vmem:[%s5874_s12 + $0x20] sm:$0xff]  }
 0x415   :  { %3948 = vmatprep.mubr.msk.bf16.mxu1 %vm4300_vm0, %v4299_v35 }
 0x444   :  { %v2537_v42 = vpop.f32.mrf.mxu1 }
 0x446   :  { %v3908_v33 = vpop.f32.mrf.mxu1 }
 0x447   :  { %v4272_v33 = vld [vmem:[%s5874_s12 + $0x18] sm:$0xff]  }
 0x448   :  { %v2540_v17 = vpop.f32.mrf.mxu1 }
 0x44a   :  { %v3909_v15 = vpop.f32.mrf.mxu1 }
 0x454   :  { %v2586_v63 = vpop.f32.mrf.mxu1 }
 0x455   :  { %v2587_v43 = vadd.f32 %v2586_v63, %v2537_v42  ;;  %v2870_v63 = vld [vmem:[%s5871_s9] sm:$0xff] }
 0x456   :  { %v3920_v14 = vpop.f32.mrf.mxu1 }
 0x457   :  { %v2593_v12 = vadd.f32 %v2587_v43, %v2479_v25 }
 0x458   :  { %v2589_v0 = vpop.f32.mrf.mxu1 }
 0x459   :  { %v2590_v4 = vadd.f32 %v2589_v0, %v2540_v17  ;;  %v2595_v62 = vmax.f32 %v2593_v12, 0.0 }
 0x45a   :  { %v3921_v40 = vpop.f32.mrf.mxu1 }
 0x45b   :  { %v2594_v8 = vadd.f32 %v2590_v4, %v2480_v50 }
 0x45d   :  { %v2596_v19 = vmax.f32 %v2594_v8, 0.0 }
 0x45f   :  { %v2719_v48 = vpack.c.bf16 %v2596_v19, %v2595_v62 }
 0x461   :  { %2850 = vmatmul.mubr.bf16.vlgmr.msra.gmra.mxu0 %v2719_v48 }
 0x462   :  { %2859 = vmatprep.mubr.bf16.mxu0 %v6196_v18 }
 0x4c4   :  { %v2653_v51 = vpop.f32.mrf.mxu1 }
 0x4c6   :  { %v3932_v49 = vpop.f32.mrf.mxu1 }
 0x4c8   :  { %v2656_v26 = vpop.f32.mrf.mxu1 }
 0x4ca   :  { %v3933_v27 = vpop.f32.mrf.mxu1 }
 0x4cb   :  { %v4274_v27 = vld [vmem:[%s5874_s12 + $0x8] sm:$0xff]  }
 0x4d4   :  { %v2702_v36 = vpop.f32.mrf.mxu1 }
 0x4d5   :  { %v2703_v53 = vadd.f32 %v2702_v36, %v2653_v51  ;;  %v4275_v36 = vld [vmem:[%s5874_s12] sm:$0xff]  }
 0x4d6   :  { %v3944_v39 = vpop.f32.mrf.mxu1 }
 0x4d7   :  { %v2709_v45 = vadd.f32 %v2703_v53, %v2479_v25  ;;  %v4273_v25 = vld [vmem:[%s5874_s12 + $0x10] sm:$0xff]   ;;  %v3167_v39 = vld [vmem:[%s5873_s11] sm:$0xff] }
 0x4d8   :  { %v2705_v24 = vpop.f32.mrf.mxu1 }
 0x4d9   :  { %v2706_v61 = vadd.f32 %v2705_v24, %v2656_v26  ;;  %v2711_v10 = vmax.f32 %v2709_v45, 0.0  ;;  %v3168_v45 = vld [vmem:[%s5873_s11 + $0x8] sm:$0xff] }
 0x4da   :  { %v3945_v57 = vpop.f32.mrf.mxu1 }
 0x4db   :  { %v2710_v59 = vadd.f32 %v2706_v61, %v2480_v50 }
 0x4dd   :  { %v2712_v9 = vmax.f32 %v2710_v59, 0.0 }
 0x4df   :  { %v2720_v13 = vpack.c.bf16 %v2712_v9, %v2711_v10 }
 0x4e1   :  { %2860 = vmatmul.mubr.bf16.gmra.mxu0 %v2720_v13 }
 0x4e2   :  { %3966 = vmatprep.mubr.msk.bf16.mxu0 %vm4300_vm0, %v4299_v35 }
 0x521   :  { %v2851_v18 = vpop.f32.mrf.mxu0 }
 0x523   :  { %v2853_v16 = vpop.f32.mrf.mxu0 }
 0x525   :  { %v2855_v5 = vpop.f32.mrf.mxu0 }
 0x526   :  { %v2871_v28 = vpack.c.bf16 %v2855_v5, %v2851_v18  ;;  %v3257_v5 = vld [vmem:[%s5875_s13] sm:$0x3] }
 0x527   :  { %v2857_v21 = vpop.f32.mrf.mxu0 }
 0x528   :  { %v2873_v52 = vpack.c.bf16 %v2857_v21, %v2853_v16 }
 0x52a   :  { %3947 = vmatpush3.bf16.msra.mxu1 %v2873_v52  ;;  %v3610_v52 = vld [vmem:[%s5876_s14] ss:$0 sm:$0xff] }
 0x52b   :  { %3952 = vmatprep.subr.bf16.mxu1 %v4299_v35 }
 0x52d   :  { %3949 = vmatmul.mubr.msk.bf16.vlgmr.msra.gmra.mxu1 %vm2876_vm2, %v3590_v31 }
 0x52e   :  { %3953 = vmatpush3.bf16.msra.mxu1 %v2871_v28  ;;  %3954 = vmatprep.mubr.msk.bf16.mxu1 %vm4300_vm0, %v4299_v35 }
 0x52f   :  { %3958 = vmatprep.subr.bf16.mxu1 %v4299_v35 }
 0x535   :  { %3955 = vmatmul.mubr.msk.bf16.vlgmr.msra.gmra.mxu1 %vm2876_vm2, %v2872_v55 }
 0x536   :  { %3960 = vmatprep.mubr.msk.bf16.mxu1 %vm4300_vm0, %v4299_v35 }
 0x5a1   :  { %v2861_v37 = vpop.f32.mrf.mxu0 }
 0x5a3   :  { %v2863_v44 = vpop.f32.mrf.mxu0 }
 0x5a5   :  { %v2865_v58 = vpop.f32.mrf.mxu0 }
 0x5a6   :  { %v2966_v6 = vpack.c.bf16 %v2865_v58, %v2861_v37 }
 0x5a7   :  { %v2867_v56 = vpop.f32.mrf.mxu0 }
 0x5a8   :  { %v2968_v22 = vpack.c.bf16 %v2867_v56, %v2863_v44  ;;  %3965 = vmatpush3.bf16.msra.mxu0 %v2966_v6 }
 0x5a9   :  { %3990 = vmatprep.subr.bf16.mxu0 %v4299_v35 }
 0x5aa   :  { %3959 = vmatpush3.bf16.msra.mxu1 %v2968_v22 }
 0x5ab   :  { %3967 = vmatmul.mubr.msk.bf16.vlgmr.msra.gmra.mxu0 %vm2876_vm2, %v2967_v32  ;;  %3970 = vmatprep.subr.bf16.mxu1 %v4299_v35 }
 0x5ac   :  { %4000 = vmatprep.mubr.msk.bf16.mxu0 %vm4300_vm0, %v4299_v35  ;;  %3991 = vmatpush3.bf16.msra.mxu0 %v4271_v34 }
 0x5ad   :  { %3961 = vmatmul.mubr.msk.bf16.vlgmr.msra.gmra.mxu1 %vm2876_vm2, %v3593_v41  ;;  %3992 = vmatprep.subr.bf16.mxu0 %v4299_v35 }
 0x5ae   :  { %3971 = vmatpush3.bf16.msra.mxu1 %v4263_v47  ;;  %3986 = vmatprep.mubr.msk.bf16.mxu1 %vm4300_vm0, %v4299_v35 }
 0x5af   :  { %3972 = vmatprep.subr.bf16.mxu1 %v4299_v35 }
 0x5b0   :  { %3993 = vmatpush3.bf16.msra.mxu0 %v4272_v33 }
 0x5b1   :  { %3994 = vmatprep.subr.bf16.mxu0 %v4299_v35 }
 0x5b2   :  { %3973 = vmatpush3.bf16.msra.mxu1 %v4264_v2 }
 0x5b3   :  { %3974 = vmatprep.subr.bf16.mxu1 %v4299_v35 }
 0x5b4   :  { %3995 = vmatpush3.bf16.msra.mxu0 %v4273_v25 }
 0x5b5   :  { %3996 = vmatprep.subr.bf16.mxu0 %v4299_v35 }
 0x5b6   :  { %3975 = vmatpush3.bf16.msra.mxu1 %v4265_v60 }
 0x5b7   :  { %3976 = vmatprep.subr.bf16.mxu1 %v4299_v35 }
 0x5b8   :  { %3997 = vmatpush3.bf16.msra.mxu0 %v4274_v27 }
 0x5b9   :  { %3998 = vmatprep.subr.bf16.mxu0 %v4299_v35 }
 0x5ba   :  { %3977 = vmatpush3.bf16.msra.mxu1 %v4266_v3 }
 0x5bb   :  { %3978 = vmatprep.subr.bf16.mxu1 %v4299_v35 }
 0x5bc   :  { %3999 = vmatpush3.bf16.msra.mxu0 %v4275_v36 }
 0x5bd   :  { %4004 = vmatprep.subr.mxu0 %v4299_v35 }
 0x5be   :  { %3979 = vmatpush3.bf16.msra.mxu1 %v4267_v46 }
 0x5bf   :  { %3980 = vmatprep.subr.bf16.mxu1 %v4299_v35 }
 0x5c2   :  { %3981 = vmatpush3.bf16.msra.mxu1 %v4268_v38 }
 0x5c3   :  { %3982 = vmatprep.subr.bf16.mxu1 %v4299_v35 }
 0x5c6   :  { %3983 = vmatpush3.bf16.msra.mxu1 %v4269_v1 }
 0x5c7   :  { %3984 = vmatprep.subr.bf16.mxu1 %v4299_v35 }
 0x5ca   :  { %3985 = vmatpush3.bf16.msra.mxu1 %v4270_v20 }
 0x5ed   :  { %v2914_v7 = vpop.f32.mrf.mxu1 }
 0x5ef   :  { %v3950_v54 = vpop.f32.mrf.mxu1 }
 0x5f1   :  { %v2917_v23 = vpop.f32.mrf.mxu1 }
 0x5f3   :  { %v3951_v30 = vpop.f32.mrf.mxu1 }
 0x5f5   :  { %v2957_v29 = vpop.f32.mrf.mxu1 }
 0x5f6   :  { %v2958_v11 = vadd.f32 %v2957_v29, %v2914_v7 }
 0x5f7   :  { %v3956_v42 = vpop.f32.mrf.mxu1 }
 0x5f8   :  { %v2963_v50 = vadd.f32 %v2958_v11, %v2870_v63 }
 0x5f9   :  { %v2960_v17 = vpop.f32.mrf.mxu1 }
 0x5fa   :  { %v2964_v48 = vmax.f32 %v2963_v50, 0.0 }
 0x5fb   :  { %v3957_v15 = vpop.f32.mrf.mxu1 }
 0x66b   :  { %v3050_v43 = vpop.f32.mrf.mxu0 }
 0x66d   :  { %v3007_v14 = vpop.f32.mrf.mxu1  ;;  %v3968_v12 = vpop.f32.mrf.mxu0 }
 0x66e   :  { %v3051_v0 = vadd.f32 %v3050_v43, %v3007_v14 }
 0x66f   :  { %v3962_v4 = vpop.f32.mrf.mxu1  ;;  %v3053_v40 = vpop.f32.mrf.mxu0 }
 0x670   :  { %v3056_v62 = vadd.f32 %v3051_v0, %v2870_v63 }
 0x671   :  { %v3010_v8 = vpop.f32.mrf.mxu1  ;;  %v3969_v19 = vpop.f32.mrf.mxu0 }
 0x672   :  { %v3057_v51 = vmax.f32 %v3056_v62, 0.0 }
 0x673   :  { %v3963_v49 = vpop.f32.mrf.mxu1 }
 0x674   :  { %v3061_v26 = vpack.c.bf16 %v3057_v51, %v2964_v48 }
 0x676   :  { %3987 = vmatmul.mubr.bf16.vlgmr.msra.gmra.mxu1 %v3061_v26 }
 0x736   :  { %v3160_v53 = vpop.f32.mrf.mxu1 }
 0x737   :  { %v3169_v57 = vmul.f32 %v3167_v39, %v3160_v53 }
 0x738   :  { %v3988_v24 = vpop.f32.mrf.mxu1 }
 0x73a   :  { %v3163_v61 = vpop.f32.mrf.mxu1 }
 0x73b   :  { %v3170_v59 = vmul.f32 %v3168_v45, %v3163_v61 }
 0x73c   :  { %v3989_v10 = vpop.f32.mrf.mxu1 }
 0x73d   :  { %v3171_v9 = vpack.c.bf16 %v3170_v59, %v3169_v57 }
 0x73f   :  { %4001 = vmatmul.mubr.msk.bf16.vlgmr.msra.gmra.mxu0 %vm3212_vm3, %v3171_v9 }
 0x740   :  { %4008 = vmatprep.mubr.msk.f32.mxu0 %vm4300_vm0, %v4299_v35 }
 0x7ff   :  { %v3250_v13 = vpop.f32.mrf.mxu0 }
 0x801   :  { %v4002_v18 = vpop.f32.mrf.mxu0 }
 0x803   :  { %v3253_v16 = vpop.f32.mrf.mxu0 }
 0x804   :  { %4005 = vmatpush3.msra.mxu0 %v3253_v16 }
 0x805   :  { %v4003_v21 = vpop.f32.mrf.mxu0  ;;  %4006 = vmatprep.subr.mxu0 %v4299_v35 }
 0x806   :  { %4007 = vmatpush3.msra.mxu0 %v3250_v13 }
 0x807   :  { %4009 = vmatmul.mubr.msk.f32.vlgmr.msra.gmra.mxu0 %vm2876_vm2, %v3257_v5 }
 0x8c7   :  { %v3334_v28 = vpop.f32.mrf.mxu0 }
 0x8c8   :  { %v3335_v31 = vadd.f32 %v3610_v52, %v3334_v28 }
 0x8c9   :  { %v4010_v55 = vpop.f32.mrf.mxu0 }
 0x8ca   :  { %3339 = vst.msk [vmem:[#allocation5] sm:$0x3] %vm3338_vm4, %v3335_v31 }
 0x8cb   :  { %4287 = shalt.err (!%p4284_p4)
}
 0x8cc   :  { %3349 = dma.vmem_to_hbm [thread:$0]  %s3347_s26, 32, %s5877_s15, [#allocation6]  }
 0x8cd   :  { %4296 = dma.done.wait [#allocation6], 32  }
 0x8ce   :  { %4297 = vsyncadd [#allocation6], 4294967264 }
 0x8cf   :  { %3353 = vsyncpa [#allocation6], 1 }

</bundles_post_ra>
